<compile_context>
chip_gen: v7x
topology: tpu7x:2x2x1
jax: 0.10.0
libtpu: 0.0.40
codegen_flags: <defaults>
</compile_context>

<pallas_src>
import functools

import jax
import jax.numpy as jnp
from jax.experimental import pallas as pl
from jax.experimental.pallas import tpu as pltpu

EPS_BN = 1e-5
EPS_GUMBEL = 1e-8
TEMP_TEST = 0.01  # LWTA eval temperature


# ---------------------------------------------------------------------------
# small helpers
# ---------------------------------------------------------------------------
def _round_up(x, m):
    return (x + m - 1) // m * m


def _pad2(x, rows, cols):
    r, c = x.shape
    if (r, c) == (rows, cols):
        return x
    return jnp.pad(x, ((0, rows - r), (0, cols - c)))


def grouped_dims(c):
    """Grouped channel layout for c channels (U=2 pairs).

    Returns (g, hp): total lane width g (multiple of 128) and the half-slot
    stride hp.  Pair member a of pair j lives at column j, member b at column
    hp + j.  For small channel counts both halves share one 128-lane group
    (no per-half padding blow-up); per-half 128 alignment is only used when it
    costs no extra width."""
    ch = c // 2
    hp = _round_up(ch, 128)
    if 2 * hp > _round_up(2 * ch, 128):
        hp = ch                      # pack both halves into shared lane groups
    return _round_up(2 * hp, 128), hp


def group_cols(m, c):
    """Reorder the last axis (natural interleaved channels, length c) into the
    grouped layout [pair-member-a | pair-member-b], zero padded to width
    grouped_dims(c)[0].  One-time / XLA-side layout plumbing."""
    assert c % 2 == 0
    ch = c // 2
    g, hp = grouped_dims(c)
    out = jnp.zeros(m.shape[:-1] + (g,), m.dtype)
    out = out.at[..., :ch].set(m[..., 0::2])
    out = out.at[..., hp:hp + ch].set(m[..., 1::2])
    return out


def group_rows(m, c):
    """Grouped layout applied to the second-to-last axis (input channels)."""
    return jnp.swapaxes(group_cols(jnp.swapaxes(m, -1, -2), c), -1, -2)


def grouped_in_3x3(w_conv):
    """(Cout, Cin, 3, 3) conv weight -> (9 * g_in, Cout) matmul weight with row
    order (kh, kw, grouped_cin), matching im2col of a grouped-layout
    activation."""
    c_out, c_in = w_conv.shape[0], w_conv.shape[1]
    w = jnp.transpose(w_conv, (2, 3, 0, 1))          # (3, 3, Cout, Cin)
    wg = group_cols(w, c_in)                         # (3, 3, Cout, Gi)
    wg = jnp.transpose(wg, (0, 1, 3, 2))             # (3, 3, Gi, Cout)
    return wg.reshape(9 * wg.shape[2], c_out)


# ---------------------------------------------------------------------------
# Pallas kernels
# ---------------------------------------------------------------------------
def bn_lwta_kernel(x_ref, noise_ref, scale_ref, shift_ref, o_ref, *,
                   inv_temp, hp):
    """Fused BatchNorm(eval) + LWTA(U=2) Gumbel-softmax gating on a grouped
    layout block: columns [0:hp) hold pair member a, [hp:2*hp) member b.

    gate_a = softmax_pair((a + G_a)/T, (b + G_b)/T)[0]
           = sigmoid((a - b + (G_a - G_b)) / T),  noise_ref holds G_a - G_b.
    """
    a = x_ref[...].astype(jnp.float32) * scale_ref[...] + shift_ref[...]
    aa = a[:, :hp]
    ab = a[:, hp:2 * hp]

    d = (aa - ab + noise_ref[...].astype(jnp.float32)) * inv_temp
    pos = d >= 0.0
    z = jnp.exp(jnp.where(pos, -d, d))                # exp of a non-positive
    inv = 1.0 / (1.0 + z)
    gate_a = jnp.where(pos, inv, z * inv)             # stable sigmoid(d)

    o_ref[:, :hp] = (aa * gate_a).astype(o_ref.dtype)
    o_ref[:, hp:2 * hp] = (ab * (1.0 - gate_a)).astype(o_ref.dtype)
    g = o_ref.shape[-1]
    if g > 2 * hp:                                    # static tail padding
        o_ref[:, 2 * hp:] = jnp.zeros((o_ref.shape[0], g - 2 * hp),
                                      o_ref.dtype)


def matmul_kernel(a_ref, w_ref, o_ref, acc_ref):
    @pl.when(pl.program_id(2) == 0)
    def _init():
        acc_ref[...] = jnp.zeros_like(acc_ref)

    acc_ref[...] += jnp.dot(a_ref[...], w_ref[...],
                            preferred_element_type=jnp.float32)

    @pl.when(pl.program_id(2) == pl.num_programs(2) - 1)
    def _store():
        o_ref[...] = acc_ref[...].astype(o_ref.dtype)


def matmul_add_kernel(a_ref, w_ref, r_ref, o_ref, acc_ref):
    @pl.when(pl.program_id(2) == 0)
    def _init():
        acc_ref[...] = jnp.zeros_like(acc_ref)

    acc_ref[...] += jnp.dot(a_ref[...], w_ref[...],
                            preferred_element_type=jnp.float32)

    @pl.when(pl.program_id(2) == pl.num_programs(2) - 1)
    def _store():
        o_ref[...] = (acc_ref[...] + r_ref[...].astype(jnp.float32)
                      ).astype(o_ref.dtype)


# ---------------------------------------------------------------------------
# pallas_call wrappers
# ---------------------------------------------------------------------------
def bn_lwta(x_g, scale_g, shift_g, key, temperature, hp,
            out_dtype=jnp.bfloat16):
    """x_g: (R, G) grouped-layout activations (bf16); scale/shift: (1, G) f32.
    Returns (R, G) grouped-layout gated activations (bf16)."""
    r, g = x_g.shape

    # VMEM-budget-based row tile (x + out + noise blocks, double-buffered).
    per_row = g * (x_g.dtype.itemsize + jnp.dtype(out_dtype).itemsize) + 2 * hp
    budget = 8 * 1024 * 1024
    tr = min(1024, _round_up(r, 8),
             max(8, (budget // (2 * per_row)) // 8 * 8))
    rp = _round_up(r, tr)
    if rp != r:
        x_g = jnp.pad(x_g, ((0, rp - r), (0, 0)))

    # Host-side Gumbel noise (exact reference formula), streamed as bf16.
    k1, k2 = jax.random.split(key)
    u1 = jax.random.uniform(k1, (rp, hp), jnp.float32)
    u2 = jax.random.uniform(k2, (rp, hp), jnp.float32)
    ga = -jnp.log(-jnp.log(u1 + EPS_GUMBEL) + EPS_GUMBEL)
    gb = -jnp.log(-jnp.log(u2 + EPS_GUMBEL) + EPS_GUMBEL)
    noise = (ga - gb).astype(jnp.bfloat16)

    kern = functools.partial(bn_lwta_kernel,
                             inv_temp=float(1.0 / temperature), hp=hp)
    out = pl.pallas_call(
        kern,
        out_shape=jax.ShapeDtypeStruct((rp, g), out_dtype),
        grid=(rp // tr,),
        in_specs=[pl.BlockSpec((tr, g), lambda i: (i, 0)),
                  pl.BlockSpec((tr, hp), lambda i: (i, 0)),
                  pl.BlockSpec((1, g), lambda i: (0, 0)),
                  pl.BlockSpec((1, g), lambda i: (0, 0))],
        out_specs=pl.BlockSpec((tr, g), lambda i: (i, 0)),
        compiler_params=pltpu.CompilerParams(
            dimension_semantics=("parallel",)),
        cost_estimate=pl.CostEstimate(
            flops=2 * rp * g + 9 * rp * hp,
            transcendentals=2 * rp * hp,
            bytes_accessed=rp * g * (x_g.dtype.itemsize
                                     + jnp.dtype(out_dtype).itemsize)
                           + 2 * rp * hp + 2 * g * 4),
    )(x_g, noise, scale_g, shift_g)
    return out[:r] if rp != r else out


def _pick_tile(dim, cap):
    """Largest multiple of 128 that divides `dim` and is <= cap."""
    best, t = 128, 128
    while t <= min(cap, dim):
        if dim % t == 0:
            best = t
        t += 128
    return best


def _matmul_tiles(m, k, n):
    kp = _round_up(k, 128)
    tk = _pick_tile(kp, 512)
    np_ = _round_up(n, 128)
    tn = _pick_tile(np_, 512)
    if tn == 128 and np_ >= 512:          # keep N tiles >= 256 for 256x256 MXU
        np_ = _round_up(np_, 256)
        tn = _pick_tile(np_, 512)

    mp = _round_up(m, 8)
    tm, t = 8, 8
    while t <= min(512, mp):              # largest divisor of mp, <= 512
        if mp % t == 0:
            tm = t
        t += 8
    if tm < 128 and mp > 512:             # poor divisor structure -> pad M
        tm = 512
        mp = _round_up(mp, tm)
    # v7x megacore: keep >= 2 parallel grid points when the shape allows it.
    if (mp // tm) * (np_ // tn) < 2 and tm >= 256 and tm % 16 == 0:
        tm //= 2
    return mp, kp, np_, tm, tk, tn


def conv_matmul(a, w, residual=None, *, out_dtype=jnp.float32):
    """Tiled MXU matmul out = a @ w (+ residual).  a/w/residual are streamed
    as bf16; accumulation happens in an f32 VMEM scratch.  The residual block
    is resident across the K loop (k-independent BlockSpec) and added on the
    last K step."""
    m, k = a.shape
    k2, n = w.shape
    assert k == k2
    mp, kp, np_, tm, tk, tn = _matmul_tiles(m, k, n)
    a_p = _pad2(a.astype(jnp.bfloat16), mp, kp)
    w_p = _pad2(w.astype(jnp.bfloat16), kp, np_)
    grid = (mp // tm, np_ // tn, kp // tk)

    a_spec = pl.BlockSpec((tm, tk), lambda i, j, kk: (i, kk))
    w_spec = pl.BlockSpec((tk, tn), lambda i, j, kk: (kk, j))
    o_spec = pl.BlockSpec((tm, tn), lambda i, j, kk: (i, j))

    flops = 2 * mp * kp * np_
    out_b = jnp.dtype(out_dtype).itemsize
    if residual is None:
        kern, in_specs, ops = matmul_kernel, [a_spec, w_spec], (a_p, w_p)
        bytes_acc = 2 * mp * kp + 2 * kp * np_ + out_b * mp * np_
    else:
        r_p = _pad2(residual.astype(jnp.bfloat16), mp, np_)
        r_spec = pl.BlockSpec((tm, tn), lambda i, j, kk: (i, j))
        kern = matmul_add_kernel
        in_specs, ops = [a_spec, w_spec, r_spec], (a_p, w_p, r_p)
        bytes_acc = 2 * mp * kp + 2 * kp * np_ + (2 + out_b) * mp * np_

    out = pl.pallas_call(
        kern,
        out_shape=jax.ShapeDtypeStruct((mp, np_), out_dtype),
        grid=grid,
        in_specs=in_specs,
        out_specs=o_spec,
        scratch_shapes=[pltpu.VMEM((tm, tn), jnp.float32)],
        compiler_params=pltpu.CompilerParams(
            dimension_semantics=("parallel", "parallel", "arbitrary"),
            vmem_limit_bytes=40 * 1024 * 1024),
        cost_estimate=pl.CostEstimate(flops=flops, transcendentals=0,
                                      bytes_accessed=bytes_acc),
    )(*ops)
    return out if (mp, np_) == (m, n) else out[:m, :n]


# ---------------------------------------------------------------------------
# JAX glue: im2col, parameter init, full block forward
# ---------------------------------------------------------------------------
def im2col_3x3(x_nhwc, stride):
    """3x3, padding=1 patches. Returns (N*Ho*Wo, 9*C), Ho, Wo.
    TODO(synk): fold this into the conv matmul kernel (9 shifted windows
    accumulated in the scratch) to kill the 9x HBM blow-up."""
    n, h, w, c = x_nhwc.shape
    xp = jnp.pad(x_nhwc, ((0, 0), (1, 1), (1, 1), (0, 0)))
    ho = (h + 2 - 3) // stride + 1
    wo = (w + 2 - 3) // stride + 1
    cols = []
    for kh in range(3):
        for kw in range(3):
            cols.append(xp[:, kh:kh + (ho - 1) * stride + 1:stride,
                           kw:kw + (wo - 1) * stride + 1:stride, :])
    patches = jnp.stack(cols, axis=3)            # (N, Ho, Wo, 9, C)
    return patches.reshape(n * ho * wo, 9 * c), ho, wo


def init_basic_block(key, in_planes, out_planes):
    ks = jax.random.split(key, 12)
    p = {}
    p["bn1_gamma"] = 1.0 + 0.1 * jax.random.normal(ks[0], (in_planes,), jnp.float32)
    p["bn1_beta"] = 0.1 * jax.random.normal(ks[1], (in_planes,), jnp.float32)
    p["bn1_mean"] = 0.1 * jax.random.normal(ks[2], (in_planes,), jnp.float32)
    p["bn1_var"] = 1.0 + 0.1 * jax.random.uniform(ks[3], (in_planes,), jnp.float32)
    p["bn2_gamma"] = 1.0 + 0.1 * jax.random.normal(ks[4], (out_planes,), jnp.float32)
    p["bn2_beta"] = 0.1 * jax.random.normal(ks[5], (out_planes,), jnp.float32)
    p["bn2_mean"] = 0.1 * jax.random.normal(ks[6], (out_planes,), jnp.float32)
    p["bn2_var"] = 1.0 + 0.1 * jax.random.uniform(ks[7], (out_planes,), jnp.float32)
    std1 = (2.0 / (in_planes * 9)) ** 0.5
    p["conv1_w"] = std1 * jax.random.normal(ks[8], (out_planes, in_planes, 3, 3), jnp.float32)
    std2 = (2.0 / (out_planes * 9)) ** 0.5
    p["conv2_w"] = std2 * jax.random.normal(ks[9], (out_planes, out_planes, 3, 3), jnp.float32)
    stds = (2.0 / in_planes) ** 0.5
    p["convs_w"] = stds * jax.random.normal(ks[10], (out_planes, in_planes, 1, 1), jnp.float32)
    return p


def basic_block_forward(params, x_nchw, key, *, in_planes, out_planes, stride):
    n, c, h, w = x_nchw.shape
    assert c == in_planes and in_planes % 2 == 0 and out_planes % 2 == 0
    equal_in_out = (in_planes == out_planes)
    if equal_in_out:
        assert stride == 1, "identity shortcut requires stride 1"

    g_in, hp_in = grouped_dims(in_planes)
    g_out, hp_out = grouped_dims(out_planes)

    # NOTE: in a full-Net composition this NCHW -> grouped-NHWC relayout is
    # done once at the stem; activations stay grouped between blocks.
    x_nhwc = jnp.transpose(x_nchw, (0, 2, 3, 1)).astype(jnp.float32)
    x2d = x_nhwc.reshape(n * h * w, c)
    x_g = group_cols(x2d, c).astype(jnp.bfloat16)         # (R, g_in) bf16

    k1, k2 = jax.random.split(key)

    # ---- lwta1(bn1(x)) : fused kernel, grouped layout, bf16 output ---------
    s1 = params["bn1_gamma"] / jnp.sqrt(params["bn1_var"] + EPS_BN)
    b1 = params["bn1_beta"] - params["bn1_mean"] * s1
    act1_g = bn_lwta(x_g, group_cols(s1.reshape(1, -1), in_planes),
                     group_cols(b1.reshape(1, -1), in_planes),
                     k1, TEMP_TEST, hp_in)                 # (R, g_in) bf16
    act1 = act1_g.reshape(n, h, w, g_in)

    # ---- conv1 (3x3, stride, pad=1, no bias), grouped in & out channels ----
    patches1, ho, wo = im2col_3x3(act1, stride)            # (R1, 9*g_in) bf16
    w1 = group_cols(grouped_in_3x3(params["conv1_w"]), out_planes)
    out1_g = conv_matmul(patches1, w1, out_dtype=jnp.bfloat16)  # (R1, g_out)

    # ---- lwta2(bn2(.)) -----------------------------------------------------
    s2 = params["bn2_gamma"] / jnp.sqrt(params["bn2_var"] + EPS_BN)
    b2 = params["bn2_beta"] - params["bn2_mean"] * s2
    act2_g = bn_lwta(out1_g, group_cols(s2.reshape(1, -1), out_planes),
                     group_cols(b2.reshape(1, -1), out_planes),
                     k2, TEMP_TEST, hp_out)                # (R1, g_out) bf16
    act2 = act2_g.reshape(n, ho, wo, g_out)

    # ---- residual (bf16, upcast inside the fused add kernel) ---------------
    if equal_in_out:
        res = x2d.astype(jnp.bfloat16)                     # (R1, Cout)
    else:
        xs = act1[:, ::stride, ::stride, :].reshape(n * ho * wo, g_in)
        ws = group_rows(params["convs_w"][:, :, 0, 0].T, in_planes)
        res = conv_matmul(xs, ws, out_dtype=jnp.bfloat16)  # (R1, Cout)

    # ---- conv2 (3x3, stride 1, pad 1) + residual add (fused in kernel) -----
    patches2, _, _ = im2col_3x3(act2, 1)                   # (R1, 9*g_out) bf16
    w2 = grouped_in_3x3(params["conv2_w"])                 # (9*g_out, Cout)
    out2 = conv_matmul(patches2, w2, residual=res,
                       out_dtype=jnp.float32)              # (R1, Cout) f32

    out = out2.reshape(n, ho, wo, out_planes)
    return jnp.transpose(out, (0, 3, 1, 2))                # back to NCHW


# ---------------------------------------------------------------------------
if __name__ == "__main__":
    key = jax.random.PRNGKey(0)
    kparam, kx, knoise, kparam2, knoise2 = jax.random.split(key, 5)

    fwd = jax.jit(basic_block_forward,
                  static_argnames=("in_planes", "out_planes", "stride"))

    # Case 1: in_planes != out_planes, stride 2 (convShortcut branch)
    in_planes, out_planes, stride = 4, 8, 2
    params = init_basic_block(kparam, in_planes, out_planes)
    x = jax.random.normal(kx, (2, in_planes, 16, 16), jnp.float32)
    y = fwd(params, x, knoise, in_planes=in_planes,
            out_planes=out_planes, stride=stride)
    y = jax.block_until_ready(y)
    assert y.shape == (2, out_planes, 8, 8)
    assert bool(jnp.all(jnp.isfinite(y)))

    # Case 2: equalInOut, stride 1 (identity shortcut branch)
    params_eq = init_basic_block(kparam2, 4, 4)
    y2 = fwd(params_eq, x, knoise2, in_planes=4, out_planes=4, stride=1)
    y2 = jax.block_until_ready(y2)
    assert y2.shape == (2, 4, 16, 16)
    assert bool(jnp.all(jnp.isfinite(y2)))

    print("KERNEL_OK")
</pallas_src>

<mosaic_0001>
module attributes {stable_mosaic.version = 11 : i64} {
  func.func @bn_lwta_kernel(%arg0: i32, %arg1: memref<512x128xbf16, #tpu.memory_space<vmem>>, %arg2: memref<512x2xbf16, #tpu.memory_space<vmem>>, %arg3: memref<1x128xf32, #tpu.memory_space<vmem>>, %arg4: memref<1x128xf32, #tpu.memory_space<vmem>>, %arg5: memref<512x128xbf16, #tpu.memory_space<vmem>>) attributes {dimension_semantics = [#tpu.dimension_semantics<parallel>], iteration_bounds = array<i64: 1>, scalar_prefetch = 0 : i64, scratch_operands = 0 : i64, tpu.core_type = #tpu.core_type<tc>, window_params = [{transform_indices = @transform_0, window_bounds = array<i64: 512, 128>}, {transform_indices = @transform_1, window_bounds = array<i64: 512, 2>}, {pipeline_mode = #tpu.pipeline_mode<synchronous>, transform_indices = @transform_2, window_bounds = array<i64: 1, 128>}, {pipeline_mode = #tpu.pipeline_mode<synchronous>, transform_indices = @transform_3, window_bounds = array<i64: 1, 128>}, {transform_indices = @transform_4, window_bounds = array<i64: 512, 128>}]} {
    %c0 = arith.constant 0 : index
    %c0_0 = arith.constant 0 : index
    %0 = vector.load %arg1[%c0, %c0_0] : memref<512x128xbf16, #tpu.memory_space<vmem>>, vector<512x128xbf16>
    %1 = arith.extf %0 : vector<512x128xbf16> to vector<512x128xf32>
    %c0_1 = arith.constant 0 : index
    %c0_2 = arith.constant 0 : index
    %2 = vector.load %arg3[%c0_1, %c0_2] : memref<1x128xf32, #tpu.memory_space<vmem>>, vector<1x128xf32>
    %3 = vector.broadcast %2 : vector<1x128xf32> to vector<512x128xf32>
    %4 = arith.mulf %1, %3 : vector<512x128xf32>
    %c0_3 = arith.constant 0 : index
    %c0_4 = arith.constant 0 : index
    %5 = vector.load %arg4[%c0_3, %c0_4] : memref<1x128xf32, #tpu.memory_space<vmem>>, vector<1x128xf32>
    %6 = vector.broadcast %5 : vector<1x128xf32> to vector<512x128xf32>
    %7 = arith.addf %4, %6 : vector<512x128xf32>
    %8 = vector.extract_strided_slice %7 {offsets = [0, 0], sizes = [512, 2], strides = [1, 1]} : vector<512x128xf32> to vector<512x2xf32>
    %9 = vector.extract_strided_slice %7 {offsets = [0, 2], sizes = [512, 2], strides = [1, 1]} : vector<512x128xf32> to vector<512x2xf32>
    %10 = arith.subf %8, %9 : vector<512x2xf32>
    %c0_5 = arith.constant 0 : index
    %c0_6 = arith.constant 0 : index
    %11 = vector.load %arg2[%c0_5, %c0_6] : memref<512x2xbf16, #tpu.memory_space<vmem>>, vector<512x2xbf16>
    %12 = arith.extf %11 : vector<512x2xbf16> to vector<512x2xf32>
    %13 = arith.addf %10, %12 : vector<512x2xf32>
    %cst = arith.constant 1.000000e+02 : f32
    %14 = vector.broadcast %cst : f32 to vector<512x2xf32>
    %15 = arith.mulf %13, %14 : vector<512x2xf32>
    %cst_7 = arith.constant 0.000000e+00 : f32
    %16 = vector.broadcast %cst_7 : f32 to vector<512x2xf32>
    %17 = arith.cmpf oge, %15, %16 : vector<512x2xf32>
    %cst_8 = arith.constant 0.000000e+00 : f32
    %18 = vector.broadcast %cst_8 : f32 to vector<512x2xf32>
    %19 = arith.subf %18, %15 : vector<512x2xf32>
    %20 = arith.select %17, %19, %15 : vector<512x2xi1>, vector<512x2xf32>
    %21 = math.exp %20 : vector<512x2xf32>
    %cst_9 = arith.constant 1.000000e+00 : f32
    %22 = vector.broadcast %cst_9 : f32 to vector<512x2xf32>
    %23 = arith.addf %22, %21 : vector<512x2xf32>
    %cst_10 = arith.constant 1.000000e+00 : f32
    %24 = vector.broadcast %cst_10 : f32 to vector<512x2xf32>
    %25 = arith.divf %24, %23 : vector<512x2xf32>
    %26 = arith.mulf %21, %25 : vector<512x2xf32>
    %27 = arith.select %17, %25, %26 : vector<512x2xi1>, vector<512x2xf32>
    %28 = arith.mulf %8, %27 : vector<512x2xf32>
    %29 = arith.truncf %28 : vector<512x2xf32> to vector<512x2xbf16>
    %c0_11 = arith.constant 0 : index
    %c0_12 = arith.constant 0 : index
    %30 = vector.load %arg5[%c0_11, %c0_12] : memref<512x128xbf16, #tpu.memory_space<vmem>>, vector<512x2xbf16>
    tpu.vector_store %arg5[%c0_11, %c0_12], %29 {strides = array<i32>} : memref<512x128xbf16, #tpu.memory_space<vmem>>, vector<512x2xbf16>,
    %cst_13 = arith.constant 1.000000e+00 : f32
    %31 = vector.broadcast %cst_13 : f32 to vector<512x2xf32>
    %32 = arith.subf %31, %27 : vector<512x2xf32>
    %33 = arith.mulf %9, %32 : vector<512x2xf32>
    %34 = arith.truncf %33 : vector<512x2xf32> to vector<512x2xbf16>
    %c0_14 = arith.constant 0 : index
    %c2 = arith.constant 2 : index
    %35 = vector.load %arg5[%c0_14, %c2] : memref<512x128xbf16, #tpu.memory_space<vmem>>, vector<512x2xbf16>
    tpu.vector_store %arg5[%c0_14, %c2], %34 {strides = array<i32>} : memref<512x128xbf16, #tpu.memory_space<vmem>>, vector<512x2xbf16>,
    %cst_15 = arith.constant 0.000000e+00 : bf16
    %36 = vector.broadcast %cst_15 : bf16 to vector<512x124xbf16>
    %c0_16 = arith.constant 0 : index
    %c4 = arith.constant 4 : index
    %37 = vector.load %arg5[%c0_16, %c4] : memref<512x128xbf16, #tpu.memory_space<vmem>>, vector<512x124xbf16>
    tpu.vector_store %arg5[%c0_16, %c4], %36 {strides = array<i32>} : memref<512x128xbf16, #tpu.memory_space<vmem>>, vector<512x124xbf16>,
    return
  }
  func.func @transform_0(%arg0: i32) -> (i32, i32) {
    %c0_i32 = arith.constant 0 : i32
    %c0_i32_0 = arith.constant 0 : i32
    return %arg0, %c0_i32 : i32, i32
  }
  func.func @transform_1(%arg0: i32) -> (i32, i32) {
    %c0_i32 = arith.constant 0 : i32
    %c0_i32_0 = arith.constant 0 : i32
    return %arg0, %c0_i32 : i32, i32
  }
  func.func @transform_2(%arg0: i32) -> (i32, i32) {
    %c0_i32 = arith.constant 0 : i32
    %c0_i32_0 = arith.constant 0 : i32
    %c0_i32_1 = arith.constant 0 : i32
    return %c0_i32, %c0_i32_0 : i32, i32
  }
  func.func @transform_3(%arg0: i32) -> (i32, i32) {
    %c0_i32 = arith.constant 0 : i32
    %c0_i32_0 = arith.constant 0 : i32
    %c0_i32_1 = arith.constant 0 : i32
    return %c0_i32, %c0_i32_0 : i32, i32
  }
  func.func @transform_4(%arg0: i32) -> (i32, i32) {
    %c0_i32 = arith.constant 0 : i32
    %c0_i32_0 = arith.constant 0 : i32
    return %arg0, %c0_i32 : i32, i32
  }
}

module attributes {stable_mosaic.version = 11 : i64} {
  func.func @matmul_kernel(%arg0: i32, %arg1: i32, %arg2: i32, %arg3: memref<128x384xbf16, #tpu.memory_space<vmem>>, %arg4: memref<384x128xbf16, #tpu.memory_space<vmem>>, %arg5: memref<128x128xbf16, #tpu.memory_space<vmem>>, %arg6: memref<128x128xf32, #tpu.memory_space<vmem>>) attributes {dimension_semantics = [#tpu.dimension_semantics<parallel>, #tpu.dimension_semantics<parallel>, #tpu.dimension_semantics<arbitrary>], iteration_bounds = array<i64: 1, 1, 3>, scalar_prefetch = 0 : i64, scratch_operands = 1 : i64, tpu.core_type = #tpu.core_type<tc>, window_params = [{transform_indices = @transform_0, window_bounds = array<i64: 128, 384>}, {transform_indices = @transform_1, window_bounds = array<i64: 384, 128>}, {transform_indices = @transform_2, window_bounds = array<i64: 128, 128>}]} {
    %c0_i32 = arith.constant 0 : i32
    %0 = arith.cmpi eq, %arg2, %c0_i32 : i32
    %1 = arith.extui %0 : i1 to i32
    %c0_i32_0 = arith.constant 0 : i32
    %2 = arith.cmpi ne, %1, %c0_i32_0 : i32
    scf.if %2 {
      %cst_9 = arith.constant 0.000000e+00 : f32
      %12 = vector.broadcast %cst_9 : f32 to vector<128x128xf32>
      %c0_10 = arith.constant 0 : index
      %c0_11 = arith.constant 0 : index
      %13 = vector.load %arg6[%c0_10, %c0_11] : memref<128x128xf32, #tpu.memory_space<vmem>>, vector<128x128xf32>
      tpu.vector_store %arg6[%c0_10, %c0_11], %12 {strides = array<i32>} : memref<128x128xf32, #tpu.memory_space<vmem>>, vector<128x128xf32>,
    } else {
    }
    %c0 = arith.constant 0 : index
    %c0_1 = arith.constant 0 : index
    %3 = vector.load %arg6[%c0, %c0_1] : memref<128x128xf32, #tpu.memory_space<vmem>>, vector<128x128xf32>
    %c0_2 = arith.constant 0 : index
    %c0_3 = arith.constant 0 : index
    %4 = vector.load %arg3[%c0_2, %c0_3] : memref<128x384xbf16, #tpu.memory_space<vmem>>, vector<128x384xbf16>
    %c0_4 = arith.constant 0 : index
    %c0_5 = arith.constant 0 : index
    %5 = vector.load %arg4[%c0_4, %c0_5] : memref<384x128xbf16, #tpu.memory_space<vmem>>, vector<384x128xbf16>
    %cst = arith.constant dense<0.000000e+00> : vector<128x128xf32>
    %6 = tpu.matmul %4, %5, %cst {dimension_numbers = #tpu.dot_dimension_numbers<[1], [0], [0], [1], [0, 0, 1, 1], [], []>} : vector<128x384xbf16>, vector<384x128xbf16>, vector<128x128xf32> -> vector<128x128xf32>
    %7 = arith.addf %3, %6 : vector<128x128xf32>
    %c0_6 = arith.constant 0 : index
    %c0_7 = arith.constant 0 : index
    %8 = vector.load %arg6[%c0_6, %c0_7] : memref<128x128xf32, #tpu.memory_space<vmem>>, vector<128x128xf32>
    tpu.vector_store %arg6[%c0_6, %c0_7], %7 {strides = array<i32>} : memref<128x128xf32, #tpu.memory_space<vmem>>, vector<128x128xf32>,
    %c2_i32 = arith.constant 2 : i32
    %9 = arith.cmpi eq, %arg2, %c2_i32 : i32
    %10 = arith.extui %9 : i1 to i32
    %c0_i32_8 = arith.constant 0 : i32
    %11 = arith.cmpi ne, %10, %c0_i32_8 : i32
    scf.if %11 {
      %c0_9 = arith.constant 0 : index
      %c0_10 = arith.constant 0 : index
      %12 = vector.load %arg6[%c0_9, %c0_10] : memref<128x128xf32, #tpu.memory_space<vmem>>, vector<128x128xf32>
      %13 = arith.truncf %12 : vector<128x128xf32> to vector<128x128xbf16>
      %c0_11 = arith.constant 0 : index
      %c0_12 = arith.constant 0 : index
      %14 = vector.load %arg5[%c0_11, %c0_12] : memref<128x128xbf16, #tpu.memory_space<vmem>>, vector<128x128xbf16>
      tpu.vector_store %arg5[%c0_11, %c0_12], %13 {strides = array<i32>} : memref<128x128xbf16, #tpu.memory_space<vmem>>, vector<128x128xbf16>,
    } else {
    }
    return
  }
  func.func @transform_0(%arg0: i32, %arg1: i32, %arg2: i32) -> (i32, i32) {
    %c0_i32 = arith.constant 0 : i32
    return %arg0, %arg2 : i32, i32
  }
  func.func @transform_1(%arg0: i32, %arg1: i32, %arg2: i32) -> (i32, i32) {
    %c0_i32 = arith.constant 0 : i32
    return %arg2, %arg1 : i32, i32
  }
  func.func @transform_2(%arg0: i32, %arg1: i32, %arg2: i32) -> (i32, i32) {
    %c0_i32 = arith.constant 0 : i32
    return %arg0, %arg1 : i32, i32
  }
}

module attributes {stable_mosaic.version = 11 : i64} {
  func.func @bn_lwta_kernel(%arg0: i32, %arg1: memref<128x128xbf16, #tpu.memory_space<vmem>>, %arg2: memref<128x4xbf16, #tpu.memory_space<vmem>>, %arg3: memref<1x128xf32, #tpu.memory_space<vmem>>, %arg4: memref<1x128xf32, #tpu.memory_space<vmem>>, %arg5: memref<128x128xbf16, #tpu.memory_space<vmem>>) attributes {dimension_semantics = [#tpu.dimension_semantics<parallel>], iteration_bounds = array<i64: 1>, scalar_prefetch = 0 : i64, scratch_operands = 0 : i64, tpu.core_type = #tpu.core_type<tc>, window_params = [{transform_indices = @transform_0, window_bounds = array<i64: 128, 128>}, {transform_indices = @transform_1, window_bounds = array<i64: 128, 4>}, {pipeline_mode = #tpu.pipeline_mode<synchronous>, transform_indices = @transform_2, window_bounds = array<i64: 1, 128>}, {pipeline_mode = #tpu.pipeline_mode<synchronous>, transform_indices = @transform_3, window_bounds = array<i64: 1, 128>}, {transform_indices = @transform_4, window_bounds = array<i64: 128, 128>}]} {
    %c0 = arith.constant 0 : index
    %c0_0 = arith.constant 0 : index
    %0 = vector.load %arg1[%c0, %c0_0] : memref<128x128xbf16, #tpu.memory_space<vmem>>, vector<128x128xbf16>
    %1 = arith.extf %0 : vector<128x128xbf16> to vector<128x128xf32>
    %c0_1 = arith.constant 0 : index
    %c0_2 = arith.constant 0 : index
    %2 = vector.load %arg3[%c0_1, %c0_2] : memref<1x128xf32, #tpu.memory_space<vmem>>, vector<1x128xf32>
    %3 = vector.broadcast %2 : vector<1x128xf32> to vector<128x128xf32>
    %4 = arith.mulf %1, %3 : vector<128x128xf32>
    %c0_3 = arith.constant 0 : index
    %c0_4 = arith.constant 0 : index
    %5 = vector.load %arg4[%c0_3, %c0_4] : memref<1x128xf32, #tpu.memory_space<vmem>>, vector<1x128xf32>
    %6 = vector.broadcast %5 : vector<1x128xf32> to vector<128x128xf32>
    %7 = arith.addf %4, %6 : vector<128x128xf32>
    %8 = vector.extract_strided_slice %7 {offsets = [0, 0], sizes = [128, 4], strides = [1, 1]} : vector<128x128xf32> to vector<128x4xf32>
    %9 = vector.extract_strided_slice %7 {offsets = [0, 4], sizes = [128, 4], strides = [1, 1]} : vector<128x128xf32> to vector<128x4xf32>
    %10 = arith.subf %8, %9 : vector<128x4xf32>
    %c0_5 = arith.constant 0 : index
    %c0_6 = arith.constant 0 : index
    %11 = vector.load %arg2[%c0_5, %c0_6] : memref<128x4xbf16, #tpu.memory_space<vmem>>, vector<128x4xbf16>
    %12 = arith.extf %11 : vector<128x4xbf16> to vector<128x4xf32>
    %13 = arith.addf %10, %12 : vector<128x4xf32>
    %cst = arith.constant 1.000000e+02 : f32
    %14 = vector.broadcast %cst : f32 to vector<128x4xf32>
    %15 = arith.mulf %13, %14 : vector<128x4xf32>
    %cst_7 = arith.constant 0.000000e+00 : f32
    %16 = vector.broadcast %cst_7 : f32 to vector<128x4xf32>
    %17 = arith.cmpf oge, %15, %16 : vector<128x4xf32>
    %cst_8 = arith.constant 0.000000e+00 : f32
    %18 = vector.broadcast %cst_8 : f32 to vector<128x4xf32>
    %19 = arith.subf %18, %15 : vector<128x4xf32>
    %20 = arith.select %17, %19, %15 : vector<128x4xi1>, vector<128x4xf32>
    %21 = math.exp %20 : vector<128x4xf32>
    %cst_9 = arith.constant 1.000000e+00 : f32
    %22 = vector.broadcast %cst_9 : f32 to vector<128x4xf32>
    %23 = arith.addf %22, %21 : vector<128x4xf32>
    %cst_10 = arith.constant 1.000000e+00 : f32
    %24 = vector.broadcast %cst_10 : f32 to vector<128x4xf32>
    %25 = arith.divf %24, %23 : vector<128x4xf32>
    %26 = arith.mulf %21, %25 : vector<128x4xf32>
    %27 = arith.select %17, %25, %26 : vector<128x4xi1>, vector<128x4xf32>
    %28 = arith.mulf %8, %27 : vector<128x4xf32>
    %29 = arith.truncf %28 : vector<128x4xf32> to vector<128x4xbf16>
    %c0_11 = arith.constant 0 : index
    %c0_12 = arith.constant 0 : index
    %30 = vector.load %arg5[%c0_11, %c0_12] : memref<128x128xbf16, #tpu.memory_space<vmem>>, vector<128x4xbf16>
    tpu.vector_store %arg5[%c0_11, %c0_12], %29 {strides = array<i32>} : memref<128x128xbf16, #tpu.memory_space<vmem>>, vector<128x4xbf16>,
    %cst_13 = arith.constant 1.000000e+00 : f32
    %31 = vector.broadcast %cst_13 : f32 to vector<128x4xf32>
    %32 = arith.subf %31, %27 : vector<128x4xf32>
    %33 = arith.mulf %9, %32 : vector<128x4xf32>
    %34 = arith.truncf %33 : vector<128x4xf32> to vector<128x4xbf16>
    %c0_14 = arith.constant 0 : index
    %c4 = arith.constant 4 : index
    %35 = vector.load %arg5[%c0_14, %c4] : memref<128x128xbf16, #tpu.memory_space<vmem>>, vector<128x4xbf16>
    tpu.vector_store %arg5[%c0_14, %c4], %34 {strides = array<i32>} : memref<128x128xbf16, #tpu.memory_space<vmem>>, vector<128x4xbf16>,
    %cst_15 = arith.constant 0.000000e+00 : bf16
    %36 = vector.broadcast %cst_15 : bf16 to vector<128x120xbf16>
    %c0_16 = arith.constant 0 : index
    %c8 = arith.constant 8 : index
    %37 = vector.load %arg5[%c0_16, %c8] : memref<128x128xbf16, #tpu.memory_space<vmem>>, vector<128x120xbf16>
    tpu.vector_store %arg5[%c0_16, %c8], %36 {strides = array<i32>} : memref<128x128xbf16, #tpu.memory_space<vmem>>, vector<128x120xbf16>,
    return
  }
  func.func @transform_0(%arg0: i32) -> (i32, i32) {
    %c0_i32 = arith.constant 0 : i32
    %c0_i32_0 = arith.constant 0 : i32
    return %arg0, %c0_i32 : i32, i32
  }
  func.func @transform_1(%arg0: i32) -> (i32, i32) {
    %c0_i32 = arith.constant 0 : i32
    %c0_i32_0 = arith.constant 0 : i32
    return %arg0, %c0_i32 : i32, i32
  }
  func.func @transform_2(%arg0: i32) -> (i32, i32) {
    %c0_i32 = arith.constant 0 : i32
    %c0_i32_0 = arith.constant 0 : i32
    %c0_i32_1 = arith.constant 0 : i32
    return %c0_i32, %c0_i32_0 : i32, i32
  }
  func.func @transform_3(%arg0: i32) -> (i32, i32) {
    %c0_i32 = arith.constant 0 : i32
    %c0_i32_0 = arith.constant 0 : i32
    %c0_i32_1 = arith.constant 0 : i32
    return %c0_i32, %c0_i32_0 : i32, i32
  }
  func.func @transform_4(%arg0: i32) -> (i32, i32) {
    %c0_i32 = arith.constant 0 : i32
    %c0_i32_0 = arith.constant 0 : i32
    return %arg0, %c0_i32 : i32, i32
  }
}

module attributes {stable_mosaic.version = 11 : i64} {
  func.func @matmul_kernel(%arg0: i32, %arg1: i32, %arg2: i32, %arg3: memref<128x128xbf16, #tpu.memory_space<vmem>>, %arg4: memref<128x128xbf16, #tpu.memory_space<vmem>>, %arg5: memref<128x128xbf16, #tpu.memory_space<vmem>>, %arg6: memref<128x128xf32, #tpu.memory_space<vmem>>) attributes {dimension_semantics = [#tpu.dimension_semantics<parallel>, #tpu.dimension_semantics<parallel>, #tpu.dimension_semantics<arbitrary>], iteration_bounds = array<i64: 1, 1, 1>, scalar_prefetch = 0 : i64, scratch_operands = 1 : i64, tpu.core_type = #tpu.core_type<tc>, window_params = [{transform_indices = @transform_0, window_bounds = array<i64: 128, 128>}, {transform_indices = @transform_1, window_bounds = array<i64: 128, 128>}, {transform_indices = @transform_2, window_bounds = array<i64: 128, 128>}]} {
    %c0_i32 = arith.constant 0 : i32
    %0 = arith.cmpi eq, %arg2, %c0_i32 : i32
    %1 = arith.extui %0 : i1 to i32
    %c0_i32_0 = arith.constant 0 : i32
    %2 = arith.cmpi ne, %1, %c0_i32_0 : i32
    scf.if %2 {
      %cst_10 = arith.constant 0.000000e+00 : f32
      %12 = vector.broadcast %cst_10 : f32 to vector<128x128xf32>
      %c0_11 = arith.constant 0 : index
      %c0_12 = arith.constant 0 : index
      %13 = vector.load %arg6[%c0_11, %c0_12] : memref<128x128xf32, #tpu.memory_space<vmem>>, vector<128x128xf32>
      tpu.vector_store %arg6[%c0_11, %c0_12], %12 {strides = array<i32>} : memref<128x128xf32, #tpu.memory_space<vmem>>, vector<128x128xf32>,
    } else {
    }
    %c0 = arith.constant 0 : index
    %c0_1 = arith.constant 0 : index
    %3 = vector.load %arg6[%c0, %c0_1] : memref<128x128xf32, #tpu.memory_space<vmem>>, vector<128x128xf32>
    %c0_2 = arith.constant 0 : index
    %c0_3 = arith.constant 0 : index
    %4 = vector.load %arg3[%c0_2, %c0_3] : memref<128x128xbf16, #tpu.memory_space<vmem>>, vector<128x128xbf16>
    %c0_4 = arith.constant 0 : index
    %c0_5 = arith.constant 0 : index
    %5 = vector.load %arg4[%c0_4, %c0_5] : memref<128x128xbf16, #tpu.memory_space<vmem>>, vector<128x128xbf16>
    %cst = arith.constant dense<0.000000e+00> : vector<128x128xf32>
    %6 = tpu.matmul %4, %5, %cst {dimension_numbers = #tpu.dot_dimension_numbers<[1], [0], [0], [1], [0, 0, 1, 1], [], []>} : vector<128x128xbf16>, vector<128x128xbf16>, vector<128x128xf32> -> vector<128x128xf32>
    %7 = arith.addf %3, %6 : vector<128x128xf32>
    %c0_6 = arith.constant 0 : index
    %c0_7 = arith.constant 0 : index
    %8 = vector.load %arg6[%c0_6, %c0_7] : memref<128x128xf32, #tpu.memory_space<vmem>>, vector<128x128xf32>
    tpu.vector_store %arg6[%c0_6, %c0_7], %7 {strides = array<i32>} : memref<128x128xf32, #tpu.memory_space<vmem>>, vector<128x128xf32>,
    %c0_i32_8 = arith.constant 0 : i32
    %9 = arith.cmpi eq, %arg2, %c0_i32_8 : i32
    %10 = arith.extui %9 : i1 to i32
    %c0_i32_9 = arith.constant 0 : i32
    %11 = arith.cmpi ne, %10, %c0_i32_9 : i32
    scf.if %11 {
      %c0_10 = arith.constant 0 : index
      %c0_11 = arith.constant 0 : index
      %12 = vector.load %arg6[%c0_10, %c0_11] : memref<128x128xf32, #tpu.memory_space<vmem>>, vector<128x128xf32>
      %13 = arith.truncf %12 : vector<128x128xf32> to vector<128x128xbf16>
      %c0_12 = arith.constant 0 : index
      %c0_13 = arith.constant 0 : index
      %14 = vector.load %arg5[%c0_12, %c0_13] : memref<128x128xbf16, #tpu.memory_space<vmem>>, vector<128x128xbf16>
      tpu.vector_store %arg5[%c0_12, %c0_13], %13 {strides = array<i32>} : memref<128x128xbf16, #tpu.memory_space<vmem>>, vector<128x128xbf16>,
    } else {
    }
    return
  }
  func.func @transform_0(%arg0: i32, %arg1: i32, %arg2: i32) -> (i32, i32) {
    %c0_i32 = arith.constant 0 : i32
    return %arg0, %arg2 : i32, i32
  }
  func.func @transform_1(%arg0: i32, %arg1: i32, %arg2: i32) -> (i32, i32) {
    %c0_i32 = arith.constant 0 : i32
    return %arg2, %arg1 : i32, i32
  }
  func.func @transform_2(%arg0: i32, %arg1: i32, %arg2: i32) -> (i32, i32) {
    %c0_i32 = arith.constant 0 : i32
    return %arg0, %arg1 : i32, i32
  }
}

module attributes {stable_mosaic.version = 11 : i64} {
  func.func @matmul_add_kernel(%arg0: i32, %arg1: i32, %arg2: i32, %arg3: memref<128x384xbf16, #tpu.memory_space<vmem>>, %arg4: memref<384x128xbf16, #tpu.memory_space<vmem>>, %arg5: memref<128x128xbf16, #tpu.memory_space<vmem>>, %arg6: memref<128x128xf32, #tpu.memory_space<vmem>>, %arg7: memref<128x128xf32, #tpu.memory_space<vmem>>) attributes {dimension_semantics = [#tpu.dimension_semantics<parallel>, #tpu.dimension_semantics<parallel>, #tpu.dimension_semantics<arbitrary>], iteration_bounds = array<i64: 1, 1, 3>, scalar_prefetch = 0 : i64, scratch_operands = 1 : i64, tpu.core_type = #tpu.core_type<tc>, window_params = [{transform_indices = @transform_0, window_bounds = array<i64: 128, 384>}, {transform_indices = @transform_1, window_bounds = array<i64: 384, 128>}, {transform_indices = @transform_2, window_bounds = array<i64: 128, 128>}, {transform_indices = @transform_3, window_bounds = array<i64: 128, 128>}]} {
    %c0_i32 = arith.constant 0 : i32
    %0 = arith.cmpi eq, %arg2, %c0_i32 : i32
    %1 = arith.extui %0 : i1 to i32
    %c0_i32_0 = arith.constant 0 : i32
    %2 = arith.cmpi ne, %1, %c0_i32_0 : i32
    scf.if %2 {
      %cst_9 = arith.constant 0.000000e+00 : f32
      %12 = vector.broadcast %cst_9 : f32 to vector<128x128xf32>
      %c0_10 = arith.constant 0 : index
      %c0_11 = arith.constant 0 : index
      %13 = vector.load %arg7[%c0_10, %c0_11] : memref<128x128xf32, #tpu.memory_space<vmem>>, vector<128x128xf32>
      tpu.vector_store %arg7[%c0_10, %c0_11], %12 {strides = array<i32>} : memref<128x128xf32, #tpu.memory_space<vmem>>, vector<128x128xf32>,
    } else {
    }
    %c0 = arith.constant 0 : index
    %c0_1 = arith.constant 0 : index
    %3 = vector.load %arg7[%c0, %c0_1] : memref<128x128xf32, #tpu.memory_space<vmem>>, vector<128x128xf32>
    %c0_2 = arith.constant 0 : index
    %c0_3 = arith.constant 0 : index
    %4 = vector.load %arg3[%c0_2, %c0_3] : memref<128x384xbf16, #tpu.memory_space<vmem>>, vector<128x384xbf16>
    %c0_4 = arith.constant 0 : index
    %c0_5 = arith.constant 0 : index
    %5 = vector.load %arg4[%c0_4, %c0_5] : memref<384x128xbf16, #tpu.memory_space<vmem>>, vector<384x128xbf16>
    %cst = arith.constant dense<0.000000e+00> : vector<128x128xf32>
    %6 = tpu.matmul %4, %5, %cst {dimension_numbers = #tpu.dot_dimension_numbers<[1], [0], [0], [1], [0, 0, 1, 1], [], []>} : vector<128x384xbf16>, vector<384x128xbf16>, vector<128x128xf32> -> vector<128x128xf32>
    %7 = arith.addf %3, %6 : vector<128x128xf32>
    %c0_6 = arith.constant 0 : index
    %c0_7 = arith.constant 0 : index
    %8 = vector.load %arg7[%c0_6, %c0_7] : memref<128x128xf32, #tpu.memory_space<vmem>>, vector<128x128xf32>
    tpu.vector_store %arg7[%c0_6, %c0_7], %7 {strides = array<i32>} : memref<128x128xf32, #tpu.memory_space<vmem>>, vector<128x128xf32>,
    %c2_i32 = arith.constant 2 : i32
    %9 = arith.cmpi eq, %arg2, %c2_i32 : i32
    %10 = arith.extui %9 : i1 to i32
    %c0_i32_8 = arith.constant 0 : i32
    %11 = arith.cmpi ne, %10, %c0_i32_8 : i32
    scf.if %11 {
      %c0_9 = arith.constant 0 : index
      %c0_10 = arith.constant 0 : index
      %12 = vector.load %arg7[%c0_9, %c0_10] : memref<128x128xf32, #tpu.memory_space<vmem>>, vector<128x128xf32>
      %c0_11 = arith.constant 0 : index
      %c0_12 = arith.constant 0 : index
      %13 = vector.load %arg5[%c0_11, %c0_12] : memref<128x128xbf16, #tpu.memory_space<vmem>>, vector<128x128xbf16>
      %14 = arith.extf %13 : vector<128x128xbf16> to vector<128x128xf32>
      %15 = arith.addf %12, %14 : vector<128x128xf32>
      %c0_13 = arith.constant 0 : index
      %c0_14 = arith.constant 0 : index
      %16 = vector.load %arg6[%c0_13, %c0_14] : memref<128x128xf32, #tpu.memory_space<vmem>>, vector<128x128xf32>
      tpu.vector_store %arg6[%c0_13, %c0_14], %15 {strides = array<i32>} : memref<128x128xf32, #tpu.memory_space<vmem>>, vector<128x128xf32>,
    } else {
    }
    return
  }
  func.func @transform_0(%arg0: i32, %arg1: i32, %arg2: i32) -> (i32, i32) {
    %c0_i32 = arith.constant 0 : i32
    return %arg0, %arg2 : i32, i32
  }
  func.func @transform_1(%arg0: i32, %arg1: i32, %arg2: i32) -> (i32, i32) {
    %c0_i32 = arith.constant 0 : i32
    return %arg2, %arg1 : i32, i32
  }
  func.func @transform_2(%arg0: i32, %arg1: i32, %arg2: i32) -> (i32, i32) {
    %c0_i32 = arith.constant 0 : i32
    return %arg0, %arg1 : i32, i32
  }
  func.func @transform_3(%arg0: i32, %arg1: i32, %arg2: i32) -> (i32, i32) {
    %c0_i32 = arith.constant 0 : i32
    return %arg0, %arg1 : i32, i32
  }
}

</mosaic_0001>

<bundles_post_ra>
// kernel: basic_block_forward.5
= control target key start
LH: loop header
LB: loop body
LE: loop exit
PB: predicated region body
PF: predicated region fallthrough
CT: control target
= control target key end

     0   :  { %vm1824_vm10 = vcmask 11264   ;;  %s6525_s0 = inlined_call_operand.vmem [shape: bf16[512,128], index: 0, kind: input, shape index: {}]   ;;  %s6526_s2 = inlined_call_operand.vmem [shape: f32[1,128], index: 2, kind: input, shape index: {}]   ;;  %s6527_s3 = inlined_call_operand.vmem [shape: f32[1,128], index: 3, kind: input, shape index: {}]   ;;  %s6528_s1 = inlined_call_operand.vmem [shape: bf16[512,2], index: 1, kind: input, shape index: {}]   ;;  %s6529_s4 = inlined_call_operand.vmem [shape: bf16[512,128], index: 4, kind: output, shape index: {}]  }
   0x1   :  { %v3177_v0 = vld [vmem:[%s6525_s0 + $0x8] sm:$0xff]   ;;  %v3532_v1 = vld [vmem:[%s6526_s2] ss:$0 sm:$0xff]  ;;  %v3178_v5 = vld [vmem:[%s6525_s0 + $0x10] sm:$0xff]  }
   0x2   :  { %v2927_v2 = vunpack.c.l.bf16 %v3177_v0  ;;  %v2922_v3 = vld [vmem:[%s6525_s0] sm:$0xff]   ;;  %v2928_v4 = vunpack.c.h.bf16 %v3177_v0  ;;  %v2932_v11 = vunpack.c.h.bf16 %v3178_v5  ;;  %v2931_v14 = vunpack.c.l.bf16 %v3178_v5  ;;  %v3179_v15 = vld [vmem:[%s6525_s0 + $0x18] sm:$0xff]   ;;  %v3181_v27 = vld [vmem:[%s6525_s0 + $0x28] sm:$0xff]  }
   0x3   :  { %v3543_v6 = vld [vmem:[%s6527_s3] ss:$0 sm:$0xff]  ;;  %v2923_v7 = vunpack.c.l.bf16 %v2922_v3  ;;  %v2924_v8 = vunpack.c.h.bf16 %v2922_v3  ;;  %s3498_s3 = smov 126   ;;  %v2936_v20 = vunpack.c.h.bf16 %v3179_v15  ;;  %v2935_v21 = vunpack.c.l.bf16 %v3179_v15  ;;  %v3182_v28 = vld [vmem:[%s6525_s0 + $0x30] sm:$0xff]   ;;  %v3183_v32 = vld [vmem:[%s6525_s0 + $0x38] sm:$0xff]  }
   0x4   :  { %v155_v9 = vmul.f32 %v2927_v2, %v3532_v1  ;;  %v156_v10 = vmul.f32 %v2928_v4, %v3532_v1  ;;  %v158_v19 = vmul.f32 %v2932_v11, %v3532_v1  ;;  %v3180_v22 = vld [vmem:[%s6525_s0 + $0x20] sm:$0xff]   ;;  %v157_v24 = vmul.f32 %v2931_v14, %v3532_v1  ;;  %v3185_v39 = vld [vmem:[%s6525_s0 + $0x48] sm:$0xff]   ;;  %v3186_v40 = vld [vmem:[%s6525_s0 + $0x50] sm:$0xff]  }
   0x5   :  { %v153_v12 = vmul.f32 %v2923_v7, %v3532_v1  ;;  %v154_v13 = vmul.f32 %v2924_v8, %v3532_v1  ;;  %v2940_v25 = vunpack.c.h.bf16 %v3180_v22  ;;  %v2939_v26 = vunpack.c.l.bf16 %v3180_v22  ;;  %v3184_v34 = vld [vmem:[%s6525_s0 + $0x40] sm:$0xff]   ;;  %v3187_v53 = vld [vmem:[%s6525_s0 + $0x58] sm:$0xff]  }
   0x6   :  { %v3553_v16 = vadd.f32 %v3543_v6, %v155_v9  ;;  %v3561_v18 = vadd.f32 %v3543_v6, %v156_v10  ;;  %v3582_v29 = vadd.f32 %v3543_v6, %v158_v19  ;;  %v160_v30 = vmul.f32 %v2936_v20, %v3532_v1  ;;  %v3661_v14 = vld [vmem:[%s6525_s0 + $0x60] sm:$0xff]  }
   0x7   :  { %v3556_v17 = vadd.f32 %v3543_v6, %v153_v12  ;;  %v3570_v23 = vadd.f32 %v3543_v6, %v154_v13  ;;  %v159_v31 = vmul.f32 %v2935_v21, %v3532_v1  ;;  %v3592_v33 = vadd.f32 %v3543_v6, %v157_v24  ;;  %v3192_v15 = vld [vmem:[%s6525_s0 + $0x80] sm:$0xff]   ;;  %v3193_v24 = vld [vmem:[%s6525_s0 + $0x88] sm:$0xff]  }
   0x8   :  { %6704 = vst [vmem:[#allocation2_spill] sm:$0xff] %v3553_v16  ;;  %356 = vrot.lane.b32.xlu1 %v3553_v16, %s3498_s3  ;;  %6706 = vst [vmem:[#allocation4_spill] sm:$0xff] %v3561_v18  ;;  %v2944_v35 = vunpack.c.h.bf16 %v3181_v27  ;;  %v2943_v36 = vunpack.c.l.bf16 %v3181_v27  ;;  %v2948_v37 = vunpack.c.h.bf16 %v3182_v28  ;;  %v2947_v38 = vunpack.c.l.bf16 %v3182_v28 }
   0x9   :  { %6705 = vst [vmem:[#allocation3_spill] sm:$0xff] %v3556_v17  ;;  %352 = vrot.lane.b32.xlu0 %v3556_v17, %s3498_s3  ;;  %6707 = vst [vmem:[#allocation5_spill] sm:$0xff] %v3570_v23  ;;  %v162_v41 = vmul.f32 %v2940_v25, %v3532_v1  ;;  %v161_v42 = vmul.f32 %v2939_v26, %v3532_v1  ;;  %v2952_v43 = vunpack.c.h.bf16 %v3183_v32  ;;  %v2951_v44 = vunpack.c.l.bf16 %v3183_v32  ;;  %v3194_v25 = vld [vmem:[%s6525_s0 + $0x90] sm:$0xff]  }
   0xa   :  { %6708 = vst [vmem:[#allocation6_spill] sm:$0xff] %v3582_v29  ;;  %6709 = vst [vmem:[#allocation7_spill] sm:$0xff] %v3592_v33  ;;  %v3608_v45 = vadd.f32 %v3543_v6, %v160_v30  ;;  %v3611_v46 = vadd.f32 %v3543_v6, %v159_v31  ;;  %v2956_v47 = vunpack.c.h.bf16 %v3184_v34  ;;  %v2955_v48 = vunpack.c.l.bf16 %v3184_v34  ;;  %v3195_v31 = vld [vmem:[%s6525_s0 + $0x98] sm:$0xff]  }
   0xb   :  { %v2960_v49 = vunpack.c.h.bf16 %v3185_v39  ;;  %v2959_v50 = vunpack.c.l.bf16 %v3185_v39  ;;  %v2964_v51 = vunpack.c.h.bf16 %v3186_v40  ;;  %v2963_v52 = vunpack.c.l.bf16 %v3186_v40 }
   0xc   :  { %358 = vrot.lane.b32.xlu1 %v3561_v18, %s3498_s3  ;;  %6710 = vst [vmem:[#allocation8_spill] sm:$0xff] %v3608_v45  ;;  %6711 = vst [vmem:[#allocation9_spill] sm:$0xff] %v3611_v46  ;;  %v164_v54 = vmul.f32 %v2944_v35, %v3532_v1  ;;  %v163_v55 = vmul.f32 %v2943_v36, %v3532_v1  ;;  %v166_v56 = vmul.f32 %v2948_v37, %v3532_v1 }
   0xd   :  { %354 = vrot.lane.b32.xlu0 %v3570_v23, %s3498_s3  ;;  %v165_v57 = vmul.f32 %v2947_v38, %v3532_v1  ;;  %v3623_v58 = vadd.f32 %v3543_v6, %v162_v41  ;;  %v3626_v59 = vadd.f32 %v3543_v6, %v161_v42  ;;  %v168_v60 = vmul.f32 %v2952_v43, %v3532_v1 }
   0xe   :  { %v167_v61 = vmul.f32 %v2951_v44, %v3532_v1  ;;  %v170_v62 = vmul.f32 %v2956_v47, %v3532_v1  ;;  %v169_v63 = vmul.f32 %v2955_v48, %v3532_v1  ;;  %v2968_v0 = vunpack.c.h.bf16 %v3187_v53 }
   0xf   :  { %6712 = vst [vmem:[#allocation10_spill] sm:$0xff] %v3623_v58  ;;  %6713 = vst [vmem:[#allocation11_spill] sm:$0xff] %v3626_v59  ;;  %v2967_v2 = vunpack.c.l.bf16 %v3187_v53  ;;  %v172_v3 = vmul.f32 %v2960_v49, %v3532_v1  ;;  %v171_v4 = vmul.f32 %v2959_v50, %v3532_v1  ;;  %v174_v5 = vmul.f32 %v2964_v51, %v3532_v1  ;;  %v3196_v51 = vld [vmem:[%s6525_s0 + $0xa0] sm:$0xff]  }
  0x10   :  { %362 = vrot.lane.b32.xlu1 %v3582_v29, %s3498_s3  ;;  %v173_v7 = vmul.f32 %v2963_v52, %v3532_v1  ;;  %v3641_v8 = vadd.f32 %v3543_v6, %v164_v54  ;;  %v3644_v9 = vadd.f32 %v3543_v6, %v163_v55  ;;  %v3647_v10 = vadd.f32 %v3543_v6, %v166_v56  ;;  %v3197_v56 = vld [vmem:[%s6525_s0 + $0xa8] sm:$0xff]  }
  0x11   :  { %360 = vrot.lane.b32.xlu0 %v3592_v33, %s3498_s3  ;;  %v3650_v11 = vadd.f32 %v3543_v6, %v165_v57  ;;  %v3653_v12 = vadd.f32 %v3543_v6, %v168_v60  ;;  %v3656_v13 = vadd.f32 %v3543_v6, %v167_v61  ;;  %v3669_v19 = vadd.f32 %v3543_v6, %v170_v62  ;;  %v3198_v57 = vld [vmem:[%s6525_s0 + $0xb0] sm:$0xff]  }
  0x12   :  { %6714 = vst [vmem:[#allocation12_spill] sm:$0xff] %v3641_v8  ;;  %6715 = vst [vmem:[#allocation13_spill] sm:$0xff] %v3644_v9  ;;  %v3672_v20 = vadd.f32 %v3543_v6, %v169_v63  ;;  %v3675_v21 = vmul.f32 %v2968_v0, %v3532_v1  ;;  %v3678_v22 = vmul.f32 %v2967_v2, %v3532_v1  ;;  %v2988_v35 = vunpack.c.h.bf16 %v3192_v15  ;;  %v3199_v0 = vld [vmem:[%s6525_s0 + $0xb8] sm:$0xff]  }
  0x13   :  { %6716 = vst [vmem:[#allocation14_spill] sm:$0xff] %v3647_v10  ;;  %6717 = vst [vmem:[#allocation15_spill] sm:$0xff] %v3650_v11  ;;  %v3689_v26 = vadd.f32 %v3543_v6, %v172_v3  ;;  %v3692_v27 = vadd.f32 %v3543_v6, %v171_v4  ;;  %v3695_v28 = vadd.f32 %v3543_v6, %v174_v5  ;;  %v2987_v36 = vunpack.c.l.bf16 %v3192_v15 }
  0x14   :  { %366 = vrot.lane.b32.xlu1 %v3608_v45, %s3498_s3  ;;  %6718 = vst [vmem:[#allocation16_spill] sm:$0xff] %v3653_v12  ;;  %6719 = vst [vmem:[#allocation17_spill] sm:$0xff] %v3656_v13  ;;  %v3698_v30 = vadd.f32 %v3543_v6, %v173_v7  ;;  %v2992_v37 = vunpack.c.h.bf16 %v3193_v24  ;;  %v2991_v38 = vunpack.c.l.bf16 %v3193_v24  ;;  %v2996_v39 = vunpack.c.h.bf16 %v3194_v25 }
  0x15   :  { %364 = vrot.lane.b32.xlu0 %v3611_v46, %s3498_s3  ;;  %6720 = vst [vmem:[#allocation18_spill] sm:$0xff] %v3669_v19  ;;  %6721 = vst [vmem:[#allocation19_spill] sm:$0xff] %v3672_v20  ;;  %v2995_v40 = vunpack.c.l.bf16 %v3194_v25  ;;  %v186_v41 = vmul.f32 %v2988_v35, %v3532_v1  ;;  %v185_v42 = vmul.f32 %v2987_v36, %v3532_v1  ;;  %v3000_v43 = vunpack.c.h.bf16 %v3195_v31 }
  0x16   :  { %6722 = vst [vmem:[#allocation20_spill] sm:$0xff] %v3689_v26  ;;  %6723 = vst [vmem:[#allocation21_spill] sm:$0xff] %v3692_v27  ;;  %v2999_v44 = vunpack.c.l.bf16 %v3195_v31  ;;  %v188_v47 = vmul.f32 %v2992_v37, %v3532_v1  ;;  %v187_v48 = vmul.f32 %v2991_v38, %v3532_v1  ;;  %v190_v49 = vmul.f32 %v2996_v39, %v3532_v1 }
  0x17   :  { %6724 = vst [vmem:[#allocation22_spill] sm:$0xff] %v3695_v28  ;;  %6725 = vst [vmem:[#allocation23_spill] sm:$0xff] %v3698_v30  ;;  %v189_v50 = vmul.f32 %v2995_v40, %v3532_v1  ;;  %v3719_v52 = vadd.f32 %v3543_v6, %v186_v41  ;;  %v3722_v53 = vadd.f32 %v3543_v6, %v185_v42  ;;  %v3004_v4 = vunpack.c.h.bf16 %v3196_v51  ;;  %v3200_v42 = vld [vmem:[%s6525_s0 + $0xc0] sm:$0xff]  }
  0x18   :  { %370 = vrot.lane.b32.xlu1 %v3623_v58, %s3498_s3  ;;  %v192_v54 = vmul.f32 %v3000_v43, %v3532_v1  ;;  %v191_v55 = vmul.f32 %v2999_v44, %v3532_v1  ;;  %v3733_v60 = vadd.f32 %v3543_v6, %v188_v47  ;;  %v3736_v61 = vadd.f32 %v3543_v6, %v187_v48 }
  0x19   :  { %368 = vrot.lane.b32.xlu0 %v3626_v59, %s3498_s3  ;;  %6726 = vst [vmem:[#allocation24_spill] sm:$0xff] %v3719_v52  ;;  %6727 = vst [vmem:[#allocation25_spill] sm:$0xff] %v3722_v53  ;;  %v3739_v62 = vadd.f32 %v3543_v6, %v190_v49  ;;  %v3742_v63 = vadd.f32 %v3543_v6, %v189_v50  ;;  %v3003_v5 = vunpack.c.l.bf16 %v3196_v51  ;;  %v3008_v7 = vunpack.c.h.bf16 %v3197_v56  ;;  %v3201_v49 = vld [vmem:[%s6525_s0 + $0xc8] sm:$0xff]   ;;  %v3202_v50 = vld [vmem:[%s6525_s0 + $0xd0] sm:$0xff]  }
  0x1a   :  { %6728 = vst [vmem:[#allocation26_spill] sm:$0xff] %v3733_v60  ;;  %6729 = vst [vmem:[#allocation27_spill] sm:$0xff] %v3736_v61  ;;  %v3750_v2 = vadd.f32 %v3543_v6, %v192_v54  ;;  %v3753_v3 = vadd.f32 %v3543_v6, %v191_v55  ;;  %v3007_v15 = vunpack.c.l.bf16 %v3197_v56  ;;  %v3012_v24 = vunpack.c.h.bf16 %v3198_v57 }
  0x1b   :  { %6730 = vst [vmem:[#allocation28_spill] sm:$0xff] %v3739_v62  ;;  %6731 = vst [vmem:[#allocation29_spill] sm:$0xff] %v3742_v63  ;;  %v3011_v25 = vunpack.c.l.bf16 %v3198_v57  ;;  %v194_v31 = vmul.f32 %v3004_v4, %v3532_v1  ;;  %v193_v35 = vmul.f32 %v3003_v5, %v3532_v1  ;;  %v3016_v36 = vunpack.c.h.bf16 %v3199_v0  ;;  %v3203_v57 = vld [vmem:[%s6525_s0 + $0xd8] sm:$0xff]  }
  0x1c   :  { %374 = vrot.lane.b32.xlu1 %v3641_v8, %s3498_s3  ;;  %6732 = vst [vmem:[#allocation30_spill] sm:$0xff] %v3750_v2  ;;  %6733 = vst [vmem:[#allocation31_spill] sm:$0xff] %v3753_v3  ;;  %v3015_v37 = vunpack.c.l.bf16 %v3199_v0  ;;  %v196_v38 = vmul.f32 %v3008_v7, %v3532_v1  ;;  %v195_v39 = vmul.f32 %v3007_v15, %v3532_v1  ;;  %v3020_v5 = vunpack.c.h.bf16 %v3200_v42 }
  0x1d   :  { %372 = vrot.lane.b32.xlu0 %v3644_v9, %s3498_s3  ;;  %v198_v40 = vmul.f32 %v3012_v24, %v3532_v1  ;;  %v197_v41 = vmul.f32 %v3011_v25, %v3532_v1  ;;  %v3769_v43 = vadd.f32 %v3543_v6, %v194_v31  ;;  %v3772_v44 = vadd.f32 %v3543_v6, %v193_v35 }
  0x1e   :  { %v200_v47 = vmul.f32 %v3016_v36, %v3532_v1  ;;  %v199_v48 = vmul.f32 %v3015_v37, %v3532_v1  ;;  %v3785_v51 = vadd.f32 %v3543_v6, %v196_v38  ;;  %v3788_v54 = vadd.f32 %v3543_v6, %v195_v39 }
  0x1f   :  { %6734 = vst [vmem:[#allocation32_spill] sm:$0xff] %v3769_v43  ;;  %6735 = vst [vmem:[#allocation33_spill] sm:$0xff] %v3772_v44  ;;  %v3791_v55 = vadd.f32 %v3543_v6, %v198_v40  ;;  %v3794_v56 = vadd.f32 %v3543_v6, %v197_v41  ;;  %v3019_v7 = vunpack.c.l.bf16 %v3200_v42  ;;  %v3024_v15 = vunpack.c.h.bf16 %v3201_v49 }
  0x20   :  { %378 = vrot.lane.b32.xlu1 %v3647_v10, %s3498_s3  ;;  %6736 = vst [vmem:[#allocation34_spill] sm:$0xff] %v3785_v51  ;;  %6737 = vst [vmem:[#allocation35_spill] sm:$0xff] %v3788_v54  ;;  %v3800_v0 = vadd.f32 %v3543_v6, %v200_v47  ;;  %v3803_v4 = vadd.f32 %v3543_v6, %v199_v48  ;;  %v3023_v24 = vunpack.c.l.bf16 %v3201_v49  ;;  %v3028_v25 = vunpack.c.h.bf16 %v3202_v50  ;;  %v3204_v47 = vld [vmem:[%s6525_s0 + $0xe0] sm:$0xff]  }
  0x21   :  { %376 = vrot.lane.b32.xlu0 %v3650_v11, %s3498_s3  ;;  %6738 = vst [vmem:[#allocation36_spill] sm:$0xff] %v3791_v55  ;;  %6739 = vst [vmem:[#allocation37_spill] sm:$0xff] %v3794_v56  ;;  %v3027_v31 = vunpack.c.l.bf16 %v3202_v50  ;;  %v202_v35 = vmul.f32 %v3020_v5, %v3532_v1  ;;  %v201_v36 = vmul.f32 %v3019_v7, %v3532_v1  ;;  %v3032_v37 = vunpack.c.h.bf16 %v3203_v57  ;;  %v3205_v5 = vld [vmem:[%s6525_s0 + $0xe8] sm:$0xff]  }
  0x22   :  { %6740 = vst [vmem:[#allocation38_spill] sm:$0xff] %v3800_v0  ;;  %6741 = vst [vmem:[#allocation39_spill] sm:$0xff] %v3803_v4  ;;  %v3031_v38 = vunpack.c.l.bf16 %v3203_v57  ;;  %v204_v39 = vmul.f32 %v3024_v15, %v3532_v1  ;;  %v203_v40 = vmul.f32 %v3023_v24, %v3532_v1  ;;  %v206_v41 = vmul.f32 %v3028_v25, %v3532_v1  ;;  %v3189_v7 = vld [vmem:[%s6525_s0 + $0x68] sm:$0xff]  }
  0x23   :  { %v205_v42 = vmul.f32 %v3027_v31, %v3532_v1  ;;  %v3819_v48 = vadd.f32 %v3543_v6, %v202_v35  ;;  %v3822_v49 = vadd.f32 %v3543_v6, %v201_v36  ;;  %v208_v50 = vmul.f32 %v3032_v37, %v3532_v1 }
  0x24   :  { %382 = vrot.lane.b32.xlu1 %v3653_v12, %s3498_s3  ;;  %v207_v57 = vmul.f32 %v3031_v38, %v3532_v1  ;;  %v3833_v15 = vadd.f32 %v3543_v6, %v204_v39  ;;  %v3836_v24 = vadd.f32 %v3543_v6, %v203_v40  ;;  %v3839_v25 = vadd.f32 %v3543_v6, %v206_v41  ;;  %v3206_v39 = vld [vmem:[%s6525_s0 + $0xf0] sm:$0xff]  }
  0x25   :  { %380 = vrot.lane.b32.xlu0 %v3656_v13, %s3498_s3  ;;  %6742 = vst [vmem:[#allocation40_spill] sm:$0xff] %v3819_v48  ;;  %6743 = vst [vmem:[#allocation41_spill] sm:$0xff] %v3822_v49  ;;  %v3842_v31 = vadd.f32 %v3543_v6, %v205_v42  ;;  %v3847_v35 = vadd.f32 %v3543_v6, %v208_v50  ;;  %v3036_v37 = vunpack.c.h.bf16 %v3204_v47  ;;  %v3035_v38 = vunpack.c.l.bf16 %v3204_v47 }
  0x26   :  { %6744 = vst [vmem:[#allocation42_spill] sm:$0xff] %v3833_v15  ;;  %6745 = vst [vmem:[#allocation43_spill] sm:$0xff] %v3836_v24  ;;  %v3850_v36 = vadd.f32 %v3543_v6, %v207_v57  ;;  %v3859_v40 = vadd.f32 %v3543_v6, %v3675_v21  ;;  %v3863_v41 = vadd.f32 %v3543_v6, %v3678_v22  ;;  %v3040_v42 = vunpack.c.h.bf16 %v3205_v5  ;;  %v3207_v21 = vld [vmem:[%s6525_s0 + $0xf8] sm:$0xff]  }
  0x27   :  { %6746 = vst [vmem:[#allocation44_spill] sm:$0xff] %v3839_v25  ;;  %6747 = vst [vmem:[#allocation45_spill] sm:$0xff] %v3842_v31  ;;  %v3039_v50 = vunpack.c.l.bf16 %v3205_v5  ;;  %v2976_v57 = vunpack.c.h.bf16 %v3189_v7  ;;  %v2975_v34 = vunpack.c.l.bf16 %v3189_v7  ;;  %v210_v47 = vmul.f32 %v3036_v37, %v3532_v1 }
  0x28   :  { %386 = vrot.lane.b32.xlu1 %v3669_v19, %s3498_s3  ;;  %6748 = vst [vmem:[#allocation46_spill] sm:$0xff] %v3847_v35  ;;  %6749 = vst [vmem:[#allocation47_spill] sm:$0xff] %v3850_v36  ;;  %v209_v32 = vmul.f32 %v3035_v38, %v3532_v1  ;;  %v3043_v19 = vunpack.c.l.bf16 %v3206_v39  ;;  %v6752_v22 = vunpack.c.h.bf16 %v3661_v14  ;;  %v6753_v7 = vunpack.c.l.bf16 %v3661_v14  ;;  %v3190_v38 = vld [vmem:[%s6525_s0 + $0x70] sm:$0xff]  }
  0x29   :  { %384 = vrot.lane.b32.xlu0 %v3672_v20, %s3498_s3  ;;  %6750 = vst [vmem:[#allocation48_spill] sm:$0xff] %v3859_v40  ;;  %6751 = vst [vmem:[#allocation49_spill] sm:$0xff] %v3863_v41  ;;  %v3044_v20 = vunpack.c.h.bf16 %v3206_v39  ;;  %v3884_v39 = vadd.f32 %v3543_v6, %v210_v47  ;;  %v3047_v13 = vunpack.c.l.bf16 %v3207_v21  ;;  %v2980_v47 = vunpack.c.h.bf16 %v3190_v38 }
  0x2a   :  { %v178_v5 = vmul.f32 %v6752_v22, %v3532_v1  ;;  %v177_v37 = vmul.f32 %v6753_v7, %v3532_v1  ;;  %v213_v7 = vmul.f32 %v3043_v19, %v3532_v1 }
  0x2b   :  { %6754 = vst [vmem:[#allocation50_spill] sm:$0xff] %v3884_v39  ;;  %v214_v14 = vmul.f32 %v3044_v20, %v3532_v1  ;;  %v215_v19 = vmul.f32 %v3047_v13, %v3532_v1 }
  0x2c   :  { %390 = vrot.lane.b32.xlu1 %v3689_v26, %s3498_s3  ;;  %v212_v26 = vmul.f32 %v3040_v42, %v3532_v1  ;;  %v3887_v42 = vadd.f32 %v3543_v6, %v209_v32  ;;  %v3903_v32 = vadd.f32 %v3543_v6, %v213_v7  ;;  %v2979_v7 = vunpack.c.l.bf16 %v3190_v38 }
  0x2d   :  { %388 = vrot.lane.b32.xlu0 %v3692_v27, %s3498_s3  ;;  %v211_v27 = vmul.f32 %v3039_v50, %v3532_v1  ;;  %v3900_v12 = vadd.f32 %v3543_v6, %v214_v14  ;;  %v179_v14 = vmul.f32 %v2975_v34, %v3532_v1 }
  0x2e   :  { %6755 = vst [vmem:[#allocation51_spill] sm:$0xff] %v3887_v42  ;;  %v3892_v50 = vadd.f32 %v3543_v6, %v212_v26  ;;  %6759 = vst [vmem:[#allocation55_spill] sm:$0xff] %v3903_v32  ;;  %v3908_v26 = vadd.f32 %v3543_v6, %v178_v5  ;;  %v3191_v5 = vld [vmem:[%s6525_s0 + $0x78] sm:$0xff]   ;;  %v181_v38 = vmul.f32 %v2979_v7, %v3532_v1 }
  0x2f   :  { %v3895_v22 = vadd.f32 %v3543_v6, %v211_v27  ;;  %6758 = vst [vmem:[#allocation54_spill] sm:$0xff] %v3900_v12  ;;  %v180_v27 = vmul.f32 %v2976_v57, %v3532_v1  ;;  %v182_v57 = vmul.f32 %v2980_v47, %v3532_v1  ;;  %v2984_v34 = vunpack.c.h.bf16 %v3191_v5 }
  0x30   :  { %394 = vrot.lane.b32.xlu1 %v3695_v28, %s3498_s3  ;;  %6756 = vst [vmem:[#allocation52_spill] sm:$0xff] %v3892_v50  ;;  %v3048_v28 = vunpack.c.h.bf16 %v3207_v21  ;;  %6760 = vst [vmem:[#allocation56_spill] sm:$0xff] %v3908_v26  ;;  %v3916_v21 = vadd.f32 %v3543_v6, %v177_v37  ;;  %v3937_v37 = vadd.f32 %v3543_v6, %v179_v14 }
  0x31   :  { %392 = vrot.lane.b32.xlu0 %v3698_v30, %s3498_s3  ;;  %6757 = vst [vmem:[#allocation53_spill] sm:$0xff] %v3895_v22  ;;  %v3931_v13 = vadd.f32 %v3543_v6, %v180_v27  ;;  %v184_v27 = vmul.f32 %v2984_v34, %v3532_v1  ;;  %v3949_v47 = vadd.f32 %v3543_v6, %v181_v38  ;;  %v4030_v34 = vld [vmem:[%s6528_s1 + $0x18] sm:$0xff]   ;;  %v4035_v38 = vld [vmem:[%s6528_s1 + $0x20] sm:$0xff]  }
  0x32   :  { %v216_v20 = vmul.f32 %v3048_v28, %v3532_v1  ;;  %6761 = vst [vmem:[#allocation57_spill] sm:$0xff] %v3916_v21  ;;  %v3926_v28 = vadd.f32 %v3543_v6, %v215_v19  ;;  %6765 = vst [vmem:[#allocation61_spill] sm:$0xff] %v3937_v37  ;;  %v3943_v19 = vadd.f32 %v3543_v6, %v182_v57  ;;  %v4023_v57 = vld [vmem:[%s6528_s1 + $0x10] sm:$0xff]  }
  0x33   :  { %6764 = vst [vmem:[#allocation60_spill] sm:$0xff] %v3931_v13  ;;  %6767 = vst [vmem:[#allocation63_spill] sm:$0xff] %v3949_v47  ;;  %v3955_v7 = vadd.f32 %v3543_v6, %v184_v27 }
  0x34   :  { %398 = vrot.lane.b32.xlu1 %v3859_v40, %s3498_s3  ;;  %v3923_v40 = vadd.f32 %v3543_v6, %v216_v20  ;;  %6763 = vst [vmem:[#allocation59_spill] sm:$0xff] %v3926_v28  ;;  %v2983_v20 = vunpack.c.l.bf16 %v3191_v5  ;;  %6766 = vst [vmem:[#allocation62_spill] sm:$0xff] %v3943_v19 }
  0x35   :  { %396 = vrot.lane.b32.xlu0 %v3863_v41, %s3498_s3  ;;  %6768 = vst [vmem:[#allocation64_spill] sm:$0xff] %v3955_v7 }
  0x36   :  { %6762 = vst [vmem:[#allocation58_spill] sm:$0xff] %v3923_v40  ;;  %v183_v14 = vmul.f32 %v2983_v20, %v3532_v1  ;;  %v4013_v1 = vld [vmem:[%s6528_s1 + $0x8] sm:$0xff]  }
  0x37   :  { %v3055_v20 = vunpack.c.l.bf16 %v4013_v1 }
  0x38   :  { %402 = vrot.lane.b32.xlu1 %v3908_v26, %s3498_s3  ;;  %v3960_v5 = vadd.f32 %v3543_v6, %v183_v14  ;;  %v4018_v6 = vld [vmem:[%s6528_s1] sm:$0xff]   ;;  %v4044_v14 = vld [vmem:[%s6528_s1 + $0x28] sm:$0xff]  }
  0x39   :  { %400 = vrot.lane.b32.xlu0 %v3916_v21, %s3498_s3  ;;  %v3051_v27 = vunpack.c.l.bf16 %v4018_v6 }
  0x3a   :  { %6769 = vst [vmem:[#allocation65_spill] sm:$0xff] %v3960_v5 }
  0x3c   :  { %406 = vrot.lane.b32.xlu1 %v3931_v13, %s3498_s3 }
  0x3d   :  { %404 = vrot.lane.b32.xlu0 %v3937_v37, %s3498_s3 }
  0x40   :  { %410 = vrot.lane.b32.xlu1 %v3943_v19, %s3498_s3 }
  0x41   :  { %408 = vrot.lane.b32.xlu0 %v3949_v47, %s3498_s3 }
  0x44   :  { %414 = vrot.lane.b32.xlu1 %v3955_v7, %s3498_s3 }
  0x45   :  { %412 = vrot.lane.b32.xlu0 %v3960_v5, %s3498_s3 }
  0x48   :  { %418 = vrot.lane.b32.xlu1 %v3719_v52, %s3498_s3 }
  0x49   :  { %416 = vrot.lane.b32.xlu0 %v3722_v53, %s3498_s3 }
  0x4c   :  { %422 = vrot.lane.b32.xlu1 %v3733_v60, %s3498_s3 }
  0x4d   :  { %420 = vrot.lane.b32.xlu0 %v3736_v61, %s3498_s3 }
  0x50   :  { %426 = vrot.lane.b32.xlu1 %v3739_v62, %s3498_s3 }
  0x51   :  { %424 = vrot.lane.b32.xlu0 %v3742_v63, %s3498_s3  ;;  %v6776_v63 = vunpack.c.h.bf16 %v4018_v6 }
  0x54   :  { %430 = vrot.lane.b32.xlu1 %v3750_v2, %s3498_s3 }
  0x55   :  { %428 = vrot.lane.b32.xlu0 %v3753_v3, %s3498_s3 }
  0x58   :  { %434 = vrot.lane.b32.xlu1 %v3769_v43, %s3498_s3 }
  0x59   :  { %432 = vrot.lane.b32.xlu0 %v3772_v44, %s3498_s3 }
  0x5c   :  { %438 = vrot.lane.b32.xlu1 %v3785_v51, %s3498_s3 }
  0x5d   :  { %436 = vrot.lane.b32.xlu0 %v3788_v54, %s3498_s3 }
  0x60   :  { %442 = vrot.lane.b32.xlu1 %v3791_v55, %s3498_s3 }
  0x61   :  { %440 = vrot.lane.b32.xlu0 %v3794_v56, %s3498_s3  ;;  %v4093_v56 = vld [vmem:[%s6528_s1 + $0x60] sm:$0xff]  }
  0x64   :  { %446 = vrot.lane.b32.xlu1 %v3800_v0, %s3498_s3  ;;  %v4088_v0 = vld [vmem:[%s6528_s1 + $0x58] sm:$0xff]  }
  0x65   :  { %444 = vrot.lane.b32.xlu0 %v3803_v4, %s3498_s3  ;;  %v4077_v4 = vld [vmem:[%s6528_s1 + $0x50] sm:$0xff]  }
  0x68   :  { %450 = vrot.lane.b32.xlu1 %v3819_v48, %s3498_s3  ;;  %v4127_v48 = vld [vmem:[%s6528_s1 + $0x80] sm:$0xff]  }
  0x69   :  { %448 = vrot.lane.b32.xlu0 %v3822_v49, %s3498_s3  ;;  %v4063_v49 = vld [vmem:[%s6528_s1 + $0x40] sm:$0xff]   ;;  %6770 = vst [vmem:[#allocation66_spill] sm:$0xff] %v4127_v48 }
  0x6c   :  { %454 = vrot.lane.b32.xlu1 %v3833_v15, %s3498_s3  ;;  %v4058_v15 = vld [vmem:[%s6528_s1 + $0x38] sm:$0xff]  }
  0x6d   :  { %452 = vrot.lane.b32.xlu0 %v3836_v24, %s3498_s3  ;;  %v4072_v24 = vld [vmem:[%s6528_s1 + $0x48] sm:$0xff]  }
  0x70   :  { %458 = vrot.lane.b32.xlu1 %v3839_v25, %s3498_s3  ;;  %v4113_v25 = vld [vmem:[%s6528_s1 + $0x70] sm:$0xff]  }
  0x71   :  { %456 = vrot.lane.b32.xlu0 %v3842_v31, %s3498_s3 }
  0x74   :  { %462 = vrot.lane.b32.xlu1 %v3847_v35, %s3498_s3  ;;  %v4049_v35 = vld [vmem:[%s6528_s1 + $0x30] sm:$0xff]  }
  0x75   :  { %460 = vrot.lane.b32.xlu0 %v3850_v36, %s3498_s3  ;;  %v4118_v36 = vld [vmem:[%s6528_s1 + $0x78] sm:$0xff]  }
  0x78   :  { %466 = vrot.lane.b32.xlu1 %v3884_v39, %s3498_s3  ;;  %v4104_v39 = vld [vmem:[%s6528_s1 + $0x68] sm:$0xff]  }
  0x79   :  { %464 = vrot.lane.b32.xlu0 %v3887_v42, %s3498_s3  ;;  %v4138_v42 = vld [vmem:[%s6528_s1 + $0x88] sm:$0xff]  }
  0x7a   :  { %v357_v55 = vpop.permute.xlu1 %356  ;;  %6771 = vst [vmem:[#allocation67_spill] sm:$0xff] %v4138_v42  ;;  %v6786_v42 = vunpack.c.l.bf16 %v4044_v14 }
  0x7b   :  { %v546_v31 = vsub.f32 %v3553_v16, %v357_v55  ;;  %v353_v44 = vpop.permute.xlu0 %352  ;;  %v4148_v55 = vld [vmem:[%s6528_s1 + $0x90] sm:$0xff]  }
  0x7c   :  { %v544_v43 = vsub.f32 %v3556_v17, %v353_v44  ;;  %470 = vrot.lane.b32.xlu1 %v3892_v50, %s3498_s3  ;;  %6772 = vst [vmem:[#allocation68_spill] sm:$0xff] %v4148_v55  ;;  %v4156_v44 = vld [vmem:[%s6528_s1 + $0x98] sm:$0xff]  }
  0x7d   :  { %v738_v51 = vadd.f32 %v3055_v20, %v546_v31  ;;  %468 = vrot.lane.b32.xlu0 %v3895_v22, %s3498_s3  ;;  %6773 = vst [vmem:[#allocation69_spill] sm:$0xff] %v4156_v44 }
  0x7e   :  { %v736_v54 = vadd.f32 %v3051_v27, %v544_v43  ;;  %v359_v3 = vpop.permute.xlu1 %358  ;;  %v6775_v43 = vunpack.c.h.bf16 %v4013_v1 }
  0x7f   :  { %v4158_v2 = vmul.f32 100.0, %v738_v51  ;;  %v547_v50 = vsub.f32 %v3561_v18, %v359_v3  ;;  %v355_v22 = vpop.permute.xlu0 %354  ;;  %v4173_v3 = vld [vmem:[%s6528_s1 + $0xa0] sm:$0xff]  }
  0x80   :  { %v4163_v27 = vmul.f32 100.0, %v736_v54  ;;  %v545_v31 = vsub.f32 %v3570_v23, %v355_v22  ;;  %474 = vrot.lane.b32.xlu1 %v3900_v12, %s3498_s3  ;;  %6774 = vst [vmem:[#allocation70_spill] sm:$0xff] %v4173_v3  ;;  %v6796_v3 = vld [vmem:[#allocation18_spill] sm:$0xff] }
  0x81   :  { %v930_v51 = vsub.f32 0.0, %v4158_v2  ;;  %v739_v54 = vadd.f32 %v6775_v43, %v547_v50  ;;  %472 = vrot.lane.b32.xlu0 %v3903_v32, %s3498_s3  ;;  %vm866_vm0 = vcmp.ge.f32.partialorder %v4158_v2, 0.0 }
  0x82   :  { %v928_v20 = vsub.f32 0.0, %v4163_v27  ;;  %v737_v62 = vadd.f32 %v6776_v63, %v545_v31  ;;  %v363_v12 = vpop.permute.xlu1 %362  ;;  %vm864_vm1 = vcmp.ge.f32.partialorder %v4163_v27, 0.0 }
  0x83   :  { %v4187_v61 = vmul.f32 100.0, %v739_v54  ;;  %v549_v50 = vsub.f32 %v3582_v29, %v363_v12  ;;  %v361_v1 = vpop.permute.xlu0 %360  ;;  %v994_v43 = vsel %vm866_vm0, %v930_v51, %v4158_v2  ;;  %v6777_v54 = vunpack.c.h.bf16 %v4023_v57 }
  0x84   :  { %v4194_v32 = vmul.f32 100.0, %v737_v62  ;;  %v548_v63 = vsub.f32 %v3592_v33, %v361_v1  ;;  %478 = vrot.lane.b32.xlu1 %v3923_v40, %s3498_s3  ;;  %v992_v6 = vsel %vm864_vm1, %v928_v20, %v4163_v27  ;;  %v1060_v31 = vmul.f32 1.442695, %v994_v43  ;;  %v6804_v27 = vld [vmem:[#allocation22_spill] sm:$0xff] }
  0x85   :  { %v931_v12 = vsub.f32 0.0, %v4187_v61  ;;  %v741_v55 = vadd.f32 %v6777_v54, %v549_v50  ;;  %476 = vrot.lane.b32.xlu0 %v3926_v28, %s3498_s3  ;;  %v1056_v62 = vmul.f32 1.442695, %v992_v6  ;;  %vm867_vm2 = vcmp.ge.f32.partialorder %v4187_v61, 0.0  ;;  %s3499_s3 = smov 2  }
  0x86   :  { %v929_v51 = vsub.f32 0.0, %v4194_v32  ;;  %v6778_v1 = vunpack.c.l.bf16 %v4023_v57  ;;  %v367_v40 = vpop.permute.xlu1 %366  ;;  %3242 = vpow2.f32 %v1060_v31  ;;  %vm865_vm3 = vcmp.ge.f32.partialorder %v4194_v32, 0.0 }
  0x87   :  { %v4212_v20 = vmul.f32 100.0, %v741_v55  ;;  %v551_v43 = vsub.f32 %v3608_v45, %v367_v40  ;;  %v365_v50 = vpop.permute.xlu0 %364  ;;  %3244 = vpow2.f32 %v1056_v62  ;;  %v995_v6 = vsel %vm867_vm2, %v931_v12, %v4187_v61 }
  0x88   :  { %v740_v22 = vadd.f32 %v6778_v1, %v548_v63  ;;  %v550_v28 = vsub.f32 %v3611_v46, %v365_v50  ;;  %v993_v57 = vsel %vm865_vm3, %v929_v51, %v4194_v32  ;;  %v1062_v63 = vmul.f32 1.442695, %v995_v6 }
  0x89   :  { %v933_v55 = vsub.f32 0.0, %v4212_v20  ;;  %v6779_v31 = vunpack.c.h.bf16 %v4030_v34  ;;  %v1058_v1 = vmul.f32 1.442695, %v993_v57  ;;  %vm869_vm4 = vcmp.ge.f32.partialorder %v4212_v20, 0.0 }
  0x8a   :  { %v4218_v54 = vmul.f32 100.0, %v740_v22  ;;  %v6780_v22 = vunpack.c.l.bf16 %v4030_v34  ;;  %v371_v44 = vpop.permute.xlu1 %370  ;;  %3246 = vpow2.f32 %v1062_v63  ;;  %v6809_v61 = vunpack.c.l.bf16 %v4088_v0 }
  0x8b   :  { %v743_v40 = vadd.f32 %v6779_v31, %v551_v43  ;;  %v553_v51 = vsub.f32 %v3623_v58, %v371_v44  ;;  %v369_v6 = vpop.permute.xlu0 %368  ;;  %3248 = vpow2.f32 %v1058_v1  ;;  %v997_v43 = vsel %vm869_vm4, %v933_v55, %v4212_v20 }
  0x8c   :  { %v932_v62 = vsub.f32 0.0, %v4218_v54  ;;  %v742_v12 = vadd.f32 %v6780_v22, %v550_v28  ;;  %vm868_vm5 = vcmp.ge.f32.partialorder %v4218_v54, 0.0  ;;  %v552_v31 = vsub.f32 %v3626_v59, %v369_v6 }
  0x8d   :  { %v4232_v50 = vmul.f32 100.0, %v743_v40  ;;  %v1066_v34 = vmul.f32 1.442695, %v997_v43  ;;  %v6781_v40 = vunpack.c.h.bf16 %v4035_v38  ;;  %v6782_v55 = vunpack.c.l.bf16 %v4035_v38 }
  0x8e   :  { %v4238_v57 = vmul.f32 100.0, %v742_v12  ;;  %v996_v28 = vsel %vm868_vm5, %v932_v62, %v4218_v54  ;;  %v375_v58 = vpop.permute.xlu1 %374  ;;  %v6811_v20 = vunpack.c.l.bf16 %v4093_v56 }
  0x8f   :  { %v935_v63 = vsub.f32 0.0, %v4232_v50  ;;  %v745_v44 = vadd.f32 %v6781_v40, %v553_v51  ;;  %v1064_v22 = vmul.f32 1.442695, %v996_v28  ;;  %vm871_vm6 = vcmp.ge.f32.partialorder %v4232_v50, 0.0  ;;  %v373_v43 = vpop.permute.xlu0 %372 }
  0x90   :  { %v934_v1 = vsub.f32 0.0, %v4238_v57  ;;  %v744_v12 = vadd.f32 %v6782_v55, %v552_v31  ;;  %3250 = vpow2.f32 %v1066_v34  ;;  %vm870_vm7 = vcmp.ge.f32.partialorder %v4238_v57, 0.0  ;;  %v4258_v28 = vpop.eup %3242 }
  0x91   :  { %v4252_v6 = vmul.f32 100.0, %v745_v44  ;;  %v555_v62 = vsub.f32 %v3641_v8, %v375_v58  ;;  %3252 = vpow2.f32 %v1064_v22  ;;  %v999_v51 = vsel %vm871_vm6, %v935_v63, %v4232_v50  ;;  %v4266_v44 = vpop.eup %3244 }
  0x92   :  { %v4260_v40 = vmul.f32 100.0, %v744_v12  ;;  %v554_v38 = vsub.f32 %v3644_v9, %v373_v43  ;;  %v998_v31 = vsel %vm870_vm7, %v934_v1, %v4238_v57  ;;  %v1070_v34 = vmul.f32 1.442695, %v999_v51  ;;  %v379_v9 = vpop.permute.xlu1 %378 }
  0x93   :  { %6783 = vst [vmem:[#allocation71_spill] sm:$0xff] %v4252_v6  ;;  %v937_v58 = vsub.f32 0.0, %v4252_v6  ;;  %v6785_v22 = vunpack.c.h.bf16 %v4044_v14  ;;  %v1186_v63 = vadd.f32 1.0, %v4258_v28  ;;  %v1068_v8 = vmul.f32 1.442695, %v998_v31  ;;  %v377_v60 = vpop.permute.xlu0 %376 }
  0x94   :  { %6784 = vst [vmem:[#allocation72_spill] sm:$0xff] %v4260_v40  ;;  %v936_v12 = vsub.f32 0.0, %v4260_v40  ;;  %v746_v43 = vadd.f32 %v6786_v42, %v554_v38  ;;  %v1184_v59 = vadd.f32 1.0, %v4266_v44  ;;  %3254 = vpow2.f32 %v1070_v34 }
  0x95   :  { %v747_v55 = vadd.f32 %v6785_v22, %v555_v62  ;;  %v557_v51 = vsub.f32 %v3647_v10, %v379_v9  ;;  %3256 = vrcp.f32 %v1186_v63  ;;  %vm872_vm8 = vcmp.ge.f32.partialorder %v4260_v40, 0.0  ;;  %v4280_v62 = vpop.eup %3246 }
  0x96   :  { %v4282_v31 = vmul.f32 100.0, %v746_v43  ;;  %v556_v22 = vsub.f32 %v3650_v11, %v377_v60  ;;  %3258 = vrcp.f32 %v1184_v59  ;;  %v1000_v42 = vsel %vm872_vm8, %v936_v12, %v4260_v40  ;;  %v4288_v14 = vpop.eup %3248  ;;  %v383_v59 = vpop.permute.xlu1 %382  ;;  %v6791_v40 = vld [vmem:[#allocation16_spill] sm:$0xff] }
  0x97   :  { %v4276_v1 = vmul.f32 100.0, %v747_v55  ;;  %v6788_v38 = vunpack.c.h.bf16 %v4049_v35  ;;  %v1187_v34 = vadd.f32 1.0, %v4280_v62  ;;  %3260 = vpow2.f32 %v1068_v8  ;;  %v381_v53 = vpop.permute.xlu0 %380 }
  0x98   :  { %6787 = vst [vmem:[#allocation73_spill] sm:$0xff] %v4282_v31  ;;  %v6789_v43 = vunpack.c.l.bf16 %v4049_v35  ;;  %v1185_v10 = vadd.f32 1.0, %v4288_v14  ;;  %v1072_v11 = vmul.f32 1.442695, %v1000_v42  ;;  %v559_v48 = vsub.f32 %v6791_v40, %v383_v59 }
  0x99   :  { %v749_v9 = vadd.f32 %v6788_v38, %v557_v51  ;;  %3262 = vrcp.f32 %v1187_v34  ;;  %vm873_vm9 = vcmp.ge.f32.partialorder %v4252_v6, 0.0  ;;  %v938_v51 = vsub.f32 0.0, %v4282_v31  ;;  %v6792_v38 = vld [vmem:[#allocation17_spill] sm:$0xff] }
  0x9a   :  { %v748_v60 = vadd.f32 %v6789_v43, %v556_v22  ;;  %v4302_v8 = vpop.eup %3250  ;;  %v558_v55 = vsub.f32 %v6792_v38, %v381_v53  ;;  %3264 = vrcp.f32 %v1185_v10  ;;  %v1001_v35 = vsel %vm873_vm9, %v937_v58, %v4252_v6  ;;  %v387_v53 = vpop.permute.xlu1 %386 }
  0x9b   :  { %v4298_v12 = vmul.f32 100.0, %v749_v9  ;;  %v4309_v22 = vpop.eup %3252  ;;  %v6793_v34 = vunpack.c.h.bf16 %v4058_v15  ;;  %v1189_v59 = vadd.f32 1.0, %v4302_v8  ;;  %v6794_v63 = vunpack.c.l.bf16 %v4058_v15  ;;  %v6797_v15 = vld [vmem:[#allocation19_spill] sm:$0xff] }
  0x9c   :  { %v4312_v9 = vmul.f32 100.0, %v748_v60  ;;  %v1188_v10 = vadd.f32 1.0, %v4309_v22  ;;  %3266 = vpow2.f32 %v1072_v11  ;;  %v1074_v58 = vmul.f32 1.442695, %v1001_v35  ;;  %v385_v60 = vpop.permute.xlu0 %384 }
  0x9d   :  { %6790 = vst [vmem:[#allocation74_spill] sm:$0xff] %v4298_v12  ;;  %v751_v43 = vadd.f32 %v6793_v34, %v559_v48  ;;  %v750_v40 = vadd.f32 %v6794_v63, %v558_v55  ;;  %v561_v42 = vsub.f32 %v6796_v3, %v387_v53  ;;  %3268 = vrcp.f32 %v1189_v59 }
  0x9e   :  { %vm874_vm11 = vcmp.ge.f32.partialorder %v4282_v31, 0.0  ;;  %v4324_v48 = vpop.eup %3254  ;;  %v560_v55 = vsub.f32 %v6797_v15, %v385_v60  ;;  %3270 = vrcp.f32 %v1188_v10  ;;  %v6798_v59 = vunpack.c.h.bf16 %v4063_v49  ;;  %v391_v15 = vpop.permute.xlu1 %390 }
  0x9f   :  { %v4320_v38 = vmul.f32 100.0, %v751_v43  ;;  %v4326_v34 = vmul.f32 100.0, %v750_v40  ;;  %v1002_v11 = vsel %vm874_vm11, %v938_v51, %v4282_v31  ;;  %v3257_v63 = vpop.eup %3256  ;;  %v1191_v3 = vadd.f32 1.0, %v4324_v48  ;;  %v6800_v43 = vld [vmem:[#allocation20_spill] sm:$0xff]  ;;  %v6801_v40 = vld [vmem:[#allocation21_spill] sm:$0xff] }
  0xa0   :  { %v753_v53 = vadd.f32 %v6798_v59, %v561_v42  ;;  %v3259_v6 = vpop.eup %3258  ;;  %v6799_v60 = vunpack.c.l.bf16 %v4063_v49  ;;  %v1378_v52 = vmul.f32 %v3257_v63, %v4258_v28  ;;  %3272 = vpow2.f32 %v1074_v58 }
  0xa1   :  { %6795 = vst [vmem:[#allocation75_spill] sm:$0xff] %v4320_v38  ;;  %v4341_v51 = vpop.eup %3260  ;;  %v563_v31 = vsub.f32 %v6800_v43, %v391_v15  ;;  %v389_v38 = vpop.permute.xlu0 %388  ;;  %v1376_v42 = vmul.f32 %v3259_v6, %v4266_v44  ;;  %v4347_v59 = vmul.f32 1.442695, %v1002_v11  ;;  %3274 = vrcp.f32 %v1191_v3 }
  0xa2   :  { %v752_v10 = vadd.f32 %v6799_v60, %v560_v55  ;;  %v4343_v35 = vmul.f32 100.0, %v753_v53  ;;  %v562_v49 = vsub.f32 %v6801_v40, %v389_v38  ;;  %v1442_v55 = vsel %vm866_vm0, %v3257_v63, %v1378_v52  ;;  %v395_v2 = vpop.permute.xlu1 %394 }
  0xa3   :  { %v3263_v28 = vpop.eup %3262  ;;  %v6802_v58 = vunpack.c.h.bf16 %v4072_v24  ;;  %v1440_v15 = vsel %vm864_vm1, %v3259_v6, %v1376_v42  ;;  %v1506_v60 = vmul.f32 %v1442_v55, %v3553_v16  ;;  %v1190_v44 = vadd.f32 1.0, %v4341_v51 }
  0xa4   :  { %v4349_v12 = vmul.f32 100.0, %v752_v10  ;;  %v3265_v11 = vpop.eup %3264  ;;  %v6803_v38 = vunpack.c.l.bf16 %v4072_v24  ;;  %v1889_v52 = vsub.f32 1.0, %v1440_v15  ;;  %v1504_v3 = vmul.f32 %v1440_v15, %v3556_v17 }
  0xa5   :  { %v755_v53 = vadd.f32 %v6802_v58, %v563_v31  ;;  %v565_v6 = vsub.f32 %v6804_v27, %v395_v2  ;;  %v393_v42 = vpop.permute.xlu0 %392  ;;  %v2795_v58 = vpack.c.bf16 %v1506_v60, %v1506_v60  ;;  %v1891_v60 = vsub.f32 1.0, %v1442_v55 }
  0xa6   :  { %v754_v43 = vadd.f32 %v6803_v38, %v562_v49  ;;  %v4368_v16 = vpop.eup %3266  ;;  %v564_v10 = vsub.f32 %v3698_v30, %v393_v42  ;;  %2017 = vrot.lane.b32.xlu0 %v1889_v52, %s3499_s3  ;;  %v2793_v24 = vpack.c.bf16 %v1504_v3, %v1504_v3  ;;  %v1377_v49 = vmul.f32 %v3265_v11, %v4288_v14 }
  0xa7   :  { %v4365_v31 = vmul.f32 100.0, %v755_v53  ;;  %v3269_v15 = vpop.eup %3268  ;;  %v6805_v53 = vunpack.c.h.bf16 %v4077_v4  ;;  %1827 = vst.msk [vmem:[%s6529_s4 + $0x8] sm:$0xf] %vm1824_vm10, %v2795_v58  ;;  %3276 = vrcp.f32 %v1190_v44  ;;  %v6806_v14 = vunpack.c.l.bf16 %v4077_v4 }
  0xa8   :  { %v4370_v40 = vmul.f32 100.0, %v754_v43  ;;  %v1379_v43 = vmul.f32 %v3263_v28, %v4280_v62  ;;  %v3271_v2 = vpop.eup %3270  ;;  %1825 = vst.msk [vmem:[%s6529_s4] sm:$0xf] %vm1824_vm10, %v2793_v24  ;;  %v1441_v55 = vsel %vm865_vm3, %v3265_v11, %v1377_v49  ;;  %v6807_v62 = vld [vmem:[#allocation48_spill] sm:$0xff]  ;;  %v1381_v11 = vmul.f32 %v3269_v15, %v4302_v8 }
  0xa9   :  { %v757_v38 = vadd.f32 %v6805_v53, %v565_v6  ;;  %v756_v3 = vadd.f32 %v6806_v14, %v564_v10  ;;  %v399_v6 = vpop.permute.xlu1 %398  ;;  %v397_v53 = vpop.permute.xlu0 %396  ;;  %v1890_v42 = vsub.f32 1.0, %v1441_v55  ;;  %v1505_v52 = vmul.f32 %v1441_v55, %v3570_v23 }
  0xaa   :  { %v567_v44 = vsub.f32 %v6807_v62, %v399_v6  ;;  %v4396_v63 = vpop.eup %3272  ;;  %v566_v4 = vsub.f32 %v3863_v41, %v397_v53  ;;  %2021 = vrot.lane.b32.xlu0 %v1891_v60, %s3499_s3  ;;  %v1443_v10 = vsel %vm867_vm2, %v3263_v28, %v1379_v43  ;;  %v1380_v32 = vmul.f32 %v3271_v2, %v4309_v22 }
  0xab   :  { %v4392_v58 = vmul.f32 100.0, %v757_v38  ;;  %v4404_v24 = vmul.f32 100.0, %v756_v3  ;;  %v6808_v49 = vunpack.c.h.bf16 %v4088_v0  ;;  %2019 = vrot.lane.b32.xlu1 %v1890_v42, %s3499_s3  ;;  %v2794_v14 = vpack.c.bf16 %v1505_v52, %v1505_v52  ;;  %v3275_v55 = vpop.eup %3274 }
  0xac   :  { %v1507_v6 = vmul.f32 %v1443_v10, %v3561_v18  ;;  %v758_v28 = vadd.f32 %v6809_v61, %v566_v4  ;;  %v1892_v22 = vsub.f32 1.0, %v1443_v10  ;;  %v1444_v8 = vsel %vm868_vm5, %v3271_v2, %v1380_v32 }
  0xad   :  { %v759_v38 = vadd.f32 %v6808_v49, %v567_v44  ;;  %v403_v43 = vpop.permute.xlu1 %402  ;;  %1826 = vst.msk [vmem:[%s6529_s4 + $0x4] sm:$0xf] %vm1824_vm10, %v2794_v14  ;;  %v401_v52 = vpop.permute.xlu0 %400  ;;  %v1893_v53 = vsub.f32 1.0, %v1444_v8  ;;  %v1508_v4 = vmul.f32 %v1444_v8, %v3592_v33  ;;  %v1445_v54 = vsel %vm869_vm4, %v3269_v15, %v1381_v11 }
  0xae   :  { %v569_v42 = vsub.f32 %v3908_v26, %v403_v43  ;;  %v2796_v44 = vpack.c.bf16 %v1507_v6, %v1507_v6  ;;  %v4422_v49 = vmul.f32 100.0, %v758_v28  ;;  %v568_v0 = vsub.f32 %v3916_v21, %v401_v52 }
  0xaf   :  { %v4415_v3 = vmul.f32 100.0, %v759_v38  ;;  %v6810_v32 = vunpack.c.h.bf16 %v4093_v56  ;;  %2023 = vrot.lane.b32.xlu1 %v1892_v22, %s3499_s3  ;;  %2025 = vrot.lane.b32.xlu0 %v1893_v53, %s3499_s3  ;;  %v1509_v14 = vmul.f32 %v1445_v54, %v3582_v29  ;;  %v2797_v11 = vpack.c.bf16 %v1508_v4, %v1508_v4  ;;  %v6832_v53 = vld [vmem:[#allocation11_spill] sm:$0xff] }
  0xb0   :  { %1828 = vst.msk [vmem:[%s6529_s4 + $0xc] sm:$0xf] %vm1824_vm10, %v2796_v44  ;;  %v760_v15 = vadd.f32 %v6811_v20, %v568_v0  ;;  %v1894_v61 = vsub.f32 1.0, %v1445_v54  ;;  %v1383_v28 = vmul.f32 %v3275_v55, %v4324_v48  ;;  %v1192_v22 = vadd.f32 1.0, %v4368_v16 }
  0xb1   :  { %v761_v38 = vadd.f32 %v6810_v32, %v569_v42  ;;  %v407_v6 = vpop.permute.xlu1 %406  ;;  %v3277_v43 = vpop.eup %3276  ;;  %v2798_v44 = vpack.c.bf16 %v1509_v14, %v1509_v14  ;;  %1829 = vst.msk [vmem:[%s6529_s4 + $0x10] sm:$0xf] %vm1824_vm10, %v2797_v11  ;;  %v6812_v32 = vunpack.c.h.bf16 %v4104_v39  ;;  %vm875_vm12 = vcmp.ge.f32.partialorder %v4276_v1, 0.0 }
  0xb2   :  { %v571_v42 = vsub.f32 %v3931_v13, %v407_v6  ;;  %v405_v52 = vpop.permute.xlu0 %404  ;;  %v1382_v48 = vmul.f32 %v3277_v43, %v4341_v51  ;;  %v1447_v0 = vsel %vm871_vm6, %v3275_v55, %v1383_v28  ;;  %v4456_v54 = vmul.f32 100.0, %v760_v15 }
  0xb3   :  { %v4442_v8 = vmul.f32 100.0, %v761_v38  ;;  %v570_v56 = vsub.f32 %v3937_v37, %v405_v52  ;;  %1830 = vst.msk [vmem:[%s6529_s4 + $0x14] sm:$0xf] %vm1824_vm10, %v2798_v44  ;;  %2027 = vrot.lane.b32.xlu1 %v1894_v61, %s3499_s3  ;;  %v1511_v14 = vmul.f32 %v1447_v0, %v3608_v45  ;;  %v6813_v51 = vunpack.c.l.bf16 %v4104_v39  ;;  %v6835_v45 = vld [vmem:[#allocation27_spill] sm:$0xff] }
  0xb4   :  { %v763_v38 = vadd.f32 %v6812_v32, %v571_v42  ;;  %v1446_v55 = vsel %vm870_vm7, %v3277_v43, %v1382_v48  ;;  %v1896_v15 = vsub.f32 1.0, %v1447_v0  ;;  %3278 = vrcp.f32 %v1192_v22 }
  0xb5   :  { %v762_v50 = vadd.f32 %v6813_v51, %v570_v56  ;;  %v411_v20 = vpop.permute.xlu1 %410  ;;  %v1895_v6 = vsub.f32 1.0, %v1446_v55  ;;  %v1510_v28 = vmul.f32 %v1446_v55, %v3611_v46  ;;  %v2800_v39 = vpack.c.bf16 %v1511_v14, %v1511_v14 }
  0xb6   :  { %v4470_v11 = vmul.f32 100.0, %v763_v38  ;;  %v573_v42 = vsub.f32 %v3943_v19, %v411_v20  ;;  %v409_v52 = vpop.permute.xlu0 %408  ;;  %v1193_v56 = vadd.f32 1.0, %v4396_v63  ;;  %v6814_v22 = vunpack.c.h.bf16 %v4113_v25 }
  0xb7   :  { %v4474_v61 = vmul.f32 100.0, %v762_v50  ;;  %v572_v44 = vsub.f32 %v3949_v47, %v409_v52  ;;  %2029 = vrot.lane.b32.xlu0 %v1895_v6, %s3499_s3  ;;  %v2799_v43 = vpack.c.bf16 %v1510_v28, %v1510_v28  ;;  %2031 = vrot.lane.b32.xlu1 %v1896_v15, %s3499_s3  ;;  %3280 = vpow2.f32 %v4347_v59  ;;  %1832 = vst.msk [vmem:[%s6529_s4 + $0x1c] sm:$0xf] %vm1824_vm10, %v2800_v39 }
  0xb8   :  { %v765_v48 = vadd.f32 %v6814_v22, %v573_v42  ;;  %v6815_v32 = vunpack.c.l.bf16 %v4113_v25  ;;  %3282 = vrcp.f32 %v1193_v56  ;;  %v6816_v50 = vsub.f32 0.0, %v4276_v1 }
  0xb9   :  { %v415_v14 = vpop.permute.xlu1 %414  ;;  %1831 = vst.msk [vmem:[%s6529_s4 + $0x18] sm:$0xf] %vm1824_vm10, %v2799_v43  ;;  %vm876_vm13 = vcmp.ge.f32.partialorder %v4312_v9, 0.0  ;;  %v6817_v28 = vsub.f32 0.0, %v4312_v9  ;;  %v6819_v43 = vld [vmem:[#allocation74_spill] sm:$0xff]  ;;  %vm878_vm15 = vcmp.ge.f32.partialorder %v4326_v34, 0.0 }
  0xba   :  { %v764_v38 = vadd.f32 %v6815_v32, %v572_v44  ;;  %v4496_v59 = vmul.f32 100.0, %v765_v48  ;;  %v575_v51 = vsub.f32 %v3955_v7, %v415_v14  ;;  %v413_v25 = vpop.permute.xlu0 %412  ;;  %v1003_v55 = vsel %vm875_vm12, %v6816_v50, %v4276_v1 }
  0xbb   :  { %v574_v15 = vsub.f32 %v3960_v5, %v413_v25  ;;  %v1078_v6 = vmul.f32 1.442695, %v1003_v55  ;;  %v1004_v42 = vsel %vm876_vm13, %v6817_v28, %v4312_v9  ;;  %v6818_v44 = vunpack.c.h.bf16 %v4118_v36  ;;  %v6822_v55 = vld [vmem:[#allocation24_spill] sm:$0xff] }
  0xbc   :  { %v4512_v52 = vmul.f32 100.0, %v764_v38  ;;  %v1080_v56 = vmul.f32 1.442695, %v1004_v42  ;;  %vm877_vm14 = vcmp.ge.f32.partialorder %v6819_v43, 0.0  ;;  %v6820_v48 = vunpack.c.l.bf16 %v4118_v36  ;;  %v6823_v36 = vld [vmem:[#allocation25_spill] sm:$0xff] }
  0xbd   :  { %v767_v39 = vadd.f32 %v6818_v44, %v575_v51  ;;  %v419_v14 = vpop.permute.xlu1 %418  ;;  %3284 = vpow2.f32 %v1078_v6  ;;  %v6821_v25 = vsub.f32 0.0, %v6819_v43  ;;  %v6824_v6 = vld [vmem:[#allocation75_spill] sm:$0xff]  ;;  %v6828_v4 = vsub.f32 0.0, %v4326_v34 }
  0xbe   :  { %v766_v32 = vadd.f32 %v6820_v48, %v574_v15  ;;  %v577_v51 = vsub.f32 %v6822_v55, %v419_v14  ;;  %v417_v28 = vpop.permute.xlu0 %416  ;;  %3286 = vpow2.f32 %v1080_v56  ;;  %v3279_v44 = vpop.eup %3278  ;;  %vm879_vm0 = vcmp.ge.f32.partialorder %v6824_v6, 0.0 }
  0xbf   :  { %v1005_v38 = vsel %vm877_vm14, %v6821_v25, %v6819_v43  ;;  %v4525_v50 = vmul.f32 100.0, %v767_v39  ;;  %v576_v15 = vsub.f32 %v6823_v36, %v417_v28  ;;  %v1384_v25 = vmul.f32 %v3279_v44, %v4368_v16  ;;  %v6825_v39 = vld [vmem:[#allocation66_spill] sm:$0xff]  ;;  %v6848_v36 = vld [vmem:[#allocation69_spill] sm:$0xff] }
  0xc0   :  { %v1082_v42 = vmul.f32 1.442695, %v1005_v38  ;;  %v4528_v22 = vmul.f32 100.0, %v766_v32  ;;  %v6826_v0 = vunpack.c.h.bf16 %v6825_v39  ;;  %v6827_v32 = vunpack.c.l.bf16 %v6825_v39 }
  0xc1   :  { %v423_v28 = vpop.permute.xlu1 %422  ;;  %v1006_v48 = vsel %vm878_vm15, %v6828_v4, %v4326_v34  ;;  %v4546_v57 = vpop.eup %3280  ;;  %v6831_v39 = vsub.f32 0.0, %v6824_v6  ;;  %vm880_vm3 = vcmp.ge.f32.partialorder %v4349_v12, 0.0  ;;  %vm881_vm6 = vcmp.ge.f32.partialorder %v4343_v35, 0.0 }
  0xc2   :  { %v769_v20 = vadd.f32 %v6826_v0, %v577_v51  ;;  %3288 = vpow2.f32 %v1082_v42  ;;  %v768_v38 = vadd.f32 %v6827_v32, %v576_v15  ;;  %v1448_v0 = vsel %vm872_vm8, %v3279_v44, %v1384_v25  ;;  %v6830_v51 = vld [vmem:[#allocation26_spill] sm:$0xff]  ;;  %v421_v56 = vpop.permute.xlu0 %420  ;;  %v3283_v32 = vpop.eup %3282 }
  0xc3   :  { %v579_v42 = vsub.f32 %v6830_v51, %v423_v28  ;;  %v1084_v10 = vmul.f32 1.442695, %v1006_v48  ;;  %v1007_v15 = vsel %vm879_vm0, %v6831_v39, %v6824_v6  ;;  %v1897_v14 = vsub.f32 1.0, %v1448_v0  ;;  %v6833_v28 = vld [vmem:[#allocation67_spill] sm:$0xff] }
  0xc4   :  { %v1512_v60 = vmul.f32 %v1448_v0, %v6832_v53  ;;  %v1194_v4 = vadd.f32 1.0, %v4546_v57  ;;  %v4558_v2 = vmul.f32 100.0, %v768_v38  ;;  %v1385_v44 = vmul.f32 %v3283_v32, %v4396_v63 }
  0xc5   :  { %v4561_v25 = vmul.f32 100.0, %v769_v20  ;;  %v6834_v48 = vunpack.c.h.bf16 %v6833_v28  ;;  %v578_v46 = vsub.f32 %v6835_v45, %v421_v56  ;;  %2033 = vrot.lane.b32.xlu0 %v1897_v14, %s3499_s3  ;;  %v427_v0 = vpop.permute.xlu1 %426  ;;  %v1086_v53 = vmul.f32 1.442695, %v1007_v15  ;;  %v6839_v15 = vld [vmem:[#allocation28_spill] sm:$0xff] }
  0xc6   :  { %v2801_v39 = vpack.c.bf16 %v1512_v60, %v1512_v60  ;;  %3290 = vrcp.f32 %v1194_v4  ;;  %v1449_v38 = vsel %vm873_vm9, %v3283_v32, %v1385_v44  ;;  %v6837_v63 = vunpack.c.l.bf16 %v6833_v28  ;;  %v6838_v60 = vld [vmem:[#allocation10_spill] sm:$0xff]  ;;  %v6840_v32 = vld [vmem:[#allocation29_spill] sm:$0xff] }
  0xc7   :  { %v771_v16 = vadd.f32 %v6834_v48, %v579_v42  ;;  %3292 = vpow2.f32 %v1084_v10  ;;  %v425_v42 = vpop.permute.xlu0 %424  ;;  %v4574_v48 = vpop.eup %3284  ;;  %v1513_v56 = vmul.f32 %v1449_v38, %v6838_v60  ;;  %v1898_v14 = vsub.f32 1.0, %v1449_v38  ;;  %v6841_v38 = vld [vmem:[#allocation68_spill] sm:$0xff] }
  0xc8   :  { %v770_v20 = vadd.f32 %v6837_v63, %v578_v46  ;;  %1833 = vst.msk [vmem:[%s6529_s4 + $0x20] sm:$0xf] %vm1824_vm10, %v2801_v39  ;;  %v581_v33 = vsub.f32 %v6839_v15, %v427_v0  ;;  %v580_v4 = vsub.f32 %v6840_v32, %v425_v42  ;;  %v4583_v44 = vpop.eup %3286  ;;  %v1195_v46 = vadd.f32 1.0, %v4574_v48  ;;  %v6847_v15 = vld [vmem:[#allocation31_spill] sm:$0xff] }
  0xc9   :  { %v4570_v18 = vmul.f32 100.0, %v771_v16  ;;  %v2802_v16 = vpack.c.bf16 %v1513_v56, %v1513_v56  ;;  %2035 = vrot.lane.b32.xlu1 %v1898_v14, %s3499_s3  ;;  %v1196_v39 = vadd.f32 1.0, %v4583_v44  ;;  %v6842_v63 = vunpack.c.h.bf16 %v6841_v38 }
  0xca   :  { %v4588_v28 = vmul.f32 100.0, %v770_v20  ;;  %v6843_v42 = vunpack.c.l.bf16 %v6841_v38  ;;  %3294 = vrcp.f32 %v1195_v46  ;;  %vm882_vm7 = vcmp.ge.f32.partialorder %v4370_v40, 0.0 }
  0xcb   :  { %vm899_vm1 = vcmp.ge.f32.partialorder %v4570_v18, 0.0  ;;  %v963_v10 = vsub.f32 0.0, %v4570_v18  ;;  %v773_v0 = vadd.f32 %v6842_v63, %v581_v33  ;;  %1834 = vst.msk [vmem:[%s6529_s4 + $0x24] sm:$0xf] %vm1824_vm10, %v2802_v16  ;;  %3296 = vrcp.f32 %v1196_v39  ;;  %v429_v16 = vpop.permute.xlu0 %428 }
  0xcc   :  { %v772_v29 = vadd.f32 %v6843_v42, %v580_v4  ;;  %v4596_v60 = vpop.eup %3288  ;;  %vm898_vm2 = vcmp.ge.f32.partialorder %v4588_v28, 0.0  ;;  %v962_v20 = vsub.f32 0.0, %v4588_v28  ;;  %3298 = vpow2.f32 %v1086_v53 }
  0xcd   :  { %v1027_v23 = vsel %vm899_vm1, %v963_v10, %v4570_v18  ;;  %v1197_v14 = vadd.f32 1.0, %v4596_v60  ;;  %v4608_v33 = vmul.f32 100.0, %v773_v0  ;;  %v431_v10 = vpop.permute.xlu1 %430 }
  0xce   :  { %v1126_v56 = vmul.f32 1.442695, %v1027_v23  ;;  %v1026_v4 = vsel %vm898_vm2, %v962_v20, %v4588_v28  ;;  %v4613_v46 = vmul.f32 100.0, %v772_v29  ;;  %v6845_v29 = vsub.f32 0.0, %v4349_v12  ;;  %v6846_v20 = vld [vmem:[#allocation30_spill] sm:$0xff] }
  0xcf   :  { %6844 = vst [vmem:[#allocation74_spill] sm:$0xff] %v4608_v33  ;;  %v1124_v38 = vmul.f32 1.442695, %v1026_v4  ;;  %vm901_vm4 = vcmp.ge.f32.partialorder %v4608_v33, 0.0  ;;  %v965_v23 = vsub.f32 0.0, %v4608_v33 }
  0xd0   :  { %3300 = vpow2.f32 %v1126_v56  ;;  %vm900_vm5 = vcmp.ge.f32.partialorder %v4613_v46, 0.0  ;;  %v964_v39 = vsub.f32 0.0, %v4613_v46  ;;  %v1008_v53 = vsel %vm880_vm3, %v6845_v29, %v4349_v12  ;;  %v3291_v63 = vpop.eup %3290 }
  0xd1   :  { %3302 = vrcp.f32 %v1197_v14  ;;  %v1029_v0 = vsel %vm901_vm4, %v965_v23, %v4608_v33  ;;  %v1088_v42 = vmul.f32 1.442695, %v1008_v53  ;;  %v583_v56 = vsub.f32 %v6846_v20, %v431_v10  ;;  %v4629_v14 = vpop.eup %3292 }
  0xd2   :  { %3304 = vpow2.f32 %v1124_v38  ;;  %v1386_v4 = vmul.f32 %v3291_v63, %v4546_v57  ;;  %v1130_v17 = vmul.f32 1.442695, %v1029_v0  ;;  %v1028_v55 = vsel %vm900_vm5, %v964_v39, %v4613_v46  ;;  %v6852_v39 = vld [vmem:[#allocation13_spill] sm:$0xff] }
  0xd3   :  { %v582_v29 = vsub.f32 %v6847_v15, %v429_v16  ;;  %v1198_v38 = vadd.f32 1.0, %v4629_v14  ;;  %v1128_v32 = vmul.f32 1.442695, %v1028_v55  ;;  %3306 = vpow2.f32 %v1088_v42 }
  0xd4   :  { %v6849_v23 = vunpack.c.h.bf16 %v6848_v36  ;;  %v1450_v10 = vsel %vm874_vm11, %v3291_v63, %v1386_v4  ;;  %3308 = vpow2.f32 %v1130_v17  ;;  %v6851_v57 = vunpack.c.l.bf16 %v6848_v36  ;;  %v3295_v55 = vpop.eup %3294 }
  0xd5   :  { %v1899_v20 = vsub.f32 1.0, %v1450_v10  ;;  %v1514_v7 = vmul.f32 %v1450_v10, %v6852_v39  ;;  %3310 = vrcp.f32 %v1198_v38  ;;  %v6855_v33 = vsub.f32 0.0, %v4343_v35  ;;  %v3297_v36 = vpop.eup %3296  ;;  %v6858_v39 = vld [vmem:[#allocation15_spill] sm:$0xff] }
  0xd6   :  { %v775_v53 = vadd.f32 %v6849_v23, %v583_v56  ;;  %v774_v0 = vadd.f32 %v6851_v57, %v582_v29  ;;  %3312 = vpow2.f32 %v1128_v32  ;;  %v1387_v56 = vmul.f32 %v3295_v55, %v4574_v48  ;;  %v4659_v4 = vpop.eup %3298 }
  0xd7   :  { %v1009_v17 = vsel %vm881_vm6, %v6855_v33, %v4343_v35  ;;  %2037 = vrot.lane.b32.xlu0 %v1899_v20, %s3499_s3  ;;  %v2803_v63 = vpack.c.bf16 %v1514_v7, %v1514_v7  ;;  %v1388_v29 = vmul.f32 %v3297_v36, %v4583_v44  ;;  %v1199_v48 = vadd.f32 1.0, %v4659_v4 }
  0xd8   :  { %v4645_v16 = vmul.f32 100.0, %v775_v53  ;;  %v4647_v42 = vmul.f32 100.0, %v774_v0  ;;  %v1090_v23 = vmul.f32 1.442695, %v1009_v17  ;;  %v1451_v7 = vsel %vm875_vm12, %v3295_v55, %v1387_v56  ;;  %v6857_v0 = vld [vmem:[#allocation12_spill] sm:$0xff] }
  0xd9   :  { %1835 = vst.msk [vmem:[%s6529_s4 + $0x28] sm:$0xf] %vm1824_vm10, %v2803_v63  ;;  %v6856_v20 = vsub.f32 0.0, %v4370_v40  ;;  %v1515_v33 = vmul.f32 %v1451_v7, %v6857_v0  ;;  %v1900_v17 = vsub.f32 1.0, %v1451_v7  ;;  %v1452_v1 = vsel %vm876_vm13, %v3297_v36, %v1388_v29  ;;  %v435_v29 = vpop.permute.xlu1 %434 }
  0xda   :  { %6853 = vst [vmem:[#allocation75_spill] sm:$0xff] %v4645_v16  ;;  %6854 = vst [vmem:[#allocation66_spill] sm:$0xff] %v4647_v42  ;;  %vm903_vm8 = vcmp.ge.f32.partialorder %v4645_v16, 0.0  ;;  %v967_v32 = vsub.f32 0.0, %v4645_v16  ;;  %vm902_vm9 = vcmp.ge.f32.partialorder %v4647_v42, 0.0  ;;  %v966_v38 = vsub.f32 0.0, %v4647_v42  ;;  %v4664_v53 = vpop.eup %3300 }
  0xdb   :  { %v1010_v10 = vsel %vm882_vm7, %v6856_v20, %v4370_v40  ;;  %v3303_v57 = vpop.eup %3302  ;;  %v1219_v55 = vadd.f32 1.0, %v4664_v53  ;;  %v1901_v56 = vsub.f32 1.0, %v1452_v1  ;;  %3314 = vrcp.f32 %v1199_v48  ;;  %2039 = vrot.lane.b32.xlu1 %v1900_v17, %s3499_s3 }
  0xdc   :  { %v1031_v44 = vsel %vm903_vm8, %v967_v32, %v4645_v16  ;;  %v4685_v63 = vpop.eup %3304  ;;  %v1516_v32 = vmul.f32 %v1452_v1, %v6858_v39  ;;  %v1389_v16 = vmul.f32 %v3303_v57, %v4596_v60  ;;  %v2804_v15 = vpack.c.bf16 %v1515_v33, %v1515_v33 }
  0xdd   :  { %3316 = vrcp.f32 %v1219_v55  ;;  %v1218_v20 = vadd.f32 1.0, %v4685_v63  ;;  %v1134_v7 = vmul.f32 1.442695, %v1031_v44  ;;  %v4691_v0 = vpop.eup %3306  ;;  %2041 = vrot.lane.b32.xlu0 %v1901_v56, %s3499_s3  ;;  %v1030_v60 = vsel %vm902_vm9, %v966_v38, %v4647_v42  ;;  %v6860_v44 = vld [vmem:[#allocation14_spill] sm:$0xff] }
  0xde   :  { %v2805_v9 = vpack.c.bf16 %v1516_v32, %v1516_v32  ;;  %v1453_v36 = vsel %vm877_vm14, %v3303_v57, %v1389_v16  ;;  %3318 = vpow2.f32 %v1090_v23  ;;  %v4699_v48 = vpop.eup %3308  ;;  %1836 = vst.msk [vmem:[%s6529_s4 + $0x2c] sm:$0xf] %vm1824_vm10, %v2804_v15  ;;  %v1200_v43 = vadd.f32 1.0, %v4691_v0  ;;  %v433_v16 = vpop.permute.xlu0 %432  ;;  %v6861_v32 = vld [vmem:[#allocation32_spill] sm:$0xff] }
  0xdf   :  { %6859 = vst [vmem:[#allocation72_spill] sm:$0xff] %v4699_v48  ;;  %3320 = vrcp.f32 %v1218_v20  ;;  %v1517_v33 = vmul.f32 %v1453_v36, %v6860_v44  ;;  %v1902_v17 = vsub.f32 1.0, %v1453_v36  ;;  %v3311_v57 = vpop.eup %3310  ;;  %v1221_v38 = vadd.f32 1.0, %v4699_v48  ;;  %v6862_v44 = vld [vmem:[#allocation33_spill] sm:$0xff] }
  0xe0   :  { %1837 = vst.msk [vmem:[%s6529_s4 + $0x30] sm:$0xf] %vm1824_vm10, %v2805_v9  ;;  %3322 = vpow2.f32 %v1134_v7  ;;  %v1132_v23 = vmul.f32 1.442695, %v1030_v60  ;;  %v1092_v1 = vmul.f32 1.442695, %v1010_v10  ;;  %v4712_v55 = vpop.eup %3312  ;;  %v1390_v56 = vmul.f32 %v3311_v57, %v4629_v14 }
  0xe1   :  { %v2806_v15 = vpack.c.bf16 %v1517_v33, %v1517_v33  ;;  %2043 = vrot.lane.b32.xlu1 %v1902_v17, %s3499_s3  ;;  %3324 = vrcp.f32 %v1200_v43  ;;  %v585_v20 = vsub.f32 %v6861_v32, %v435_v29  ;;  %v1220_v36 = vadd.f32 1.0, %v4712_v55  ;;  %v6863_v14 = vld [vmem:[#allocation70_spill] sm:$0xff]  ;;  %v3228_v17 = vld [vmem:[%s6528_s1 + $0xa8] sm:$0xff]  }
  0xe2   :  { %3326 = vrcp.f32 %v1221_v38  ;;  %v584_v9 = vsub.f32 %v6862_v44, %v433_v16  ;;  %vm883_vm11 = vcmp.ge.f32.partialorder %v4365_v31, 0.0  ;;  %v1454_v10 = vsel %vm878_vm15, %v3311_v57, %v1390_v56  ;;  %v6866_v16 = vld [vmem:[#allocation17_spill] sm:$0xff]  ;;  %v439_v56 = vpop.permute.xlu1 %438  ;;  %v6873_v44 = vld [vmem:[#allocation16_spill] sm:$0xff] }
  0xe3   :  { %1838 = vst.msk [vmem:[%s6529_s4 + $0x34] sm:$0xf] %vm1824_vm10, %v2806_v15  ;;  %3328 = vpow2.f32 %v1132_v23  ;;  %v6864_v7 = vunpack.c.h.bf16 %v6863_v14  ;;  %v6865_v29 = vsub.f32 0.0, %v4365_v31  ;;  %v1903_v43 = vsub.f32 1.0, %v1454_v10 }
  0xe4   :  { %v1518_v38 = vmul.f32 %v1454_v10, %v6866_v16  ;;  %3330 = vrcp.f32 %v1220_v36  ;;  %v6867_v34 = vunpack.c.l.bf16 %v6863_v14  ;;  %vm884_vm12 = vcmp.ge.f32.partialorder %v4404_v24, 0.0 }
  0xe5   :  { %v777_v60 = vadd.f32 %v6864_v7, %v585_v20  ;;  %v1011_v33 = vsel %vm883_vm11, %v6865_v29, %v4365_v31  ;;  %3332 = vpow2.f32 %v1092_v1  ;;  %v3315_v20 = vpop.eup %3314  ;;  %2045 = vrot.lane.b32.xlu0 %v1903_v43, %s3499_s3  ;;  %v6870_v10 = vsub.f32 0.0, %v4404_v24 }
  0xe6   :  { %v776_v57 = vadd.f32 %v6867_v34, %v584_v9  ;;  %v1094_v15 = vmul.f32 1.442695, %v1011_v33  ;;  %v2807_v7 = vpack.c.bf16 %v1518_v38, %v1518_v38  ;;  %v3136_v9 = vunpack.c.h.bf16 %v3228_v17  ;;  %v6871_v34 = vld [vmem:[#allocation34_spill] sm:$0xff] }
  0xe7   :  { %v4739_v23 = vmul.f32 100.0, %v777_v60  ;;  %v1012_v36 = vsel %vm884_vm12, %v6870_v10, %v4404_v24  ;;  %v4750_v1 = vpop.eup %3316  ;;  %v1391_v14 = vmul.f32 %v3315_v20, %v4659_v4  ;;  %v3135_v39 = vunpack.c.l.bf16 %v3228_v17 }
  0xe8   :  { %v4743_v29 = vmul.f32 100.0, %v776_v57  ;;  %3334 = vpow2.f32 %v1094_v15  ;;  %v4755_v33 = vpop.eup %3318  ;;  %1839 = vst.msk [vmem:[%s6529_s4 + $0x38] sm:$0xf] %vm1824_vm10, %v2807_v7  ;;  %v1096_v38 = vmul.f32 1.442695, %v1012_v36  ;;  %v587_v57 = vsub.f32 %v6871_v34, %v439_v56  ;;  %v437_v7 = vpop.permute.xlu0 %436 }
  0xe9   :  { %6868 = vst [vmem:[#allocation67_spill] sm:$0xff] %v4739_v23  ;;  %vm6655_vm13 = vcmp.ge.f32.partialorder %v4739_v23, 0.0  ;;  %v969_v60 = vsub.f32 0.0, %v4739_v23  ;;  %v4764_v4 = vpop.eup %3320  ;;  %v1455_v10 = vsel %vm879_vm0, %v3315_v20, %v1391_v14  ;;  %v1201_v15 = vadd.f32 1.0, %v4755_v33 }
  0xea   :  { %6869 = vst [vmem:[#allocation71_spill] sm:$0xff] %v4743_v29  ;;  %vm6663_vm14 = vcmp.ge.f32.partialorder %v4743_v29, 0.0  ;;  %v968_v43 = vsub.f32 0.0, %v4743_v29  ;;  %v4772_v32 = vpop.eup %3322  ;;  %v1519_v42 = vmul.f32 %v1455_v10, %v6873_v44  ;;  %v1904_v36 = vsub.f32 1.0, %v1455_v10  ;;  %v6874_v10 = vld [vmem:[#allocation35_spill] sm:$0xff] }
  0xeb   :  { %v1033_v16 = vsel %vm6655_vm13, %v969_v60, %v4739_v23  ;;  %6872 = vst [vmem:[#allocation68_spill] sm:$0xff] %v4772_v32  ;;  %v3325_v6 = vpop.eup %3324  ;;  %v1223_v20 = vadd.f32 1.0, %v4772_v32  ;;  %3336 = vrcp.f32 %v1201_v15  ;;  %v779_v34 = vadd.f32 %v3136_v9, %v587_v57 }
  0xec   :  { %v1138_v48 = vmul.f32 1.442695, %v1033_v16  ;;  %v1032_v56 = vsel %vm6663_vm14, %v968_v43, %v4743_v29  ;;  %v4779_v5 = vpop.eup %3326  ;;  %v2808_v17 = vpack.c.bf16 %v1519_v42, %v1519_v42  ;;  %2047 = vrot.lane.b32.xlu1 %v1904_v36, %s3499_s3  ;;  %v1392_v60 = vmul.f32 %v3325_v6, %v4691_v0  ;;  %v6882_v29 = vld [vmem:[#allocation37_spill] sm:$0xff] }
  0xed   :  { %v1136_v14 = vmul.f32 1.442695, %v1032_v56  ;;  %v586_v16 = vsub.f32 %v6874_v10, %v437_v7  ;;  %v4784_v44 = vpop.eup %3328  ;;  %v4786_v43 = vmul.f32 100.0, %v779_v34  ;;  %vm885_vm15 = vcmp.ge.f32.partialorder %v4392_v58, 0.0  ;;  %v3229_v34 = vld [vmem:[%s6528_s1 + $0xb0] sm:$0xff]   ;;  %v6877_v7 = vld [vmem:[#allocation19_spill] sm:$0xff] }
  0xee   :  { %3338 = vpow2.f32 %v1138_v48  ;;  %6875 = vst [vmem:[#allocation69_spill] sm:$0xff] %v4784_v44  ;;  %vm886_vm0 = vcmp.ge.f32.partialorder %v4422_v49, 0.0  ;;  %v4790_v9 = vpop.eup %3330  ;;  %1840 = vst.msk [vmem:[%s6529_s4 + $0x3c] sm:$0xf] %vm1824_vm10, %v2808_v17  ;;  %v1456_v42 = vsel %vm880_vm3, %v3325_v6, %v1392_v60  ;;  %v1222_v0 = vadd.f32 1.0, %v4784_v44 }
  0xef   :  { %3340 = vrcp.f32 %v1223_v20  ;;  %6876 = vst [vmem:[#allocation73_spill] sm:$0xff] %v4786_v43  ;;  %v778_v48 = vadd.f32 %v3135_v39, %v586_v16  ;;  %v4802_v57 = vpop.eup %3332  ;;  %v1905_v15 = vsub.f32 1.0, %v1456_v42  ;;  %v1520_v36 = vmul.f32 %v1456_v42, %v6877_v7  ;;  %v443_v39 = vpop.permute.xlu1 %442  ;;  %v6881_v7 = vld [vmem:[#allocation36_spill] sm:$0xff] }
  0xf0   :  { %3342 = vpow2.f32 %v1136_v14  ;;  %vm6661_vm13 = vcmp.ge.f32.partialorder %v4786_v43, 0.0  ;;  %v1202_v12 = vadd.f32 1.0, %v4802_v57  ;;  %v971_v56 = vsub.f32 0.0, %v4786_v43 }
  0xf1   :  { %3344 = vpow2.f32 %v1096_v38  ;;  %v4808_v6 = vmul.f32 100.0, %v778_v48  ;;  %2049 = vrot.lane.b32.xlu0 %v1905_v15, %s3499_s3  ;;  %v2809_v14 = vpack.c.bf16 %v1520_v36, %v1520_v36  ;;  %v6879_v17 = vsub.f32 0.0, %v4392_v58 }
  0xf2   :  { %3346 = vrcp.f32 %v1222_v0  ;;  %v4810_v20 = vpop.eup %3334  ;;  %v6880_v60 = vsub.f32 0.0, %v4422_v49  ;;  %v3140_v42 = vunpack.c.h.bf16 %v3229_v34  ;;  %v441_v0 = vpop.permute.xlu0 %440  ;;  %v1035_v15 = vsel %vm6661_vm13, %v971_v56, %v4786_v43 }
  0xf3   :  { %6878 = vst [vmem:[#allocation70_spill] sm:$0xff] %v4808_v6  ;;  %v1013_v38 = vsel %vm885_vm15, %v6879_v17, %v4392_v58  ;;  %3348 = vrcp.f32 %v1202_v12  ;;  %v1203_v48 = vadd.f32 1.0, %v4810_v20  ;;  %vm6662_vm3 = vcmp.ge.f32.partialorder %v4808_v6, 0.0  ;;  %1841 = vst.msk [vmem:[%s6529_s4 + $0x40] sm:$0xf] %vm1824_vm10, %v2809_v14 }
  0xf4   :  { %v1014_v16 = vsel %vm886_vm0, %v6880_v60, %v4422_v49  ;;  %v1142_v36 = vmul.f32 1.442695, %v1035_v15  ;;  %v970_v17 = vsub.f32 0.0, %v4808_v6  ;;  %v1098_v60 = vmul.f32 1.442695, %v1013_v38 }
  0xf5   :  { %v589_v10 = vsub.f32 %v6881_v7, %v443_v39  ;;  %3350 = vrcp.f32 %v1203_v48  ;;  %v1100_v12 = vmul.f32 1.442695, %v1014_v16  ;;  %v3139_v23 = vunpack.c.l.bf16 %v3229_v34  ;;  %v3337_v44 = vpop.eup %3336 }
  0xf6   :  { %v588_v32 = vsub.f32 %v6882_v29, %v441_v0  ;;  %3352 = vpow2.f32 %v1142_v36  ;;  %v1034_v56 = vsel %vm6662_vm3, %v970_v17, %v4808_v6  ;;  %vm887_vm13 = vcmp.ge.f32.partialorder %v4415_v3, 0.0  ;;  %v6889_v17 = vld [vmem:[#allocation18_spill] sm:$0xff] }
  0xf7   :  { %v781_v43 = vadd.f32 %v3140_v42, %v589_v10  ;;  %v1393_v38 = vmul.f32 %v3337_v44, %v4755_v33  ;;  %v1140_v15 = vmul.f32 1.442695, %v1034_v56  ;;  %3354 = vpow2.f32 %v1098_v60  ;;  %v3230_v56 = vld [vmem:[%s6528_s1 + $0xb8] sm:$0xff]   ;;  %v6892_v6 = vld [vmem:[#allocation38_spill] sm:$0xff] }
  0xf8   :  { %v4839_v14 = vpop.eup %3338  ;;  %v780_v39 = vadd.f32 %v3139_v23, %v588_v32  ;;  %3356 = vpow2.f32 %v1100_v12  ;;  %v6886_v48 = vsub.f32 0.0, %v4415_v3  ;;  %vm888_vm14 = vcmp.ge.f32.partialorder %v4456_v54, 0.0 }
  0xf9   :  { %6883 = vst [vmem:[#allocation76_spill] sm:$0xff] %v4839_v14  ;;  %v4842_v16 = vpop.eup %3340  ;;  %v1225_v34 = vadd.f32 1.0, %v4839_v14  ;;  %v4845_v0 = vmul.f32 100.0, %v781_v43  ;;  %v1457_v33 = vsel %vm881_vm6, %v3337_v44, %v1393_v38  ;;  %3358 = vpow2.f32 %v1140_v15 }
  0xfa   :  { %6884 = vst [vmem:[#allocation77_spill] sm:$0xff] %v4842_v16  ;;  %v1015_v10 = vsel %vm887_vm13, %v6886_v48, %v4415_v3  ;;  %v4852_v42 = vpop.eup %3342  ;;  %v4856_v32 = vmul.f32 100.0, %v780_v39  ;;  %v1521_v43 = vmul.f32 %v1457_v33, %v6889_v17  ;;  %v1906_v60 = vsub.f32 1.0, %v1457_v33  ;;  %v447_v39 = vpop.permute.xlu1 %446 }
  0xfb   :  { %6885 = vst [vmem:[#allocation78_spill] sm:$0xff] %v4845_v0  ;;  %6887 = vst [vmem:[#allocation79_spill] sm:$0xff] %v4852_v42  ;;  %v1102_v23 = vmul.f32 1.442695, %v1015_v10  ;;  %v4858_v36 = vpop.eup %3344  ;;  %3360 = vrcp.f32 %v1225_v34  ;;  %v1224_v12 = vadd.f32 1.0, %v4852_v42  ;;  %vm6671_vm6 = vcmp.ge.f32.partialorder %v4845_v0, 0.0 }
  0xfc   :  { %6888 = vst [vmem:[#allocation80_spill] sm:$0xff] %v4856_v32  ;;  %v4865_v48 = vpop.eup %3346  ;;  %v1204_v35 = vadd.f32 1.0, %v4858_v36  ;;  %v973_v44 = vsub.f32 0.0, %v4845_v0  ;;  %vm6672_vm3 = vcmp.ge.f32.partialorder %v4856_v32, 0.0  ;;  %v2810_v38 = vpack.c.bf16 %v1521_v43, %v1521_v43  ;;  %2051 = vrot.lane.b32.xlu1 %v1906_v60, %s3499_s3  ;;  %v445_v60 = vpop.permute.xlu0 %444 }
  0xfd   :  { %6890 = vst [vmem:[#allocation81_spill] sm:$0xff] %v4865_v48  ;;  %3362 = vrcp.f32 %v1224_v12  ;;  %v972_v15 = vsub.f32 0.0, %v4856_v32  ;;  %v3349_v34 = vpop.eup %3348  ;;  %v6891_v33 = vsub.f32 0.0, %v4456_v54  ;;  %v3144_v17 = vunpack.c.h.bf16 %v3230_v56 }
  0xfe   :  { %3364 = vrcp.f32 %v1204_v35  ;;  %v1037_v10 = vsel %vm6671_vm6, %v973_v44, %v4845_v0  ;;  %1842 = vst.msk [vmem:[%s6529_s4 + $0x44] sm:$0xf] %vm1824_vm10, %v2810_v38  ;;  %v1394_v12 = vmul.f32 %v3349_v34, %v4802_v57  ;;  %v3143_v14 = vunpack.c.l.bf16 %v3230_v56  ;;  %v6894_v57 = vld [vmem:[#allocation39_spill] sm:$0xff] }
  0xff   :  { %v1016_v43 = vsel %vm888_vm14, %v6891_v33, %v4456_v54  ;;  %v1146_v35 = vmul.f32 1.442695, %v1037_v10  ;;  %v1036_v44 = vsel %vm6672_vm3, %v972_v15, %v4856_v32  ;;  %3366 = vpow2.f32 %v1102_v23  ;;  %v3351_v7 = vpop.eup %3350  ;;  %v6895_v23 = vld [vmem:[#allocation21_spill] sm:$0xff] }
 0x100   :  { %v1144_v0 = vmul.f32 1.442695, %v1036_v44  ;;  %v1104_v29 = vmul.f32 1.442695, %v1016_v43  ;;  %v591_v33 = vsub.f32 %v6892_v6, %v447_v39  ;;  %v4891_v42 = vpop.eup %3352  ;;  %v1458_v16 = vsel %vm882_vm7, %v3349_v34, %v1394_v12  ;;  %v6897_v12 = vld [vmem:[#allocation20_spill] sm:$0xff] }
 0x101   :  { %6893 = vst [vmem:[#allocation82_spill] sm:$0xff] %v4891_v42  ;;  %v1395_v38 = vmul.f32 %v3351_v7, %v4810_v20  ;;  %3368 = vpow2.f32 %v1146_v35  ;;  %v590_v10 = vsub.f32 %v6894_v57, %v445_v60  ;;  %v4897_v48 = vpop.eup %3354  ;;  %v1907_v15 = vsub.f32 1.0, %v1458_v16 }
 0x102   :  { %v1522_v32 = vmul.f32 %v1458_v16, %v6895_v23  ;;  %v1227_v43 = vadd.f32 1.0, %v4891_v42  ;;  %3370 = vpow2.f32 %v1144_v0  ;;  %v4901_v39 = vpop.eup %3356  ;;  %v1205_v40 = vadd.f32 1.0, %v4897_v48 }
 0x103   :  { %v1459_v56 = vsel %vm883_vm11, %v3351_v7, %v1395_v38  ;;  %3372 = vpow2.f32 %v1104_v29  ;;  %v783_v20 = vadd.f32 %v3144_v17, %v591_v33  ;;  %v4906_v34 = vpop.eup %3358  ;;  %2053 = vrot.lane.b32.xlu0 %v1907_v15, %s3499_s3  ;;  %v1206_v31 = vadd.f32 1.0, %v4901_v39  ;;  %v3231_v17 = vld [vmem:[%s6528_s1 + $0xc0] sm:$0xff]  }
 0x104   :  { %6896 = vst [vmem:[#allocation83_spill] sm:$0xff] %v4906_v34  ;;  %v2811_v60 = vpack.c.bf16 %v1522_v32, %v1522_v32  ;;  %v1523_v35 = vmul.f32 %v1459_v56, %v6897_v12  ;;  %v1908_v16 = vsub.f32 1.0, %v1459_v56  ;;  %3374 = vrcp.f32 %v1227_v43 }
 0x105   :  { %v4910_v44 = vpop.eup %3360  ;;  %v1226_v0 = vadd.f32 1.0, %v4906_v34  ;;  %3376 = vrcp.f32 %v1205_v40  ;;  %v4914_v7 = vmul.f32 100.0, %v783_v20  ;;  %v782_v32 = vadd.f32 %v3143_v14, %v590_v10 }
 0x106   :  { %1843 = vst.msk [vmem:[%s6529_s4 + $0x48] sm:$0xf] %vm1824_vm10, %v2811_v60  ;;  %v2812_v29 = vpack.c.bf16 %v1523_v35, %v1523_v35  ;;  %2055 = vrot.lane.b32.xlu1 %v1908_v16, %s3499_s3  ;;  %vm889_vm7 = vcmp.ge.f32.partialorder %v4442_v8, 0.0  ;;  %vm890_vm11 = vcmp.ge.f32.partialorder %v4474_v61, 0.0  ;;  %v6899_v15 = vsub.f32 0.0, %v4442_v8  ;;  %v451_v60 = vpop.permute.xlu1 %450 }
 0x107   :  { %6898 = vst [vmem:[#allocation84_spill] sm:$0xff] %v4914_v7  ;;  %v4926_v33 = vpop.eup %3362  ;;  %3378 = vrcp.f32 %v1226_v0  ;;  %vm6677_vm6 = vcmp.ge.f32.partialorder %v4914_v7, 0.0  ;;  %v975_v38 = vsub.f32 0.0, %v4914_v7  ;;  %v4939_v43 = vmul.f32 100.0, %v782_v32 }
 0x108   :  { %v1017_v14 = vsel %vm889_vm7, %v6899_v15, %v4442_v8  ;;  %v3365_v10 = vpop.eup %3364  ;;  %1844 = vst.msk [vmem:[%s6529_s4 + $0x4c] sm:$0xf] %vm1824_vm10, %v2812_v29  ;;  %3380 = vrcp.f32 %v1206_v31  ;;  %v6900_v40 = vsub.f32 0.0, %v4474_v61  ;;  %v3148_v31 = vunpack.c.h.bf16 %v3231_v17 }
 0x109   :  { %v1106_v56 = vmul.f32 1.442695, %v1017_v14  ;;  %v4946_v35 = vpop.eup %3366  ;;  %v1396_v16 = vmul.f32 %v3365_v10, %v4858_v36  ;;  %v1039_v0 = vsel %vm6677_vm6, %v975_v38, %v4914_v7  ;;  %vm6678_vm3 = vcmp.ge.f32.partialorder %v4939_v43, 0.0  ;;  %v6901_v36 = vld [vmem:[#allocation40_spill] sm:$0xff]  ;;  %v449_v7 = vpop.permute.xlu0 %448 }
 0x10a   :  { %v1018_v20 = vsel %vm890_vm11, %v6900_v40, %v4474_v61  ;;  %v1207_v32 = vadd.f32 1.0, %v4946_v35  ;;  %v1150_v15 = vmul.f32 1.442695, %v1039_v0  ;;  %v974_v14 = vsub.f32 0.0, %v4939_v43 }
 0x10b   :  { %v1108_v29 = vmul.f32 1.442695, %v1018_v20  ;;  %v4955_v12 = vpop.eup %3368  ;;  %v1460_v40 = vsel %vm884_vm12, %v3365_v10, %v1396_v16  ;;  %3382 = vpow2.f32 %v1106_v56  ;;  %v593_v23 = vsub.f32 %v6901_v36, %v451_v60 }
 0x10c   :  { %v3147_v6 = vunpack.c.l.bf16 %v3231_v17  ;;  %v4960_v57 = vpop.eup %3370  ;;  %v1909_v38 = vsub.f32 1.0, %v1460_v40  ;;  %v1524_v20 = vmul.f32 %v1460_v40, %v3698_v30  ;;  %v1229_v0 = vadd.f32 1.0, %v4955_v12  ;;  %v6903_v30 = vld [vmem:[#allocation41_spill] sm:$0xff] }
 0x10d   :  { %3384 = vrcp.f32 %v1207_v32  ;;  %v4964_v42 = vpop.eup %3372  ;;  %v1228_v34 = vadd.f32 1.0, %v4960_v57  ;;  %v1038_v24 = vsel %vm6678_vm3, %v974_v14, %v4939_v43  ;;  %v785_v10 = vadd.f32 %v3148_v31, %v593_v23 }
 0x10e   :  { %3386 = vpow2.f32 %v1150_v15  ;;  %v4970_v17 = vpop.eup %3374  ;;  %2057 = vrot.lane.b32.xlu0 %v1909_v38, %s3499_s3  ;;  %v2813_v56 = vpack.c.bf16 %v1524_v20, %v1524_v20  ;;  %v1208_v60 = vadd.f32 1.0, %v4964_v42  ;;  %v1148_v16 = vmul.f32 1.442695, %v1038_v24 }
 0x10f   :  { %3388 = vrcp.f32 %v1229_v0  ;;  %v3377_v32 = vpop.eup %3376  ;;  %v4974_v40 = vmul.f32 100.0, %v785_v10  ;;  %v592_v15 = vsub.f32 %v6903_v30, %v449_v7  ;;  %vm891_vm12 = vcmp.ge.f32.partialorder %v4470_v11, 0.0 }
 0x110   :  { %3390 = vrcp.f32 %v1228_v34  ;;  %1845 = vst.msk [vmem:[%s6529_s4 + $0x50] sm:$0xf] %vm1824_vm10, %v2813_v56  ;;  %v1397_v23 = vmul.f32 %v3377_v32, %v4897_v48  ;;  %v6904_v31 = vsub.f32 0.0, %v4470_v11  ;;  %vm892_vm6 = vcmp.ge.f32.partialorder %v4512_v52, 0.0  ;;  %v3232_v56 = vld [vmem:[%s6528_s1 + $0xc8] sm:$0xff]  }
 0x111   :  { %6902 = vst [vmem:[#allocation85_spill] sm:$0xff] %v4974_v40  ;;  %3392 = vrcp.f32 %v1208_v60  ;;  %v4989_v14 = vpop.eup %3378  ;;  %vm6681_vm3 = vcmp.ge.f32.partialorder %v4974_v40, 0.0  ;;  %v977_v7 = vsub.f32 0.0, %v4974_v40  ;;  %v784_v38 = vadd.f32 %v3147_v6, %v592_v15  ;;  %v455_v60 = vpop.permute.xlu1 %454 }
 0x112   :  { %v1019_v34 = vsel %vm891_vm12, %v6904_v31, %v4470_v11  ;;  %3394 = vpow2.f32 %v1148_v16  ;;  %v3381_v20 = vpop.eup %3380  ;;  %v1461_v48 = vsel %vm885_vm15, %v3377_v32, %v1397_v23  ;;  %v6905_v24 = vsub.f32 0.0, %v4512_v52 }
 0x113   :  { %3396 = vpow2.f32 %v1108_v29  ;;  %v1110_v0 = vmul.f32 1.442695, %v1019_v34  ;;  %v1525_v16 = vmul.f32 %v1461_v48, %v6804_v27  ;;  %v1910_v6 = vsub.f32 1.0, %v1461_v48  ;;  %v6907_v27 = vld [vmem:[#allocation42_spill] sm:$0xff] }
 0x114   :  { %v1020_v10 = vsel %vm892_vm6, %v6905_v24, %v4512_v52  ;;  %v1398_v15 = vmul.f32 %v3381_v20, %v4901_v39  ;;  %v1041_v58 = vsel %vm6681_vm3, %v977_v7, %v4974_v40  ;;  %v5008_v32 = vmul.f32 100.0, %v784_v38  ;;  %v6913_v40 = vld [vmem:[#allocation45_spill] sm:$0xff] }
 0x115   :  { %v1154_v29 = vmul.f32 1.442695, %v1041_v58  ;;  %3398 = vpow2.f32 %v1110_v0  ;;  %v1112_v23 = vmul.f32 1.442695, %v1020_v10  ;;  %v5010_v31 = vpop.eup %3382  ;;  %v2814_v34 = vpack.c.bf16 %v1525_v16, %v1525_v16  ;;  %2059 = vrot.lane.b32.xlu1 %v1910_v6, %s3499_s3  ;;  %v453_v0 = vpop.permute.xlu0 %452 }
 0x116   :  { %6906 = vst [vmem:[#allocation86_spill] sm:$0xff] %v5008_v32  ;;  %v1462_v24 = vsel %vm886_vm0, %v3381_v20, %v1398_v15  ;;  %v3152_v48 = vunpack.c.h.bf16 %v3232_v56  ;;  %v595_v39 = vsub.f32 %v6907_v27, %v455_v60  ;;  %v1209_v38 = vadd.f32 1.0, %v5010_v31 }
 0x117   :  { %v3385_v36 = vpop.eup %3384  ;;  %v1911_v30 = vsub.f32 1.0, %v1462_v24  ;;  %v1526_v7 = vmul.f32 %v1462_v24, %v3863_v41  ;;  %3400 = vpow2.f32 %v1154_v29  ;;  %1846 = vst.msk [vmem:[%s6529_s4 + $0x54] sm:$0xf] %vm1824_vm10, %v2814_v34  ;;  %vm6689_vm15 = vcmp.ge.f32.partialorder %v5008_v32, 0.0 }
 0x118   :  { %v5018_v10 = vpop.eup %3386  ;;  %v1399_v49 = vmul.f32 %v3385_v36, %v4946_v35  ;;  %v976_v20 = vsub.f32 0.0, %v5008_v32  ;;  %3402 = vpow2.f32 %v1112_v23  ;;  %v787_v15 = vadd.f32 %v3152_v48, %v595_v39  ;;  %v6908_v23 = vld [vmem:[#allocation43_spill] sm:$0xff] }
 0x119   :  { %v5027_v60 = vpop.eup %3388  ;;  %2061 = vrot.lane.b32.xlu0 %v1911_v30, %s3499_s3  ;;  %v2815_v16 = vpack.c.bf16 %v1526_v7, %v1526_v7  ;;  %v1231_v6 = vadd.f32 1.0, %v5018_v10  ;;  %3404 = vrcp.f32 %v1209_v38  ;;  %v3151_v34 = vunpack.c.l.bf16 %v3232_v56 }
 0x11a   :  { %v5031_v58 = vpop.eup %3390  ;;  %v1463_v29 = vsel %vm887_vm13, %v3385_v36, %v1399_v49  ;;  %v1040_v35 = vsel %vm6689_vm15, %v976_v20, %v5008_v32  ;;  %v594_v24 = vsub.f32 %v6908_v23, %v453_v0  ;;  %v5047_v7 = vmul.f32 100.0, %v787_v15 }
 0x11b   :  { %v3393_v41 = vpop.eup %3392  ;;  %1847 = vst.msk [vmem:[%s6529_s4 + $0x58] sm:$0xf] %vm1824_vm10, %v2815_v16  ;;  %v1527_v30 = vmul.f32 %v1463_v29, %v6807_v62  ;;  %v1912_v48 = vsub.f32 1.0, %v1463_v29  ;;  %3406 = vrcp.f32 %v1231_v6  ;;  %v1152_v39 = vmul.f32 1.442695, %v1040_v35 }
 0x11c   :  { %v5044_v3 = vpop.eup %3394  ;;  %v1400_v36 = vmul.f32 %v3393_v41, %v4964_v42  ;;  %6909 = vst [vmem:[#allocation87_spill] sm:$0xff] %v5047_v7  ;;  %v786_v56 = vadd.f32 %v3151_v34, %v594_v24  ;;  %vm893_vm13 = vcmp.ge.f32.partialorder %v4496_v59, 0.0  ;;  %v6910_v20 = vsub.f32 0.0, %v4496_v59 }
 0x11d   :  { %v5050_v38 = vpop.eup %3396  ;;  %v2816_v0 = vpack.c.bf16 %v1527_v30, %v1527_v30  ;;  %2063 = vrot.lane.b32.xlu1 %v1912_v48, %s3499_s3  ;;  %v1230_v49 = vadd.f32 1.0, %v5044_v3  ;;  %3408 = vpow2.f32 %v1152_v39  ;;  %vm6687_vm0 = vcmp.ge.f32.partialorder %v5047_v7, 0.0 }
 0x11e   :  { %v1021_v16 = vsel %vm893_vm13, %v6910_v20, %v4496_v59  ;;  %v1464_v42 = vsel %vm888_vm14, %v3393_v41, %v1400_v36  ;;  %v1210_v6 = vadd.f32 1.0, %v5050_v38  ;;  %v979_v15 = vsub.f32 0.0, %v5047_v7  ;;  %v3233_v41 = vld [vmem:[%s6528_s1 + $0xd0] sm:$0xff]  }
 0x11f   :  { %v5064_v29 = vpop.eup %3398  ;;  %1848 = vst.msk [vmem:[%s6529_s4 + $0x5c] sm:$0xf] %vm1824_vm10, %v2816_v0  ;;  %v1913_v35 = vsub.f32 1.0, %v1464_v42  ;;  %v1528_v34 = vmul.f32 %v1464_v42, %v3916_v21  ;;  %3410 = vrcp.f32 %v1230_v49  ;;  %v5071_v24 = vmul.f32 100.0, %v786_v56 }
 0x120   :  { %3412 = vrcp.f32 %v1210_v6  ;;  %v1211_v54 = vadd.f32 1.0, %v5064_v29  ;;  %v1043_v30 = vsel %vm6687_vm0, %v979_v15, %v5047_v7  ;;  %v1114_v48 = vmul.f32 1.442695, %v1021_v16  ;;  %v459_v6 = vpop.permute.xlu1 %458  ;;  %v457_v16 = vpop.permute.xlu0 %456 }
 0x121   :  { %v5080_v39 = vpop.eup %3400  ;;  %2065 = vrot.lane.b32.xlu0 %v1913_v35, %s3499_s3  ;;  %v2817_v36 = vpack.c.bf16 %v1528_v34, %v1528_v34  ;;  %v1158_v0 = vmul.f32 1.442695, %v1043_v30  ;;  %vm6688_vm14 = vcmp.ge.f32.partialorder %v5071_v24, 0.0  ;;  %v978_v56 = vsub.f32 0.0, %v5071_v24 }
 0x122   :  { %v5085_v49 = vpop.eup %3402  ;;  %v1233_v20 = vadd.f32 1.0, %v5080_v39  ;;  %3414 = vrcp.f32 %v1211_v54  ;;  %vm894_vm3 = vcmp.ge.f32.partialorder %v4528_v22, 0.0  ;;  %v3156_v42 = vunpack.c.h.bf16 %v3233_v41 }
 0x123   :  { %v3405_v15 = vpop.eup %3404  ;;  %1849 = vst.msk [vmem:[%s6529_s4 + $0x60] sm:$0xf] %vm1824_vm10, %v2817_v36  ;;  %v1212_v35 = vadd.f32 1.0, %v5085_v49  ;;  %3416 = vpow2.f32 %v1158_v0  ;;  %v1042_v34 = vsel %vm6688_vm14, %v978_v56, %v5071_v24  ;;  %v6911_v54 = vsub.f32 0.0, %v4528_v22  ;;  %v6912_v36 = vld [vmem:[#allocation44_spill] sm:$0xff] }
 0x124   :  { %v1401_v21 = vmul.f32 %v3405_v15, %v5010_v31  ;;  %3418 = vrcp.f32 %v1233_v20  ;;  %v1156_v62 = vmul.f32 1.442695, %v1042_v34  ;;  %v597_v0 = vsub.f32 %v6912_v36, %v459_v6 }
 0x125   :  { %v1022_v30 = vsel %vm894_vm3, %v6911_v54, %v4528_v22  ;;  %v5103_v7 = vpop.eup %3406  ;;  %3420 = vrcp.f32 %v1212_v35  ;;  %v3155_v23 = vunpack.c.l.bf16 %v3233_v41  ;;  %v596_v32 = vsub.f32 %v6913_v40, %v457_v16  ;;  %v5117_v41 = vld [vmem:[%s6528_s1 + $0xd8] sm:$0xff]  }
 0x126   :  { %v1116_v27 = vmul.f32 1.442695, %v1022_v30  ;;  %v1465_v56 = vsel %vm889_vm7, %v3405_v15, %v1401_v21  ;;  %3422 = vpow2.f32 %v1156_v62  ;;  %vm895_vm0 = vcmp.ge.f32.partialorder %v4525_v50, 0.0 }
 0x127   :  { %vm896_vm14 = vcmp.ge.f32.partialorder %v4558_v2, 0.0  ;;  %v5111_v31 = vpop.eup %3408  ;;  %v1529_v20 = vmul.f32 %v1465_v56, %v3908_v26  ;;  %v1914_v34 = vsub.f32 1.0, %v1465_v56  ;;  %3424 = vpow2.f32 %v1114_v48 }
 0x128   :  { %v789_v35 = vadd.f32 %v3156_v42, %v597_v0  ;;  %v1232_v8 = vadd.f32 1.0, %v5111_v31  ;;  %3426 = vpow2.f32 %v1116_v27  ;;  %v788_v21 = vadd.f32 %v3155_v23, %v596_v32  ;;  %v463_v32 = vpop.permute.xlu1 %462 }
 0x129   :  { %v6914_v62 = vsub.f32 0.0, %v4525_v50  ;;  %v5125_v16 = vpop.eup %3410  ;;  %v2818_v15 = vpack.c.bf16 %v1529_v20, %v1529_v20  ;;  %2067 = vrot.lane.b32.xlu1 %v1914_v34, %s3499_s3  ;;  %v6916_v54 = vsub.f32 0.0, %v4558_v2  ;;  %v3160_v56 = vunpack.c.h.bf16 %v5117_v41 }
 0x12a   :  { %v5128_v48 = vmul.f32 100.0, %v789_v35  ;;  %v3413_v23 = vpop.eup %3412  ;;  %3428 = vrcp.f32 %v1232_v8  ;;  %v5135_v30 = vmul.f32 100.0, %v788_v21  ;;  %v6917_v21 = vld [vmem:[#allocation46_spill] sm:$0xff]  ;;  %v961_v11 = vsub.f32 0.0, %v4561_v25 }
 0x12b   :  { %v1023_v6 = vsel %vm895_vm0, %v6914_v62, %v4525_v50  ;;  %v1024_v27 = vsel %vm896_vm14, %v6916_v54, %v4558_v2  ;;  %1850 = vst.msk [vmem:[%s6529_s4 + $0x64] sm:$0xf] %vm1824_vm10, %v2818_v15  ;;  %v1402_v20 = vmul.f32 %v3413_v23, %v5050_v38  ;;  %v599_v62 = vsub.f32 %v6917_v21, %v463_v32 }
 0x12c   :  { %6915 = vst [vmem:[#allocation88_spill] sm:$0xff] %v5128_v48  ;;  %v1118_v42 = vmul.f32 1.442695, %v1023_v6  ;;  %v1120_v0 = vmul.f32 1.442695, %v1024_v27  ;;  %vm917_vm7 = vcmp.ge.f32.partialorder %v5128_v48, 0.0  ;;  %v3415_v35 = vpop.eup %3414  ;;  %v461_v6 = vpop.permute.xlu0 %460  ;;  %v3159_v27 = vunpack.c.l.bf16 %v5117_v41 }
 0x12d   :  { %v981_v34 = vsub.f32 0.0, %v5128_v48  ;;  %vm916_vm15 = vcmp.ge.f32.partialorder %v5135_v30, 0.0  ;;  %v980_v8 = vsub.f32 0.0, %v5135_v30  ;;  %v5148_v54 = vpop.eup %3416  ;;  %v1466_v15 = vsel %vm890_vm11, %v3413_v23, %v1402_v20  ;;  %v6919_v20 = vld [vmem:[#allocation47_spill] sm:$0xff] }
 0x12e   :  { %3430 = vpow2.f32 %v1118_v42  ;;  %6918 = vst [vmem:[#allocation89_spill] sm:$0xff] %v5148_v54  ;;  %v1403_v38 = vmul.f32 %v3415_v35, %v5064_v29  ;;  %v5157_v26 = vpop.eup %3418  ;;  %v1915_v36 = vsub.f32 1.0, %v1466_v15  ;;  %v1235_v32 = vadd.f32 1.0, %v5148_v54 }
 0x12f   :  { %3432 = vpow2.f32 %v1120_v0  ;;  %v1045_v42 = vsel %vm917_vm7, %v981_v34, %v5128_v48  ;;  %v1530_v0 = vmul.f32 %v1466_v15, %v3937_v37  ;;  %v3421_v40 = vpop.eup %3420  ;;  %v1044_v29 = vsel %vm916_vm15, %v980_v8, %v5135_v30 }
 0x130   :  { %v1162_v21 = vmul.f32 1.442695, %v1045_v42  ;;  %v1467_v61 = vsel %vm891_vm12, %v3415_v35, %v1403_v38  ;;  %v791_v23 = vadd.f32 %v3160_v56, %v599_v62  ;;  %v598_v34 = vsub.f32 %v6919_v20, %v461_v6  ;;  %v5167_v41 = vpop.eup %3422  ;;  %2069 = vrot.lane.b32.xlu0 %v1915_v36, %s3499_s3 }
 0x131   :  { %v2819_v48 = vpack.c.bf16 %v1530_v0, %v1530_v0  ;;  %v1531_v15 = vmul.f32 %v1467_v61, %v3931_v13  ;;  %v1916_v37 = vsub.f32 1.0, %v1467_v61  ;;  %v1404_v42 = vmul.f32 %v3421_v40, %v5085_v49  ;;  %v5172_v54 = vpop.eup %3424  ;;  %v465_v61 = vpop.permute.xlu0 %464 }
 0x132   :  { %3434 = vrcp.f32 %v1235_v32  ;;  %v1160_v35 = vmul.f32 1.442695, %v1044_v29  ;;  %v5175_v8 = vmul.f32 100.0, %v791_v23  ;;  %v5177_v56 = vpop.eup %3426  ;;  %v1213_v62 = vadd.f32 1.0, %v5172_v54  ;;  %v467_v23 = vpop.permute.xlu1 %466 }
 0x133   :  { %1851 = vst.msk [vmem:[%s6529_s4 + $0x68] sm:$0xf] %vm1824_vm10, %v2819_v48  ;;  %v2820_v36 = vpack.c.bf16 %v1531_v15, %v1531_v15  ;;  %2071 = vrot.lane.b32.xlu1 %v1916_v37, %s3499_s3  ;;  %v1468_v49 = vsel %vm892_vm6, %v3421_v40, %v1404_v42  ;;  %3436 = vpow2.f32 %v1162_v21  ;;  %v1234_v0 = vadd.f32 1.0, %v5167_v41 }
 0x134   :  { %v1917_v6 = vsub.f32 1.0, %v1468_v49  ;;  %v1532_v38 = vmul.f32 %v1468_v49, %v3949_v47  ;;  %v1214_v32 = vadd.f32 1.0, %v5177_v56  ;;  %v5190_v29 = vpop.eup %3428  ;;  %3438 = vrcp.f32 %v1213_v62 }
 0x135   :  { %1852 = vst.msk [vmem:[%s6529_s4 + $0x6c] sm:$0xf] %vm1824_vm10, %v2820_v36  ;;  %vm919_vm6 = vcmp.ge.f32.partialorder %v5175_v8, 0.0  ;;  %v983_v37 = vsub.f32 0.0, %v5175_v8  ;;  %v790_v52 = vadd.f32 %v3159_v27, %v598_v34  ;;  %vm897_vm11 = vcmp.ge.f32.partialorder %v4561_v25, 0.0  ;;  %v3235_v36 = vld [vmem:[%s6528_s1 + $0xe0] sm:$0xff]  }
 0x136   :  { %2073 = vrot.lane.b32.xlu0 %v1917_v6, %s3499_s3  ;;  %v2821_v48 = vpack.c.bf16 %v1532_v38, %v1532_v38  ;;  %3440 = vrcp.f32 %v1214_v32  ;;  %v1410_v21 = vmul.f32 %v4764_v4, %v4685_v63  ;;  %v1025_v49 = vsel %vm897_vm11, %v961_v11, %v4561_v25 }
 0x137   :  { %3442 = vpow2.f32 %v1160_v35  ;;  %v1047_v27 = vsel %vm919_vm6, %v983_v37, %v5175_v8  ;;  %v5210_v34 = vmul.f32 100.0, %v790_v52  ;;  %v1122_v38 = vmul.f32 1.442695, %v1025_v49  ;;  %v5232_v52 = vpop.permute.xlu0 %468 }
 0x138   :  { %v5198_v40 = vpop.eup %3430  ;;  %1853 = vst.msk [vmem:[%s6529_s4 + $0x70] sm:$0xf] %vm1824_vm10, %v2821_v48  ;;  %v1166_v35 = vmul.f32 1.442695, %v1047_v27  ;;  %v5226_v62 = vsel %vm898_vm2, %v4764_v4, %v1410_v21  ;;  %v3164_v37 = vunpack.c.h.bf16 %v3235_v36  ;;  %v6920_v4 = vld [vmem:[#allocation50_spill] sm:$0xff]  ;;  %v3163_v48 = vunpack.c.l.bf16 %v3235_v36 }
 0x139   :  { %v5204_v15 = vpop.eup %3432  ;;  %v1215_v42 = vadd.f32 1.0, %v5198_v40  ;;  %vm918_vm12 = vcmp.ge.f32.partialorder %v5210_v34, 0.0  ;;  %v982_v6 = vsub.f32 0.0, %v5210_v34  ;;  %v1538_v32 = vmul.f32 %v5226_v62, %v6835_v45  ;;  %v5244_v45 = vld [vmem:[%s6528_s1 + $0xe8] sm:$0xff]  }
 0x13a   :  { %v1216_v63 = vadd.f32 1.0, %v5204_v15  ;;  %v601_v11 = vsub.f32 %v6920_v4, %v467_v23  ;;  %v1411_v23 = vmul.f32 %v4750_v1, %v4664_v53  ;;  %v1412_v36 = vmul.f32 %v4790_v9, %v4712_v55  ;;  %v6923_v55 = vld [vmem:[#allocation52_spill] sm:$0xff] }
 0x13b   :  { %3444 = vrcp.f32 %v1215_v42  ;;  %v1046_v28 = vsel %vm918_vm12, %v982_v6, %v5210_v34  ;;  %v2827_v27 = vpack.c.bf16 %v1538_v32, %v1538_v32  ;;  %v1923_v2 = vsub.f32 1.0, %v5226_v62  ;;  %v6927_v62 = vld [vmem:[#allocation29_spill] sm:$0xff] }
 0x13c   :  { %3446 = vrcp.f32 %v1216_v63  ;;  %v5238_v21 = vpop.eup %3434  ;;  %v1164_v42 = vmul.f32 1.442695, %v1046_v28  ;;  %v6921_v63 = vld [vmem:[#allocation51_spill] sm:$0xff]  ;;  %v793_v6 = vadd.f32 %v3164_v37, %v601_v11 }
 0x13d   :  { %3448 = vpow2.f32 %v1166_v35  ;;  %v600_v49 = vsub.f32 %v6921_v63, %v465_v61  ;;  %v5246_v35 = vpop.permute.xlu1 %470  ;;  %v5248_v47 = vpop.eup %3436  ;;  %1859 = vst.msk [vmem:[%s6529_s4 + $0x88] sm:$0xf] %vm1824_vm10, %v2827_v27 }
 0x13e   :  { %3450 = vpow2.f32 %v1122_v38  ;;  %v1237_v38 = vadd.f32 1.0, %v5248_v47  ;;  %v3439_v32 = vpop.eup %3438  ;;  %v5259_v28 = vmul.f32 100.0, %v793_v6  ;;  %v5277_v27 = vpop.permute.xlu0 %472 }
 0x13f   :  { %3452 = vrcp.f32 %v1234_v0  ;;  %v792_v61 = vadd.f32 %v3163_v48, %v600_v49  ;;  %v5264_v0 = vsel %vm899_vm1, %v4750_v1, %v1411_v23  ;;  %v5275_v48 = vsel %vm900_vm5, %v4790_v9, %v1412_v36 }
 0x140   :  { %3454 = vpow2.f32 %v1164_v42  ;;  %6922 = vst [vmem:[#allocation47_spill] sm:$0xff] %v5259_v28  ;;  %v3441_v11 = vpop.eup %3440  ;;  %v1405_v42 = vmul.f32 %v3439_v32, %v5172_v54  ;;  %vm921_vm1 = vcmp.ge.f32.partialorder %v5259_v28, 0.0  ;;  %v985_v49 = vsub.f32 0.0, %v5259_v28 }
 0x141   :  { %3456 = vrcp.f32 %v1237_v38  ;;  %v5270_v13 = vmul.f32 100.0, %v792_v61  ;;  %v5279_v18 = vpop.eup %3442  ;;  %v1406_v1 = vmul.f32 %v3441_v11, %v5177_v56  ;;  %v1539_v54 = vmul.f32 %v5264_v0, %v6830_v51  ;;  %v5297_v53 = vpop.permute.xlu1 %474 }
 0x142   :  { %v1469_v6 = vsel %vm893_vm13, %v3439_v32, %v1405_v42  ;;  %v1236_v46 = vadd.f32 1.0, %v5279_v18  ;;  %v1049_v61 = vsel %vm921_vm1, %v985_v49, %v5259_v28  ;;  %v6924_v42 = vld [vmem:[#allocation65_spill] sm:$0xff]  ;;  %v1924_v25 = vsub.f32 1.0, %v5264_v0 }
 0x143   :  { %vm920_vm2 = vcmp.ge.f32.partialorder %v5270_v13, 0.0  ;;  %v984_v9 = vsub.f32 0.0, %v5270_v13  ;;  %v1533_v36 = vmul.f32 %v1469_v6, %v3943_v19  ;;  %v1918_v56 = vsub.f32 1.0, %v1469_v6 }
 0x144   :  { %v1470_v38 = vsel %vm894_vm3, %v3441_v11, %v1406_v1  ;;  %3458 = vrcp.f32 %v1236_v46  ;;  %v1170_v11 = vmul.f32 1.442695, %v1049_v61 }
 0x145   :  { %v3445_v23 = vpop.eup %3444  ;;  %v1919_v32 = vsub.f32 1.0, %v1470_v38  ;;  %v1534_v37 = vmul.f32 %v1470_v38, %v6924_v42  ;;  %v2822_v19 = vpack.c.bf16 %v1533_v36, %v1533_v36  ;;  %2075 = vrot.lane.b32.xlu1 %v1918_v56, %s3499_s3  ;;  %v1048_v1 = vsel %vm920_vm2, %v984_v9, %v5270_v13  ;;  %v5314_v38 = vpop.permute.xlu0 %476  ;;  %v6996_v13 = vld [vmem:[#allocation3_spill] sm:$0xff] }
 0x146   :  { %v3447_v59 = vpop.eup %3446  ;;  %v1407_v51 = vmul.f32 %v3445_v23, %v5198_v40  ;;  %v1168_v36 = vmul.f32 1.442695, %v1048_v1 }
 0x147   :  { %v5301_v4 = vpop.eup %3448  ;;  %v1408_v22 = vmul.f32 %v3447_v59, %v5204_v15  ;;  %2077 = vrot.lane.b32.xlu0 %v1919_v32, %s3499_s3  ;;  %v2823_v6 = vpack.c.bf16 %v1534_v37, %v1534_v37  ;;  %1854 = vst.msk [vmem:[%s6529_s4 + $0x74] sm:$0xf] %vm1824_vm10, %v2822_v19  ;;  %v6925_v15 = vld [vmem:[#allocation64_spill] sm:$0xff]  ;;  %v6926_v32 = vld [vmem:[#allocation25_spill] sm:$0xff]  ;;  %v2828_v19 = vpack.c.bf16 %v1539_v54, %v1539_v54 }
 0x148   :  { %v5308_v49 = vpop.eup %3450  ;;  %v1471_v40 = vsel %vm895_vm0, %v3445_v23, %v1407_v51  ;;  %v1239_v46 = vadd.f32 1.0, %v5301_v4  ;;  %v1540_v54 = vmul.f32 %v5275_v48, %v6927_v62 }
 0x149   :  { %v5316_v56 = vpop.eup %3452  ;;  %v1535_v9 = vmul.f32 %v1471_v40, %v6925_v15  ;;  %v1920_v61 = vsub.f32 1.0, %v1471_v40  ;;  %v1472_v37 = vsel %vm896_vm14, %v3447_v59, %v1408_v22  ;;  %v1217_v50 = vadd.f32 1.0, %v5308_v49  ;;  %1855 = vst.msk [vmem:[%s6529_s4 + $0x78] sm:$0xf] %vm1824_vm10, %v2823_v6  ;;  %v3237_v22 = vld [vmem:[%s6528_s1 + $0xf0] sm:$0xff]   ;;  %v5339_v40 = vpop.permute.xlu1 %478 }
 0x14a   :  { %v5326_v51 = vpop.eup %3454  ;;  %v1921_v23 = vsub.f32 1.0, %v1472_v37  ;;  %v1536_v1 = vmul.f32 %v1472_v37, %v6926_v32  ;;  %3460 = vrcp.f32 %v1239_v46  ;;  %v3167_v59 = vunpack.c.l.bf16 %v5244_v45  ;;  %1860 = vst.msk [vmem:[%s6529_s4 + $0x8c] sm:$0xf] %vm1824_vm10, %v2828_v19  ;;  %v6932_v19 = vld [vmem:[#allocation72_spill] sm:$0xff]  ;;  %v6934_v32 = vld [vmem:[#allocation81_spill] sm:$0xff] }
 0x14b   :  { %v2824_v42 = vpack.c.bf16 %v1535_v9, %v1535_v9  ;;  %2079 = vrot.lane.b32.xlu1 %v1920_v61, %s3499_s3  ;;  %3462 = vrcp.f32 %v1217_v50  ;;  %v5341_v6 = vpop.eup %3456  ;;  %v6928_v9 = vsub.f32 %v6923_v55, %v5246_v35  ;;  %v6929_v61 = vunpack.c.h.bf16 %v5244_v45  ;;  %v5355_v50 = vpop.permute.xlu0 %2017  ;;  %v6933_v35 = vld [vmem:[#allocation69_spill] sm:$0xff]  ;;  %v6939_v55 = vld [vmem:[#allocation28_spill] sm:$0xff] }
 0x14c   :  { %2081 = vrot.lane.b32.xlu0 %v1921_v23, %s3499_s3  ;;  %v2825_v46 = vpack.c.bf16 %v1536_v1, %v1536_v1  ;;  %3464 = vpow2.f32 %v1170_v11  ;;  %6930 = vst [vmem:[#allocation51_spill] sm:$0xff] %v5355_v50  ;;  %v5362_v11 = vadd.f32 1.0, %v5326_v51  ;;  %v6931_v23 = vld [vmem:[#allocation53_spill] sm:$0xff]  ;;  %v1413_v62 = vmul.f32 %v4779_v5, %v6932_v19 }
 0x14d   :  { %v795_v37 = vadd.f32 %v6929_v61, %v6928_v9  ;;  %1856 = vst.msk [vmem:[%s6529_s4 + $0x7c] sm:$0xf] %vm1824_vm10, %v2824_v42  ;;  %v602_v1 = vsub.f32 %v6931_v23, %v5232_v52  ;;  %v1414_v45 = vmul.f32 %v6934_v32, %v6933_v35  ;;  %3466 = vpow2.f32 %v1168_v36  ;;  %v6938_v23 = vld [vmem:[#allocation54_spill] sm:$0xff]  ;;  %v5386_v50 = vpop.permute.xlu1 %2019  ;;  %v5411_v19 = vld [vmem:[%s6528_s1 + $0xf8] sm:$0xff]  }
 0x14e   :  { %1857 = vst.msk [vmem:[%s6529_s4 + $0x80] sm:$0xf] %vm1824_vm10, %v2825_v46  ;;  %v2829_v9 = vpack.c.bf16 %v1540_v54, %v1540_v54  ;;  %v3172_v61 = vunpack.c.h.bf16 %v3237_v22  ;;  %v5379_v52 = vsel %vm901_vm4, %v4779_v5, %v1413_v62  ;;  %v605_v28 = vsub.f32 %v6938_v23, %v5297_v53  ;;  %v5388_v36 = vpop.eup %3458  ;;  %v6941_v62 = vld [vmem:[#allocation31_spill] sm:$0xff] }
 0x14f   :  { %v5374_v42 = vmul.f32 100.0, %v795_v37  ;;  %v794_v15 = vadd.f32 %v3167_v59, %v602_v1  ;;  %v1478_v35 = vsel %vm902_vm9, %v6934_v32, %v1414_v45  ;;  %v1925_v59 = vsub.f32 1.0, %v5275_v48  ;;  %v6942_v45 = vld [vmem:[#allocation55_spill] sm:$0xff] }
 0x150   :  { %2085 = vrot.lane.b32.xlu0 %v1923_v2, %s3499_s3  ;;  %1861 = vst.msk [vmem:[%s6529_s4 + $0x90] sm:$0xf] %vm1824_vm10, %v2829_v9  ;;  %v1541_v53 = vmul.f32 %v5379_v52, %v6939_v55  ;;  %v1927_v46 = vsub.f32 1.0, %v1478_v35  ;;  %v1542_v54 = vmul.f32 %v1478_v35, %v6941_v62  ;;  %v797_v2 = vadd.f32 %v3172_v61, %v605_v28  ;;  %v6945_v62 = vld [vmem:[#allocation79_spill] sm:$0xff] }
 0x151   :  { %6935 = vst [vmem:[#allocation72_spill] sm:$0xff] %v5374_v42  ;;  %vm923_vm4 = vcmp.ge.f32.partialorder %v5374_v42, 0.0  ;;  %v987_v5 = vsub.f32 0.0, %v5374_v42  ;;  %v5400_v32 = vmul.f32 100.0, %v794_v15  ;;  %v3171_v1 = vunpack.c.l.bf16 %v3237_v22  ;;  %v5413_v15 = vpop.permute.xlu0 %2021 }
 0x152   :  { %v2830_v37 = vpack.c.bf16 %v1541_v53, %v1541_v53  ;;  %v604_v9 = vsub.f32 %v6942_v45, %v5277_v27  ;;  %v2831_v61 = vpack.c.bf16 %v1542_v54, %v1542_v54  ;;  %v5424_v27 = vmul.f32 100.0, %v797_v2  ;;  %v6944_v53 = vld [vmem:[#allocation77_spill] sm:$0xff]  ;;  %v6946_v2 = vld [vmem:[#allocation58_spill] sm:$0xff] }
 0x153   :  { %6940 = vst [vmem:[#allocation69_spill] sm:$0xff] %v5400_v32  ;;  %v1051_v48 = vsel %vm923_vm4, %v987_v5, %v5374_v42  ;;  %vm922_vm5 = vcmp.ge.f32.partialorder %v5400_v32, 0.0  ;;  %v986_v28 = vsub.f32 0.0, %v5400_v32  ;;  %v6943_v5 = vld [vmem:[#allocation68_spill] sm:$0xff]  ;;  %v1416_v23 = vmul.f32 %v4926_v33, %v6945_v62 }
 0x154   :  { %v1174_v55 = vmul.f32 1.442695, %v1051_v48  ;;  %v5417_v35 = vpop.eup %3460  ;;  %2089 = vrot.lane.b32.xlu0 %v1925_v59, %s3499_s3  ;;  %1862 = vst.msk [vmem:[%s6529_s4 + $0x94] sm:$0xf] %vm1824_vm10, %v2830_v37  ;;  %v796_v22 = vadd.f32 %v3171_v1, %v604_v9  ;;  %v1415_v48 = vmul.f32 %v6944_v53, %v6943_v5  ;;  %1863 = vst.msk [vmem:[%s6529_s4 + $0x98] sm:$0xf] %vm1824_vm10, %v2831_v61  ;;  %v3176_v54 = vunpack.c.h.bf16 %v5411_v19  ;;  %v5440_v1 = vpop.permute.xlu1 %2023 }
 0x155   :  { %v3463_v45 = vpop.eup %3462  ;;  %v1050_v59 = vsel %vm922_vm5, %v986_v28, %v5400_v32  ;;  %v607_v37 = vsub.f32 %v6946_v2, %v5339_v40  ;;  %6947 = vst [vmem:[#allocation81_spill] sm:$0xff] %v5440_v1  ;;  %vm925_vm9 = vcmp.ge.f32.partialorder %v5424_v27, 0.0  ;;  %v989_v28 = vsub.f32 0.0, %v5424_v27  ;;  %v6949_v40 = vld [vmem:[#allocation71_spill] sm:$0xff] }
 0x156   :  { %3468 = vpow2.f32 %v1174_v55  ;;  %v5442_v9 = vpop.eup %3464  ;;  %v1409_v55 = vmul.f32 %v3463_v45, %v5308_v49  ;;  %v1172_v62 = vmul.f32 1.442695, %v1050_v59  ;;  %v5448_v42 = vmul.f32 100.0, %v796_v22  ;;  %v6951_v59 = vld [vmem:[#allocation30_spill] sm:$0xff] }
 0x157   :  { %v1241_v5 = vadd.f32 1.0, %v5442_v9  ;;  %v5453_v32 = vsel %vm903_vm8, %v6944_v53, %v1415_v48  ;;  %vm6950_vm3 = vcmp.ge.f32.partialorder %v6949_v40, 0.0  ;;  %v5458_v1 = vpop.eup %3466  ;;  %v1053_v22 = vsel %vm925_vm9, %v989_v28, %v5424_v27  ;;  %v5468_v48 = vpop.permute.xlu0 %2025  ;;  %v7013_v27 = vld [vmem:[#allocation54_spill] sm:$0xff] }
 0x158   :  { %v1480_v2 = vsel %vm6950_vm3, %v4926_v33, %v1416_v23  ;;  %v1473_v49 = vsel %vm897_vm11, %v3463_v45, %v1409_v55  ;;  %3470 = vpow2.f32 %v1172_v62  ;;  %2093 = vrot.lane.b32.xlu0 %v1927_v46, %s3499_s3  ;;  %v1543_v53 = vmul.f32 %v5453_v32, %v6951_v59  ;;  %v6952_v33 = vld [vmem:[#allocation24_spill] sm:$0xff]  ;;  %v5477_v59 = vpop.permute.xlu1 %2027 }
 0x159   :  { %3472 = vrcp.f32 %v5362_v11  ;;  %v1537_v23 = vmul.f32 %v1473_v49, %v6952_v33  ;;  %v1922_v61 = vsub.f32 1.0, %v1473_v49  ;;  %v1178_v45 = vmul.f32 1.442695, %v1053_v22  ;;  %v6953_v11 = vld [vmem:[#allocation33_spill] sm:$0xff] }
 0x15a   :  { %vm924_vm8 = vcmp.ge.f32.partialorder %v5448_v42, 0.0  ;;  %v988_v46 = vsub.f32 0.0, %v5448_v42  ;;  %v2832_v55 = vpack.c.bf16 %v1543_v53, %v1543_v53  ;;  %3474 = vrcp.f32 %v1241_v5 }
 0x15b   :  { %v2826_v62 = vpack.c.bf16 %v1537_v23, %v1537_v23  ;;  %2083 = vrot.lane.b32.xlu1 %v1922_v61, %s3499_s3  ;;  %v1240_v28 = vadd.f32 1.0, %v5458_v1  ;;  %v1929_v40 = vsub.f32 1.0, %v1480_v2  ;;  %3476 = vpow2.f32 %v1178_v45  ;;  %v6954_v23 = vld [vmem:[#allocation59_spill] sm:$0xff]  ;;  %v6955_v45 = vld [vmem:[#allocation76_spill] sm:$0xff] }
 0x15c   :  { %v1052_v0 = vsel %vm924_vm8, %v988_v46, %v5448_v42  ;;  %1864 = vst.msk [vmem:[%s6529_s4 + $0x9c] sm:$0xf] %vm1824_vm10, %v2832_v55  ;;  %v1544_v49 = vmul.f32 %v1480_v2, %v6953_v11  ;;  %v799_v22 = vadd.f32 %v3176_v54, %v607_v37  ;;  %v3175_v53 = vunpack.c.l.bf16 %v5411_v19  ;;  %v6957_v54 = vld [vmem:[#allocation83_spill] sm:$0xff]  ;;  %v6958_v37 = vld [vmem:[#allocation82_spill] sm:$0xff]  ;;  %v7007_v42 = vld [vmem:[#allocation52_spill] sm:$0xff] }
 0x15d   :  { %1858 = vst.msk [vmem:[%s6529_s4 + $0x84] sm:$0xf] %vm1824_vm10, %v2826_v62  ;;  %v1176_v5 = vmul.f32 1.442695, %v1052_v0  ;;  %2097 = vrot.lane.b32.xlu0 %v1929_v40, %s3499_s3  ;;  %v606_v61 = vsub.f32 %v6954_v23, %v5314_v38  ;;  %v1417_v46 = vmul.f32 %v4910_v44, %v6955_v45  ;;  %v1418_v2 = vmul.f32 %v4989_v14, %v6957_v54  ;;  %v5503_v0 = vpop.permute.xlu0 %2029  ;;  %v6961_v54 = vld [vmem:[#allocation32_spill] sm:$0xff] }
 0x15e   :  { %v2833_v55 = vpack.c.bf16 %v1544_v49, %v1544_v49  ;;  %v5497_v33 = vmul.f32 100.0, %v799_v22  ;;  %v1419_v62 = vmul.f32 %v4970_v17, %v6958_v37  ;;  %v1926_v38 = vsub.f32 1.0, %v5379_v52  ;;  %v6959_v49 = vld [vmem:[#allocation67_spill] sm:$0xff] }
 0x15f   :  { %2087 = vrot.lane.b32.xlu1 %v1924_v25, %s3499_s3  ;;  %3478 = vpow2.f32 %v1176_v5  ;;  %v798_v19 = vadd.f32 %v3175_v53, %v606_v61  ;;  %vm6960_vm13 = vcmp.ge.f32.partialorder %v6959_v49, 0.0  ;;  %v1420_v52 = vmul.f32 %v5031_v58, %v4960_v57  ;;  %v6964_v61 = vld [vmem:[#allocation73_spill] sm:$0xff] }
 0x160   :  { %6956 = vst [vmem:[#allocation74_spill] sm:$0xff] %v5497_v33  ;;  %v5505_v40 = vpop.eup %3468  ;;  %v5512_v22 = vsel %vm6960_vm13, %v4910_v44, %v1417_v46  ;;  %1865 = vst.msk [vmem:[%s6529_s4 + $0xa0] sm:$0xf] %vm1824_vm10, %v2833_v55  ;;  %vm927_vm0 = vcmp.ge.f32.partialorder %v5497_v33, 0.0  ;;  %v991_v45 = vsub.f32 0.0, %v5497_v33  ;;  %3480 = vrcp.f32 %v1240_v28  ;;  %v6962_v44 = vld [vmem:[#allocation70_spill] sm:$0xff]  ;;  %v5534_v55 = vpop.permute.xlu1 %2031 }
 0x161   :  { %v1545_v25 = vmul.f32 %v5512_v22, %v6961_v54  ;;  %v5524_v5 = vmul.f32 100.0, %v798_v19  ;;  %vm6963_vm14 = vcmp.ge.f32.partialorder %v6962_v44, 0.0  ;;  %vm6965_vm11 = vcmp.ge.f32.partialorder %v6964_v61, 0.0 }
 0x162   :  { %v1482_v53 = vsel %vm6963_vm14, %v4989_v14, %v1418_v2  ;;  %v5532_v46 = vsel %vm6965_vm11, %v4970_v17, %v1419_v62  ;;  %v5536_v37 = vpop.eup %3470  ;;  %v1928_v49 = vsub.f32 1.0, %v5453_v32  ;;  %v1055_v57 = vsel %vm927_vm0, %v991_v45, %v5497_v33  ;;  %v6966_v32 = vld [vmem:[#allocation35_spill] sm:$0xff]  ;;  %v6971_v33 = vld [vmem:[#allocation37_spill] sm:$0xff] }
 0x163   :  { %v2834_v28 = vpack.c.bf16 %v1545_v25, %v1545_v25  ;;  %v1931_v19 = vsub.f32 1.0, %v1482_v53  ;;  %v5542_v54 = vpop.eup %3472  ;;  %v1243_v14 = vadd.f32 1.0, %v5505_v40  ;;  %2091 = vrot.lane.b32.xlu1 %v1926_v38, %s3499_s3  ;;  %v1182_v17 = vmul.f32 1.442695, %v1055_v57  ;;  %v6967_v25 = vld [vmem:[#allocation34_spill] sm:$0xff]  ;;  %v6968_v38 = vld [vmem:[#allocation80_spill] sm:$0xff]  ;;  %v5560_v57 = vpop.permute.xlu0 %2033 }
 0x164   :  { %vm926_vm3 = vcmp.ge.f32.partialorder %v5524_v5, 0.0  ;;  %v990_v2 = vsub.f32 0.0, %v5524_v5  ;;  %v1930_v62 = vsub.f32 1.0, %v5512_v22  ;;  %v1546_v45 = vmul.f32 %v1482_v53, %v6966_v32  ;;  %6970 = vst [vmem:[#allocation66_spill] sm:$0xff] %v5560_v57  ;;  %v5562_v11 = vpop.eup %3474 }
 0x165   :  { %1866 = vst.msk [vmem:[%s6529_s4 + $0xa4] sm:$0xf] %vm1824_vm10, %v2834_v28  ;;  %2101 = vrot.lane.b32.xlu0 %v1931_v19, %s3499_s3  ;;  %v1547_v44 = vmul.f32 %v5532_v46, %v6967_v25  ;;  %vm6969_vm13 = vcmp.ge.f32.partialorder %v6968_v38, 0.0  ;;  %v1242_v22 = vadd.f32 1.0, %v5536_v37  ;;  %v5569_v32 = vpop.eup %3476  ;;  %3482 = vpow2.f32 %v1182_v17  ;;  %v6972_v17 = vld [vmem:[#allocation78_spill] sm:$0xff] }
 0x166   :  { %v1484_v61 = vsel %vm6969_vm13, %v5031_v58, %v1420_v52  ;;  %v1054_v28 = vsel %vm926_vm3, %v990_v2, %v5524_v5  ;;  %v2835_v23 = vpack.c.bf16 %v1546_v45, %v1546_v45  ;;  %3484 = vrcp.f32 %v1243_v14  ;;  %v5576_v2 = vpop.permute.xlu1 %2035  ;;  %v6975_v45 = vld [vmem:[#allocation36_spill] sm:$0xff] }
 0x167   :  { %v1933_v19 = vsub.f32 1.0, %v1484_v61  ;;  %v1548_v53 = vmul.f32 %v1484_v61, %v6971_v33  ;;  %v1180_v25 = vmul.f32 1.442695, %v1054_v28  ;;  %v2836_v38 = vpack.c.bf16 %v1547_v44, %v1547_v44  ;;  %2095 = vrot.lane.b32.xlu1 %v1928_v49, %s3499_s3 }
 0x168   :  { %v1421_v52 = vmul.f32 %v5027_v60, %v4955_v12  ;;  %v1422_v57 = vmul.f32 %v5125_v16, %v5044_v3  ;;  %1867 = vst.msk [vmem:[%s6529_s4 + $0xa8] sm:$0xf] %vm1824_vm10, %v2835_v23  ;;  %v1423_v12 = vmul.f32 %v5103_v7, %v5018_v10  ;;  %v1424_v3 = vmul.f32 %v5190_v29, %v5111_v31 }
 0x169   :  { %v2837_v58 = vpack.c.bf16 %v1548_v53, %v1548_v53  ;;  %3486 = vpow2.f32 %v1180_v25  ;;  %1868 = vst.msk [vmem:[%s6529_s4 + $0xac] sm:$0xf] %vm1824_vm10, %v2836_v38  ;;  %2105 = vrot.lane.b32.xlu0 %v1933_v19, %s3499_s3  ;;  %v1425_v49 = vmul.f32 %v5157_v26, %v5080_v39  ;;  %v5593_v14 = vpop.eup %3478  ;;  %v1245_v23 = vadd.f32 1.0, %v5569_v32  ;;  %v6976_v19 = vld [vmem:[#allocation39_spill] sm:$0xff]  ;;  %v6977_v53 = vld [vmem:[#allocation84_spill] sm:$0xff]  ;;  %v6981_v38 = vld [vmem:[#allocation85_spill] sm:$0xff] }
 0x16a   :  { %3488 = vrcp.f32 %v1242_v22  ;;  %vm6973_vm14 = vcmp.ge.f32.partialorder %v6972_v17, 0.0  ;;  %vm6974_vm11 = vcmp.ge.f32.partialorder %v4939_v43, 0.0  ;;  %v1244_v39 = vadd.f32 1.0, %v5593_v14  ;;  %v5610_v22 = vpop.permute.xlu0 %2037  ;;  %v5612_v28 = vpop.eup %3480 }
 0x16b   :  { %1869 = vst.msk [vmem:[%s6529_s4 + $0xb0] sm:$0xf] %vm1824_vm10, %v2837_v58  ;;  %v1485_v10 = vsel %vm6973_vm14, %v5027_v60, %v1421_v52  ;;  %v1486_v31 = vsel %vm6974_vm11, %v5125_v16, %v1422_v57  ;;  %v1426_v61 = vmul.f32 %v5316_v56, %v5167_v41  ;;  %2099 = vrot.lane.b32.xlu1 %v1930_v62, %s3499_s3  ;;  %vm6978_vm13 = vcmp.ge.f32.partialorder %v6977_v53, 0.0  ;;  %v6979_v16 = vld [vmem:[#allocation86_spill] sm:$0xff] }
 0x16c   :  { %v1549_v25 = vmul.f32 %v1485_v10, %v6975_v45  ;;  %v1935_v44 = vsub.f32 1.0, %v1486_v31  ;;  %v1550_v60 = vmul.f32 %v1486_v31, %v6976_v19  ;;  %v5619_v43 = vsel %vm6978_vm13, %v5103_v7, %v1423_v12  ;;  %v6983_v52 = vld [vmem:[#allocation38_spill] sm:$0xff]  ;;  %v6984_v31 = vld [vmem:[#allocation41_spill] sm:$0xff] }
 0x16d   :  { %vm6980_vm14 = vcmp.ge.f32.partialorder %v6979_v16, 0.0  ;;  %vm6982_vm11 = vcmp.ge.f32.partialorder %v6981_v38, 0.0  ;;  %3490 = vrcp.f32 %v1244_v39  ;;  %v1932_v58 = vsub.f32 1.0, %v5532_v46  ;;  %v6985_v16 = vld [vmem:[#allocation40_spill] sm:$0xff] }
 0x16e   :  { %v1488_v57 = vsel %vm6980_vm14, %v5190_v29, %v1424_v3  ;;  %v5627_v41 = vsel %vm6982_vm11, %v5157_v26, %v1425_v49  ;;  %v2838_v62 = vpack.c.bf16 %v1549_v25, %v1549_v25  ;;  %2109 = vrot.lane.b32.xlu0 %v1935_v44, %s3499_s3  ;;  %v1551_v17 = vmul.f32 %v5619_v43, %v6983_v52  ;;  %v5636_v3 = vpop.permute.xlu1 %2039  ;;  %v6987_v49 = vld [vmem:[#allocation89_spill] sm:$0xff] }
 0x16f   :  { %v2839_v7 = vpack.c.bf16 %v1550_v60, %v1550_v60  ;;  %v1937_v12 = vsub.f32 1.0, %v1488_v57  ;;  %v1552_v53 = vmul.f32 %v1488_v57, %v6984_v31  ;;  %v1553_v29 = vmul.f32 %v5627_v41, %v6985_v16  ;;  %2103 = vrot.lane.b32.xlu1 %v1932_v58, %s3499_s3  ;;  %v6988_v60 = vld [vmem:[#allocation43_spill] sm:$0xff]  ;;  %v5653_v38 = vpop.eup %3482 }
 0x170   :  { %3492 = vrcp.f32 %v1245_v23  ;;  %1870 = vst.msk [vmem:[%s6529_s4 + $0xb4] sm:$0xf] %vm1824_vm10, %v2838_v62  ;;  %v2840_v26 = vpack.c.bf16 %v1551_v17, %v1551_v17  ;;  %vm6986_vm13 = vcmp.ge.f32.partialorder %v5071_v24, 0.0  ;;  %v1427_v39 = vmul.f32 %v5238_v21, %v6987_v49  ;;  %v6989_v24 = vld [vmem:[#allocation87_spill] sm:$0xff]  ;;  %v5671_v17 = vpop.permute.xlu0 %2041 }
 0x171   :  { %v1490_v46 = vsel %vm6986_vm13, %v5316_v56, %v1426_v61  ;;  %1871 = vst.msk [vmem:[%s6529_s4 + $0xb8] sm:$0xf] %vm1824_vm10, %v2839_v7  ;;  %v2841_v23 = vpack.c.bf16 %v1552_v53, %v1552_v53  ;;  %v2842_v25 = vpack.c.bf16 %v1553_v29, %v1553_v29  ;;  %vm6990_vm14 = vcmp.ge.f32.partialorder %v6989_v24, 0.0  ;;  %v5673_v7 = vpop.eup %3484 }
 0x172   :  { %v1939_v44 = vsub.f32 1.0, %v1490_v46  ;;  %v1554_v57 = vmul.f32 %v1490_v46, %v6988_v60  ;;  %1872 = vst.msk [vmem:[%s6529_s4 + $0xbc] sm:$0xf] %vm1824_vm10, %v2840_v26  ;;  %2113 = vrot.lane.b32.xlu0 %v1937_v12, %s3499_s3  ;;  %v5663_v56 = vsel %vm6990_vm14, %v5238_v21, %v1427_v39  ;;  %v1428_v61 = vmul.f32 %v5388_v36, %v5279_v18  ;;  %v6991_v21 = vld [vmem:[#allocation42_spill] sm:$0xff]  ;;  %v5709_v34 = vpop.permute.xlu1 %2043 }
 0x173   :  { %v1429_v58 = vmul.f32 %v5341_v6, %v5248_v47  ;;  %v1430_v62 = vmul.f32 %v5542_v54, %v5326_v51  ;;  %v1247_v12 = vadd.f32 1.0, %v5653_v38  ;;  %v1934_v53 = vsub.f32 1.0, %v1485_v10  ;;  %1873 = vst.msk [vmem:[%s6529_s4 + $0xc0] sm:$0xf] %vm1824_vm10, %v2841_v23  ;;  %1874 = vst.msk [vmem:[%s6529_s4 + $0xc4] sm:$0xf] %vm1824_vm10, %v2842_v25  ;;  %v5686_v51 = vpop.eup %3486 }
 0x174   :  { %v2843_v47 = vpack.c.bf16 %v1554_v57, %v1554_v57  ;;  %v1555_v18 = vmul.f32 %v5663_v56, %v6991_v21  ;;  %v1492_v10 = vsel %vm916_vm15, %v5388_v36, %v1428_v61  ;;  %v1431_v49 = vmul.f32 %v5417_v35, %v5301_v4  ;;  %v3489_v39 = vpop.eup %3488  ;;  %v6994_v57 = vld [vmem:[#allocation44_spill] sm:$0xff] }
 0x175   :  { %v5694_v26 = vsel %vm917_vm7, %v5341_v6, %v1429_v58  ;;  %v1494_v46 = vsel %vm918_vm12, %v5542_v54, %v1430_v62  ;;  %v1246_v23 = vadd.f32 1.0, %v5686_v51  ;;  %2107 = vrot.lane.b32.xlu1 %v1934_v53, %s3499_s3  ;;  %v1936_v30 = vsub.f32 1.0, %v5619_v43  ;;  %v6993_v54 = vld [vmem:[#allocation45_spill] sm:$0xff]  ;;  %v6995_v53 = vld [vmem:[#allocation46_spill] sm:$0xff] }
 0x176   :  { %v1938_v36 = vsub.f32 1.0, %v5627_v41  ;;  %1875 = vst.msk [vmem:[%s6529_s4 + $0xc8] sm:$0xf] %vm1824_vm10, %v2843_v47  ;;  %v2844_v6 = vpack.c.bf16 %v1555_v18, %v1555_v18  ;;  %3494 = vrcp.f32 %v1247_v12  ;;  %2117 = vrot.lane.b32.xlu0 %v1939_v44, %s3499_s3  ;;  %v1941_v4 = vsub.f32 1.0, %v1492_v10  ;;  %v5730_v18 = vpop.permute.xlu0 %2045 }
 0x177   :  { %v1556_v25 = vmul.f32 %v1492_v10, %v6993_v54  ;;  %v1557_v24 = vmul.f32 %v5694_v26, %v6994_v57  ;;  %3496 = vrcp.f32 %v1246_v23  ;;  %v1558_v43 = vmul.f32 %v1494_v46, %v6919_v20  ;;  %v3491_v61 = vpop.eup %3490 }
 0x178   :  { %1876 = vst.msk [vmem:[%s6529_s4 + $0xcc] sm:$0xf] %vm1824_vm10, %v2844_v6  ;;  %v5723_v41 = vsel %vm919_vm6, %v5417_v35, %v1431_v49  ;;  %v1432_v44 = vmul.f32 %v5612_v28, %v5458_v1  ;;  %v1940_v58 = vsub.f32 1.0, %v5663_v56  ;;  %v1943_v10 = vsub.f32 1.0, %v1494_v46 }
 0x179   :  { %v2845_v62 = vpack.c.bf16 %v1556_v25, %v1556_v25  ;;  %v2846_v12 = vpack.c.bf16 %v1557_v24, %v1557_v24  ;;  %v1559_v47 = vmul.f32 %v5723_v41, %v6995_v53  ;;  %2111 = vrot.lane.b32.xlu1 %v1936_v30, %s3499_s3  ;;  %v2847_v29 = vpack.c.bf16 %v1558_v43, %v1558_v43  ;;  %v6998_v30 = vld [vmem:[#allocation5_spill] sm:$0xff]  ;;  %v6999_v24 = vld [vmem:[#allocation2_spill] sm:$0xff] }
 0x17a   :  { %v1496_v8 = vsel %vm920_vm2, %v5612_v28, %v1432_v44  ;;  %vm2529_vm15 = vcmask 27664   ;;  %v5736_v35 = vpop.eup %3492  ;;  %2121 = vrot.lane.b32.xlu0 %v1941_v4, %s3499_s3  ;;  %vm2594_vm7 = vcmask 1043488   ;;  %v6997_v28 = vld [vmem:[#allocation51_spill] sm:$0xff]  ;;  %v1433_v49 = vmul.f32 %v5562_v11, %v5442_v9  ;;  %v5759_v4 = vpop.permute.xlu1 %2047 }
 0x17b   :  { %1877 = vst.msk [vmem:[%s6529_s4 + $0xd0] sm:$0xf] %vm1824_vm10, %v2845_v62  ;;  %1878 = vst.msk [vmem:[%s6529_s4 + $0xd4] sm:$0xf] %vm1824_vm10, %v2846_v12  ;;  %v2848_v1 = vpack.c.bf16 %v1559_v47, %v1559_v47  ;;  %v1560_v56 = vmul.f32 %v1496_v8, %v6921_v63  ;;  %v2209_v46 = vmul.f32 %v6997_v28, %v6996_v13  ;;  %v7005_v13 = vld [vmem:[#allocation4_spill] sm:$0xff]  ;;  %v7006_v28 = vld [vmem:[#allocation81_spill] sm:$0xff] }
 0x17c   :  { %1879 = vst.msk [vmem:[%s6529_s4 + $0xd8] sm:$0xf] %vm1824_vm10, %v2847_v29  ;;  %v1434_v23 = vmul.f32 %v3489_v39, %v5536_v37  ;;  %v2210_v6 = vmul.f32 %v5386_v50, %v6998_v30  ;;  %v2211_v43 = vmul.f32 %v5413_v15, %v6999_v24  ;;  %v1435_v44 = vmul.f32 %v5673_v7, %v5505_v40  ;;  %v7002_v40 = vld [vmem:[#allocation50_spill] sm:$0xff]  ;;  %v7008_v24 = vld [vmem:[#allocation55_spill] sm:$0xff] }
 0x17d   :  { %1880 = vst.msk [vmem:[%s6529_s4 + $0xdc] sm:$0xf] %vm1824_vm10, %v2848_v1  ;;  %v2849_v25 = vpack.c.bf16 %v1560_v56, %v1560_v56  ;;  %v1436_v9 = vmul.f32 %v3491_v61, %v5593_v14  ;;  %2115 = vrot.lane.b32.xlu1 %v1938_v36, %s3499_s3  ;;  %v2857_v37 = vpack.c.bf16 %v2209_v46, %v2209_v46  ;;  %v1942_v1 = vsub.f32 1.0, %v5694_v26  ;;  %v7003_v36 = vld [vmem:[#allocation53_spill] sm:$0xff]  ;;  %v5787_v56 = vpop.permute.xlu0 %2049 }
 0x17e   :  { %v5774_v62 = vsel %vm921_vm1, %v5562_v11, %v1433_v49  ;;  %v1498_v47 = vsel %vm922_vm5, %v3489_v39, %v1434_v23  ;;  %v2858_v29 = vpack.c.bf16 %v2210_v6, %v2210_v6  ;;  %2125 = vrot.lane.b32.xlu0 %v1943_v10, %s3499_s3  ;;  %v1945_v15 = vsub.f32 1.0, %v1496_v8  ;;  %v5830_v50 = vpop.permute.xlu1 %2051 }
 0x17f   :  { %1881 = vst.msk [vmem:[%s6529_s4 + $0xe0] sm:$0xf] %vm1824_vm10, %v2849_v25  ;;  %v1561_v14 = vmul.f32 %v5774_v62, %v7002_v40  ;;  %v1562_v11 = vmul.f32 %v1498_v47, %v7003_v36  ;;  %v2859_v26 = vpack.c.bf16 %v2211_v43, %v2211_v43  ;;  %v5800_v10 = vsel %vm923_vm4, %v5673_v7, %v1435_v44 }
 0x180   :  { %2530 = vst.msk [vmem:[%s6529_s4] sm:$0xf] %vm2529_vm15, %v2857_v37  ;;  %2531 = vst.msk [vmem:[%s6529_s4 + $0x4] sm:$0xf] %vm2529_vm15, %v2858_v29  ;;  %v5804_v8 = vsel %vm924_vm8, %v3491_v61, %v1436_v9  ;;  %v2212_v46 = vmul.f32 %v7006_v28, %v7005_v13  ;;  %v3495_v49 = vpop.eup %3494  ;;  %v1944_v23 = vsub.f32 1.0, %v5723_v41  ;;  %v3500_v30 = vmov 0  }
 0x181   :  { %2595 = vst.msk [vmem:[%s6529_s4] sm:$0xf] %vm2594_vm7, %v3500_v30  ;;  %v2850_v6 = vpack.c.bf16 %v1561_v14, %v1561_v14  ;;  %v2851_v7 = vpack.c.bf16 %v1562_v11, %v1562_v11  ;;  %2596 = vst.msk [vmem:[%s6529_s4 + $0x4] sm:$0xf] %vm2594_vm7, %v3500_v30  ;;  %v1563_v61 = vmul.f32 %v5800_v10, %v7007_v42  ;;  %v3497_v25 = vpop.eup %3496  ;;  %2119 = vrot.lane.b32.xlu1 %v1940_v58, %s3499_s3  ;;  %v7009_v9 = vld [vmem:[#allocation7_spill] sm:$0xff]  ;;  %v7011_v11 = vld [vmem:[#allocation9_spill] sm:$0xff]  ;;  %v2054_v13 = vpop.permute.xlu0 %2053 }
 0x182   :  { %v1947_v41 = vsub.f32 1.0, %v1498_v47  ;;  %2532 = vst.msk [vmem:[%s6529_s4 + $0x8] sm:$0xf] %vm2529_vm15, %v2859_v26  ;;  %v1564_v43 = vmul.f32 %v5804_v8, %v7008_v24  ;;  %v2860_v44 = vpack.c.bf16 %v2212_v46, %v2212_v46  ;;  %v2213_v37 = vmul.f32 %v5468_v48, %v7009_v9  ;;  %2129 = vrot.lane.b32.xlu0 %v1945_v15, %s3499_s3  ;;  %v7010_v47 = vld [vmem:[#allocation6_spill] sm:$0xff] }
 0x183   :  { %1882 = vst.msk [vmem:[%s6529_s4 + $0xe4] sm:$0xf] %vm1824_vm10, %v2850_v6  ;;  %1883 = vst.msk [vmem:[%s6529_s4 + $0xe8] sm:$0xf] %vm1824_vm10, %v2851_v7  ;;  %v2852_v48 = vpack.c.bf16 %v1563_v61, %v1563_v61  ;;  %v1437_v58 = vmul.f32 %v5736_v35, %v5569_v32  ;;  %v1438_v12 = vmul.f32 %v3497_v25, %v5686_v51  ;;  %v1946_v28 = vsub.f32 1.0, %v5774_v62  ;;  %v7016_v7 = vld [vmem:[#allocation11_spill] sm:$0xff] }
 0x184   :  { %2597 = vst.msk [vmem:[%s6529_s4 + $0x8] sm:$0xf] %vm2594_vm7, %v3500_v30  ;;  %v2214_v29 = vmul.f32 %v5477_v59, %v7010_v47  ;;  %v2853_v15 = vpack.c.bf16 %v1564_v43, %v1564_v43  ;;  %v2861_v14 = vpack.c.bf16 %v2213_v37, %v2213_v37  ;;  %v2215_v26 = vmul.f32 %v5503_v0, %v7011_v11  ;;  %v7017_v61 = vld [vmem:[#allocation66_spill] sm:$0xff]  ;;  %v7020_v47 = vld [vmem:[#allocation13_spill] sm:$0xff] }
 0x185   :  { %2533 = vst.msk [vmem:[%s6529_s4 + $0xc] sm:$0xf] %vm2529_vm15, %v2860_v44  ;;  %v1439_v39 = vmul.f32 %v3495_v49, %v5653_v38  ;;  %v5870_v59 = vsel %vm925_vm9, %v5736_v35, %v1437_v58  ;;  %v5874_v0 = vsel %vm926_vm3, %v3497_v25, %v1438_v12  ;;  %v7012_v38 = vld [vmem:[#allocation8_spill] sm:$0xff]  ;;  %2123 = vrot.lane.b32.xlu1 %v1942_v1, %s3499_s3  ;;  %v1949_v46 = vsub.f32 1.0, %v5804_v8  ;;  %v7018_v9 = vld [vmem:[#allocation58_spill] sm:$0xff] }
 0x186   :  { %1884 = vst.msk [vmem:[%s6529_s4 + $0xec] sm:$0xf] %vm1824_vm10, %v2852_v48  ;;  %v2862_v32 = vpack.c.bf16 %v2214_v29, %v2214_v29  ;;  %v2216_v51 = vmul.f32 %v5534_v55, %v7012_v38  ;;  %1885 = vst.msk [vmem:[%s6529_s4 + $0xf0] sm:$0xf] %vm1824_vm10, %v2853_v15  ;;  %v1565_v5 = vmul.f32 %v5870_v59, %v7013_v27  ;;  %v7014_v55 = vld [vmem:[#allocation59_spill] sm:$0xff]  ;;  %2133 = vrot.lane.b32.xlu0 %v1947_v41, %s3499_s3  ;;  %v2056_v48 = vpop.permute.xlu1 %2055  ;;  %v7019_v58 = vld [vmem:[#allocation10_spill] sm:$0xff] }
 0x187   :  { %2598 = vst.msk [vmem:[%s6529_s4 + $0xc] sm:$0xf] %vm2594_vm7, %v3500_v30  ;;  %v1566_v35 = vmul.f32 %v5874_v0, %v7014_v55  ;;  %v2863_v62 = vpack.c.bf16 %v2215_v26, %v2215_v26  ;;  %v5905_v8 = vsel %vm927_vm0, %v3495_v49, %v1439_v39  ;;  %v2217_v25 = vmul.f32 %v7017_v61, %v7016_v7  ;;  %v7021_v15 = vld [vmem:[#allocation12_spill] sm:$0xff]  ;;  %v7024_v26 = vld [vmem:[#allocation17_spill] sm:$0xff]  ;;  %v7027_v1 = vld [vmem:[#allocation18_spill] sm:$0xff] }
 0x188   :  { %2534 = vst.msk [vmem:[%s6529_s4 + $0x10] sm:$0xf] %vm2529_vm15, %v2861_v14  ;;  %2535 = vst.msk [vmem:[%s6529_s4 + $0x14] sm:$0xf] %vm2529_vm15, %v2862_v32  ;;  %v2864_v6 = vpack.c.bf16 %v2216_v51, %v2216_v51  ;;  %v2854_v41 = vpack.c.bf16 %v1565_v5, %v1565_v5  ;;  %v1951_v43 = vsub.f32 1.0, %v5874_v0  ;;  %v1567_v37 = vmul.f32 %v5905_v8, %v7018_v9  ;;  %v7025_v51 = vld [vmem:[#allocation16_spill] sm:$0xff] }
 0x189   :  { %2599 = vst.msk [vmem:[%s6529_s4 + $0x10] sm:$0xf] %vm2594_vm7, %v3500_v30  ;;  %v2855_v44 = vpack.c.bf16 %v1566_v35, %v1566_v35  ;;  %2600 = vst.msk [vmem:[%s6529_s4 + $0x14] sm:$0xf] %vm2594_vm7, %v3500_v30  ;;  %v2865_v49 = vpack.c.bf16 %v2217_v25, %v2217_v25  ;;  %v2218_v12 = vmul.f32 %v5576_v2, %v7019_v58  ;;  %2127 = vrot.lane.b32.xlu1 %v1944_v23, %s3499_s3  ;;  %v7023_v23 = vld [vmem:[#allocation14_spill] sm:$0xff]  ;;  %v7026_v35 = vld [vmem:[#allocation19_spill] sm:$0xff] }
 0x18a   :  { %2536 = vst.msk [vmem:[%s6529_s4 + $0x18] sm:$0xf] %vm2529_vm15, %v2863_v62  ;;  %2537 = vst.msk [vmem:[%s6529_s4 + $0x1c] sm:$0xf] %vm2529_vm15, %v2864_v6  ;;  %v2219_v29 = vmul.f32 %v5610_v22, %v7020_v47  ;;  %v2220_v14 = vmul.f32 %v5636_v3, %v7021_v15  ;;  %v2856_v2 = vpack.c.bf16 %v1567_v37, %v1567_v37  ;;  %v7022_v22 = vld [vmem:[#allocation15_spill] sm:$0xff]  ;;  %2137 = vrot.lane.b32.xlu0 %v1949_v46, %s3499_s3  ;;  %v7029_v61 = vld [vmem:[#allocation20_spill] sm:$0xff] }
 0x18b   :  { %1886 = vst.msk [vmem:[%s6529_s4 + $0xf4] sm:$0xf] %vm1824_vm10, %v2854_v41  ;;  %1887 = vst.msk [vmem:[%s6529_s4 + $0xf8] sm:$0xf] %vm1824_vm10, %v2855_v44  ;;  %v2221_v3 = vmul.f32 %v5671_v17, %v7022_v22  ;;  %v2222_v11 = vmul.f32 %v5709_v34, %v7023_v23  ;;  %v2223_v39 = vmul.f32 %v5730_v18, %v7024_v26  ;;  %v2058_v17 = vpop.permute.xlu0 %2057  ;;  %v2060_v41 = vpop.permute.xlu1 %2059  ;;  %v1948_v58 = vsub.f32 1.0, %v5800_v10 }
 0x18c   :  { %2601 = vst.msk [vmem:[%s6529_s4 + $0x18] sm:$0xf] %vm2594_vm7, %v3500_v30  ;;  %2602 = vst.msk [vmem:[%s6529_s4 + $0x1c] sm:$0xf] %vm2594_vm7, %v3500_v30  ;;  %v2866_v0 = vpack.c.bf16 %v2218_v12, %v2218_v12  ;;  %v2867_v32 = vpack.c.bf16 %v2219_v29, %v2219_v29  ;;  %v2868_v38 = vpack.c.bf16 %v2220_v14, %v2220_v14  ;;  %v7032_v29 = vld [vmem:[#allocation49_spill] sm:$0xff]  ;;  %v1950_v14 = vsub.f32 1.0, %v5870_v59 }
 0x18d   :  { %2538 = vst.msk [vmem:[%s6529_s4 + $0x20] sm:$0xf] %vm2529_vm15, %v2865_v49  ;;  %v2224_v5 = vmul.f32 %v5759_v4, %v7025_v51  ;;  %v2869_v34 = vpack.c.bf16 %v2221_v3, %v2221_v3  ;;  %v2870_v18 = vpack.c.bf16 %v2222_v11, %v2222_v11  ;;  %v2871_v46 = vpack.c.bf16 %v2223_v39, %v2223_v39  ;;  %v7033_v3 = vld [vmem:[#allocation48_spill] sm:$0xff]  ;;  %v7034_v39 = vld [vmem:[#allocation57_spill] sm:$0xff] }
 0x18e   :  { %1888 = vst.msk [vmem:[%s6529_s4 + $0xfc] sm:$0xf] %vm1824_vm10, %v2856_v2  ;;  %v2225_v62 = vmul.f32 %v5787_v56, %v7026_v35  ;;  %v2226_v6 = vmul.f32 %v5830_v50, %v7027_v1  ;;  %v7028_v56 = vld [vmem:[#allocation21_spill] sm:$0xff]  ;;  %v2228_v25 = vmul.f32 %v2056_v48, %v7029_v61  ;;  %2131 = vrot.lane.b32.xlu1 %v1946_v28, %s3499_s3  ;;  %v7031_v48 = vld [vmem:[#allocation22_spill] sm:$0xff]  ;;  %v1952_v59 = vsub.f32 1.0, %v5905_v8 }
 0x18f   :  { %2603 = vst.msk [vmem:[%s6529_s4 + $0x20] sm:$0xf] %vm2594_vm7, %v3500_v30  ;;  %v2872_v4 = vpack.c.bf16 %v2224_v5, %v2224_v5  ;;  %v2227_v7 = vmul.f32 %v2054_v13, %v7028_v56  ;;  %v7030_v13 = vld [vmem:[#allocation23_spill] sm:$0xff]  ;;  %2141 = vrot.lane.b32.xlu0 %v1951_v43, %s3499_s3  ;;  %v2230_v49 = vmul.f32 %v2060_v41, %v7031_v48  ;;  %v2062_v47 = vpop.permute.xlu0 %2061  ;;  %v2064_v22 = vpop.permute.xlu1 %2063  ;;  %v7040_v41 = vld [vmem:[#allocation65_spill] sm:$0xff] }
 0x190   :  { %2539 = vst.msk [vmem:[%s6529_s4 + $0x24] sm:$0xf] %vm2529_vm15, %v2866_v0  ;;  %2540 = vst.msk [vmem:[%s6529_s4 + $0x28] sm:$0xf] %vm2529_vm15, %v2867_v32  ;;  %v2873_v50 = vpack.c.bf16 %v2225_v62, %v2225_v62  ;;  %v2229_v28 = vmul.f32 %v2058_v17, %v7030_v13  ;;  %v2874_v43 = vpack.c.bf16 %v2226_v6, %v2226_v6  ;;  %v7037_v62 = vld [vmem:[#allocation60_spill] sm:$0xff]  ;;  %v7038_v56 = vld [vmem:[#allocation63_spill] sm:$0xff] }
 0x191   :  { %2541 = vst.msk [vmem:[%s6529_s4 + $0x2c] sm:$0xf] %vm2529_vm15, %v2868_v38  ;;  %2542 = vst.msk [vmem:[%s6529_s4 + $0x30] sm:$0xf] %vm2529_vm15, %v2869_v34  ;;  %v2875_v44 = vpack.c.bf16 %v2227_v7, %v2227_v7  ;;  %v2876_v37 = vpack.c.bf16 %v2228_v25, %v2228_v25  ;;  %v2878_v10 = vpack.c.bf16 %v2230_v49, %v2230_v49  ;;  %v7035_v38 = vld [vmem:[#allocation56_spill] sm:$0xff]  ;;  %v7036_v34 = vld [vmem:[#allocation61_spill] sm:$0xff] }
 0x192   :  { %2604 = vst.msk [vmem:[%s6529_s4 + $0x24] sm:$0xf] %vm2594_vm7, %v3500_v30  ;;  %2605 = vst.msk [vmem:[%s6529_s4 + $0x28] sm:$0xf] %vm2594_vm7, %v3500_v30  ;;  %v2877_v12 = vpack.c.bf16 %v2229_v28, %v2229_v28  ;;  %2135 = vrot.lane.b32.xlu1 %v1948_v58, %s3499_s3  ;;  %v2231_v15 = vmul.f32 %v2062_v47, %v7032_v29  ;;  %v2232_v23 = vmul.f32 %v2064_v22, %v7033_v3  ;;  %v7041_v49 = vld [vmem:[#allocation64_spill] sm:$0xff] }
 0x193   :  { %2606 = vst.msk [vmem:[%s6529_s4 + $0x2c] sm:$0xf] %vm2594_vm7, %v3500_v30  ;;  %2607 = vst.msk [vmem:[%s6529_s4 + $0x30] sm:$0xf] %vm2594_vm7, %v3500_v30  ;;  %v2066_v26 = vpop.permute.xlu0 %2065 }
 0x194   :  { %2543 = vst.msk [vmem:[%s6529_s4 + $0x34] sm:$0xf] %vm2529_vm15, %v2870_v18  ;;  %2544 = vst.msk [vmem:[%s6529_s4 + $0x38] sm:$0xf] %vm2529_vm15, %v2871_v46  ;;  %v2879_v2 = vpack.c.bf16 %v2231_v15, %v2231_v15  ;;  %v2880_v11 = vpack.c.bf16 %v2232_v23, %v2232_v23  ;;  %v2233_v0 = vmul.f32 %v2066_v26, %v7034_v39 }
 0x195   :  { %2608 = vst.msk [vmem:[%s6529_s4 + $0x34] sm:$0xf] %vm2594_vm7, %v3500_v30  ;;  %2609 = vst.msk [vmem:[%s6529_s4 + $0x38] sm:$0xf] %vm2594_vm7, %v3500_v30 }
 0x196   :  { %2545 = vst.msk [vmem:[%s6529_s4 + $0x3c] sm:$0xf] %vm2529_vm15, %v2872_v4  ;;  %2546 = vst.msk [vmem:[%s6529_s4 + $0x40] sm:$0xf] %vm2529_vm15, %v2873_v50  ;;  %2139 = vrot.lane.b32.xlu1 %v1950_v14, %s3499_s3  ;;  %v2881_v32 = vpack.c.bf16 %v2233_v0, %v2233_v0  ;;  %v7039_v50 = vld [vmem:[#allocation62_spill] sm:$0xff]  ;;  %v7045_v0 = vld [vmem:[#allocation31_spill] sm:$0xff] }
 0x197   :  { %2610 = vst.msk [vmem:[%s6529_s4 + $0x3c] sm:$0xf] %vm2594_vm7, %v3500_v30  ;;  %2611 = vst.msk [vmem:[%s6529_s4 + $0x40] sm:$0xf] %vm2594_vm7, %v3500_v30 }
 0x198   :  { %2547 = vst.msk [vmem:[%s6529_s4 + $0x44] sm:$0xf] %vm2529_vm15, %v2874_v43  ;;  %2548 = vst.msk [vmem:[%s6529_s4 + $0x48] sm:$0xf] %vm2529_vm15, %v2875_v44 }
 0x199   :  { %2549 = vst.msk [vmem:[%s6529_s4 + $0x4c] sm:$0xf] %vm2529_vm15, %v2876_v37  ;;  %2550 = vst.msk [vmem:[%s6529_s4 + $0x50] sm:$0xf] %vm2529_vm15, %v2877_v12 }
 0x19a   :  { %2612 = vst.msk [vmem:[%s6529_s4 + $0x44] sm:$0xf] %vm2594_vm7, %v3500_v30  ;;  %2613 = vst.msk [vmem:[%s6529_s4 + $0x48] sm:$0xf] %vm2594_vm7, %v3500_v30  ;;  %2143 = vrot.lane.b32.xlu1 %v1952_v59, %s3499_s3  ;;  %v7044_v59 = vld [vmem:[#allocation29_spill] sm:$0xff] }
 0x19b   :  { %2614 = vst.msk [vmem:[%s6529_s4 + $0x4c] sm:$0xf] %vm2594_vm7, %v3500_v30  ;;  %2615 = vst.msk [vmem:[%s6529_s4 + $0x50] sm:$0xf] %vm2594_vm7, %v3500_v30  ;;  %v2068_v8 = vpop.permute.xlu1 %2067 }
 0x19c   :  { %2551 = vst.msk [vmem:[%s6529_s4 + $0x54] sm:$0xf] %vm2529_vm15, %v2878_v10  ;;  %2552 = vst.msk [vmem:[%s6529_s4 + $0x58] sm:$0xf] %vm2529_vm15, %v2879_v2  ;;  %v2234_v51 = vmul.f32 %v2068_v8, %v7035_v38  ;;  %v7042_v10 = vld [vmem:[#allocation25_spill] sm:$0xff]  ;;  %v7043_v2 = vld [vmem:[#allocation27_spill] sm:$0xff] }
 0x19d   :  { %2616 = vst.msk [vmem:[%s6529_s4 + $0x54] sm:$0xf] %vm2594_vm7, %v3500_v30  ;;  %2617 = vst.msk [vmem:[%s6529_s4 + $0x58] sm:$0xf] %vm2594_vm7, %v3500_v30 }
 0x19e   :  { %2553 = vst.msk [vmem:[%s6529_s4 + $0x5c] sm:$0xf] %vm2529_vm15, %v2880_v11  ;;  %2554 = vst.msk [vmem:[%s6529_s4 + $0x60] sm:$0xf] %vm2529_vm15, %v2881_v32  ;;  %v2882_v5 = vpack.c.bf16 %v2234_v51, %v2234_v51  ;;  %v7046_v51 = vld [vmem:[#allocation24_spill] sm:$0xff] }
 0x19f   :  { %2618 = vst.msk [vmem:[%s6529_s4 + $0x5c] sm:$0xf] %vm2594_vm7, %v3500_v30  ;;  %2619 = vst.msk [vmem:[%s6529_s4 + $0x60] sm:$0xf] %vm2594_vm7, %v3500_v30 }
 0x1a0   :  { %2555 = vst.msk [vmem:[%s6529_s4 + $0x64] sm:$0xf] %vm2529_vm15, %v2882_v5 }
 0x1a1   :  { %2620 = vst.msk [vmem:[%s6529_s4 + $0x64] sm:$0xf] %vm2594_vm7, %v3500_v30 }
 0x1a2   :  { %v2070_v17 = vpop.permute.xlu0 %2069 }
 0x1a3   :  { %v2235_v18 = vmul.f32 %v2070_v17, %v7036_v34 }
 0x1a5   :  { %v2072_v46 = vpop.permute.xlu1 %2071  ;;  %v2883_v35 = vpack.c.bf16 %v2235_v18, %v2235_v18  ;;  %v7047_v18 = vld [vmem:[#allocation33_spill] sm:$0xff] }
 0x1a6   :  { %v2236_v4 = vmul.f32 %v2072_v46, %v7037_v62  ;;  %v7048_v62 = vld [vmem:[#allocation26_spill] sm:$0xff] }
 0x1a7   :  { %2556 = vst.msk [vmem:[%s6529_s4 + $0x68] sm:$0xf] %vm2529_vm15, %v2883_v35 }
 0x1a8   :  { %v2884_v1 = vpack.c.bf16 %v2236_v4, %v2236_v4  ;;  %v2074_v6 = vpop.permute.xlu0 %2073  ;;  %2621 = vst.msk [vmem:[%s6529_s4 + $0x68] sm:$0xf] %vm2594_vm7, %v3500_v30 }
 0x1a9   :  { %v2237_v7 = vmul.f32 %v2074_v6, %v7038_v56 }
 0x1aa   :  { %2557 = vst.msk [vmem:[%s6529_s4 + $0x6c] sm:$0xf] %vm2529_vm15, %v2884_v1 }
 0x1ab   :  { %2622 = vst.msk [vmem:[%s6529_s4 + $0x6c] sm:$0xf] %vm2594_vm7, %v3500_v30  ;;  %v2885_v61 = vpack.c.bf16 %v2237_v7, %v2237_v7  ;;  %v7049_v7 = vld [vmem:[#allocation28_spill] sm:$0xff] }
 0x1ad   :  { %2558 = vst.msk [vmem:[%s6529_s4 + $0x70] sm:$0xf] %vm2529_vm15, %v2885_v61 }
 0x1ae   :  { %2623 = vst.msk [vmem:[%s6529_s4 + $0x70] sm:$0xf] %vm2594_vm7, %v3500_v30 }
 0x1b7   :  { %v2076_v25 = vpop.permute.xlu1 %2075 }
 0x1b8   :  { %v2238_v13 = vmul.f32 %v2076_v25, %v7039_v50  ;;  %v7050_v50 = vld [vmem:[#allocation35_spill] sm:$0xff] }
 0x1b9   :  { %v2078_v28 = vpop.permute.xlu0 %2077 }
 0x1ba   :  { %v2239_v43 = vmul.f32 %v2078_v28, %v7040_v41  ;;  %v2886_v44 = vpack.c.bf16 %v2238_v13, %v2238_v13 }
 0x1bc   :  { %v2887_v37 = vpack.c.bf16 %v2239_v43, %v2239_v43  ;;  %2559 = vst.msk [vmem:[%s6529_s4 + $0x74] sm:$0xf] %vm2529_vm15, %v2886_v44  ;;  %v7051_v44 = vld [vmem:[#allocation30_spill] sm:$0xff] }
 0x1bd   :  { %v2080_v48 = vpop.permute.xlu1 %2079  ;;  %2624 = vst.msk [vmem:[%s6529_s4 + $0x74] sm:$0xf] %vm2594_vm7, %v3500_v30 }
 0x1be   :  { %v2240_v58 = vmul.f32 %v2080_v48, %v7041_v49  ;;  %v2082_v12 = vpop.permute.xlu0 %2081  ;;  %2560 = vst.msk [vmem:[%s6529_s4 + $0x78] sm:$0xf] %vm2529_vm15, %v2887_v37 }
 0x1bf   :  { %v2241_v47 = vmul.f32 %v2082_v12, %v7042_v10  ;;  %2625 = vst.msk [vmem:[%s6529_s4 + $0x78] sm:$0xf] %vm2594_vm7, %v3500_v30 }
 0x1c0   :  { %v2888_v29 = vpack.c.bf16 %v2240_v58, %v2240_v58 }
 0x1c1   :  { %v2889_v15 = vpack.c.bf16 %v2241_v47, %v2241_v47  ;;  %v7052_v47 = vld [vmem:[#allocation32_spill] sm:$0xff] }
 0x1c2   :  { %2561 = vst.msk [vmem:[%s6529_s4 + $0x7c] sm:$0xf] %vm2529_vm15, %v2888_v29  ;;  %v2086_v14 = vpop.permute.xlu0 %2085 }
 0x1c3   :  { %2626 = vst.msk [vmem:[%s6529_s4 + $0x7c] sm:$0xf] %vm2594_vm7, %v3500_v30  ;;  %v2243_v22 = vmul.f32 %v2086_v14, %v7043_v2 }
 0x1c4   :  { %2562 = vst.msk [vmem:[%s6529_s4 + $0x80] sm:$0xf] %vm2529_vm15, %v2889_v15 }
 0x1c5   :  { %2627 = vst.msk [vmem:[%s6529_s4 + $0x80] sm:$0xf] %vm2594_vm7, %v3500_v30  ;;  %v2891_v3 = vpack.c.bf16 %v2243_v22, %v2243_v22 }
 0x1c6   :  { %v2090_v23 = vpop.permute.xlu0 %2089 }
 0x1c7   :  { %2564 = vst.msk [vmem:[%s6529_s4 + $0x88] sm:$0xf] %vm2529_vm15, %v2891_v3  ;;  %v2245_v11 = vmul.f32 %v2090_v23, %v7044_v59  ;;  %v7053_v3 = vld [vmem:[#allocation34_spill] sm:$0xff] }
 0x1c8   :  { %2629 = vst.msk [vmem:[%s6529_s4 + $0x88] sm:$0xf] %vm2594_vm7, %v3500_v30 }
 0x1c9   :  { %v2893_v26 = vpack.c.bf16 %v2245_v11, %v2245_v11 }
 0x1ca   :  { %v2094_v39 = vpop.permute.xlu0 %2093 }
 0x1cb   :  { %2566 = vst.msk [vmem:[%s6529_s4 + $0x90] sm:$0xf] %vm2529_vm15, %v2893_v26  ;;  %v2247_v32 = vmul.f32 %v2094_v39, %v7045_v0 }
 0x1cc   :  { %2631 = vst.msk [vmem:[%s6529_s4 + $0x90] sm:$0xf] %vm2594_vm7, %v3500_v30 }
 0x1cd   :  { %v2084_v8 = vpop.permute.xlu1 %2083  ;;  %v2895_v38 = vpack.c.bf16 %v2247_v32, %v2247_v32 }
 0x1ce   :  { %v2242_v5 = vmul.f32 %v2084_v8, %v7046_v51 }
 0x1cf   :  { %2568 = vst.msk [vmem:[%s6529_s4 + $0x98] sm:$0xf] %vm2529_vm15, %v2895_v38  ;;  %v2098_v17 = vpop.permute.xlu0 %2097 }
 0x1d0   :  { %v2890_v34 = vpack.c.bf16 %v2242_v5, %v2242_v5  ;;  %2633 = vst.msk [vmem:[%s6529_s4 + $0x98] sm:$0xf] %vm2594_vm7, %v3500_v30  ;;  %v2249_v46 = vmul.f32 %v2098_v17, %v7047_v18 }
 0x1d1   :  { %v2088_v35 = vpop.permute.xlu1 %2087 }
 0x1d2   :  { %2563 = vst.msk [vmem:[%s6529_s4 + $0x84] sm:$0xf] %vm2529_vm15, %v2890_v34  ;;  %v2244_v4 = vmul.f32 %v2088_v35, %v7048_v62  ;;  %v2897_v1 = vpack.c.bf16 %v2249_v46, %v2249_v46 }
 0x1d3   :  { %2628 = vst.msk [vmem:[%s6529_s4 + $0x84] sm:$0xf] %vm2594_vm7, %v3500_v30 }
 0x1d4   :  { %v2892_v6 = vpack.c.bf16 %v2244_v4, %v2244_v4  ;;  %2570 = vst.msk [vmem:[%s6529_s4 + $0xa0] sm:$0xf] %vm2529_vm15, %v2897_v1 }
 0x1d5   :  { %v2092_v56 = vpop.permute.xlu1 %2091  ;;  %2635 = vst.msk [vmem:[%s6529_s4 + $0xa0] sm:$0xf] %vm2594_vm7, %v3500_v30 }
 0x1d6   :  { %2565 = vst.msk [vmem:[%s6529_s4 + $0x8c] sm:$0xf] %vm2529_vm15, %v2892_v6  ;;  %v2246_v61 = vmul.f32 %v2092_v56, %v7049_v7 }
 0x1d7   :  { %v2102_v25 = vpop.permute.xlu0 %2101  ;;  %2630 = vst.msk [vmem:[%s6529_s4 + $0x8c] sm:$0xf] %vm2594_vm7, %v3500_v30 }
 0x1d8   :  { %v2251_v13 = vmul.f32 %v2102_v25, %v7050_v50  ;;  %v2894_v28 = vpack.c.bf16 %v2246_v61, %v2246_v61 }
 0x1d9   :  { %v2096_v41 = vpop.permute.xlu1 %2095 }
 0x1da   :  { %v2899_v43 = vpack.c.bf16 %v2251_v13, %v2251_v13  ;;  %2567 = vst.msk [vmem:[%s6529_s4 + $0x94] sm:$0xf] %vm2529_vm15, %v2894_v28  ;;  %v2248_v37 = vmul.f32 %v2096_v41, %v7051_v44 }
 0x1db   :  { %v2106_v48 = vpop.permute.xlu0 %2105  ;;  %2632 = vst.msk [vmem:[%s6529_s4 + $0x94] sm:$0xf] %vm2594_vm7, %v3500_v30 }
 0x1dc   :  { %2572 = vst.msk [vmem:[%s6529_s4 + $0xa8] sm:$0xf] %vm2529_vm15, %v2899_v43  ;;  %v2253_v49 = vmul.f32 %v2106_v48, %v6971_v33  ;;  %v2896_v58 = vpack.c.bf16 %v2248_v37, %v2248_v37 }
 0x1dd   :  { %2637 = vst.msk [vmem:[%s6529_s4 + $0xa8] sm:$0xf] %vm2594_vm7, %v3500_v30  ;;  %v2100_v12 = vpop.permute.xlu1 %2099 }
 0x1de   :  { %v2901_v10 = vpack.c.bf16 %v2253_v49, %v2253_v49  ;;  %2569 = vst.msk [vmem:[%s6529_s4 + $0x9c] sm:$0xf] %vm2529_vm15, %v2896_v58  ;;  %v2250_v29 = vmul.f32 %v2100_v12, %v7052_v47 }
 0x1df   :  { %2634 = vst.msk [vmem:[%s6529_s4 + $0x9c] sm:$0xf] %vm2594_vm7, %v3500_v30 }
 0x1e0   :  { %v2110_v15 = vpop.permute.xlu0 %2109  ;;  %2574 = vst.msk [vmem:[%s6529_s4 + $0xb0] sm:$0xf] %vm2529_vm15, %v2901_v10  ;;  %v2898_v14 = vpack.c.bf16 %v2250_v29, %v2250_v29 }
 0x1e1   :  { %v2255_v33 = vmul.f32 %v2110_v15, %v6976_v19  ;;  %2639 = vst.msk [vmem:[%s6529_s4 + $0xb0] sm:$0xf] %vm2594_vm7, %v3500_v30  ;;  %v2104_v2 = vpop.permute.xlu1 %2103 }
 0x1e2   :  { %2571 = vst.msk [vmem:[%s6529_s4 + $0xa4] sm:$0xf] %vm2529_vm15, %v2898_v14  ;;  %v2252_v23 = vmul.f32 %v2104_v2, %v7053_v3 }
 0x1e3   :  { %v2903_v22 = vpack.c.bf16 %v2255_v33, %v2255_v33  ;;  %2636 = vst.msk [vmem:[%s6529_s4 + $0xa4] sm:$0xf] %vm2594_vm7, %v3500_v30 }
 0x1e4   :  { %v2114_v59 = vpop.permute.xlu0 %2113  ;;  %v2900_v11 = vpack.c.bf16 %v2252_v23, %v2252_v23 }
 0x1e5   :  { %2576 = vst.msk [vmem:[%s6529_s4 + $0xb8] sm:$0xf] %vm2529_vm15, %v2903_v22  ;;  %v2257_v19 = vmul.f32 %v2114_v59, %v6984_v31 }
 0x1e6   :  { %2641 = vst.msk [vmem:[%s6529_s4 + $0xb8] sm:$0xf] %vm2594_vm7, %v3500_v30 }
 0x1e7   :  { %v2108_v26 = vpop.permute.xlu1 %2107  ;;  %v2905_v39 = vpack.c.bf16 %v2257_v19, %v2257_v19  ;;  %2573 = vst.msk [vmem:[%s6529_s4 + $0xac] sm:$0xf] %vm2529_vm15, %v2900_v11 }
 0x1e8   :  { %v2254_v0 = vmul.f32 %v2108_v26, %v6975_v45  ;;  %v2118_v32 = vpop.permute.xlu0 %2117  ;;  %2638 = vst.msk [vmem:[%s6529_s4 + $0xac] sm:$0xf] %vm2594_vm7, %v3500_v30 }
 0x1e9   :  { %2578 = vst.msk [vmem:[%s6529_s4 + $0xc0] sm:$0xf] %vm2529_vm15, %v2905_v39  ;;  %v2259_v31 = vmul.f32 %v2118_v32, %v6988_v60 }
 0x1ea   :  { %v2902_v8 = vpack.c.bf16 %v2254_v0, %v2254_v0  ;;  %2643 = vst.msk [vmem:[%s6529_s4 + $0xc0] sm:$0xf] %vm2594_vm7, %v3500_v30 }
 0x1eb   :  { %v2112_v45 = vpop.permute.xlu1 %2111  ;;  %v2907_v38 = vpack.c.bf16 %v2259_v31, %v2259_v31 }
 0x1ec   :  { %2575 = vst.msk [vmem:[%s6529_s4 + $0xb4] sm:$0xf] %vm2529_vm15, %v2902_v8  ;;  %v2256_v51 = vmul.f32 %v2112_v45, %v6983_v52  ;;  %v2122_v5 = vpop.permute.xlu0 %2121 }
 0x1ed   :  { %2640 = vst.msk [vmem:[%s6529_s4 + $0xb4] sm:$0xf] %vm2594_vm7, %v3500_v30  ;;  %v2261_v60 = vmul.f32 %v2122_v5, %v6993_v54 }
 0x1ee   :  { %2580 = vst.msk [vmem:[%s6529_s4 + $0xc8] sm:$0xf] %vm2529_vm15, %v2907_v38  ;;  %v2904_v17 = vpack.c.bf16 %v2256_v51, %v2256_v51 }
 0x1ef   :  { %2645 = vst.msk [vmem:[%s6529_s4 + $0xc8] sm:$0xf] %vm2594_vm7, %v3500_v30  ;;  %v2116_v52 = vpop.permute.xlu1 %2115  ;;  %v2909_v34 = vpack.c.bf16 %v2261_v60, %v2261_v60 }
 0x1f0   :  { %2577 = vst.msk [vmem:[%s6529_s4 + $0xbc] sm:$0xf] %vm2529_vm15, %v2904_v17  ;;  %v2258_v18 = vmul.f32 %v2116_v52, %v6985_v16  ;;  %v2126_v46 = vpop.permute.xlu0 %2125 }
 0x1f1   :  { %2642 = vst.msk [vmem:[%s6529_s4 + $0xbc] sm:$0xf] %vm2594_vm7, %v3500_v30  ;;  %v2263_v54 = vmul.f32 %v2126_v46, %v6919_v20 }
 0x1f2   :  { %2582 = vst.msk [vmem:[%s6529_s4 + $0xd0] sm:$0xf] %vm2529_vm15, %v2909_v34  ;;  %v2906_v35 = vpack.c.bf16 %v2258_v18, %v2258_v18 }
 0x1f3   :  { %2647 = vst.msk [vmem:[%s6529_s4 + $0xd0] sm:$0xf] %vm2594_vm7, %v3500_v30  ;;  %v2120_v16 = vpop.permute.xlu1 %2119  ;;  %v2911_v62 = vpack.c.bf16 %v2263_v54, %v2263_v54 }
 0x1f4   :  { %2579 = vst.msk [vmem:[%s6529_s4 + $0xc4] sm:$0xf] %vm2529_vm15, %v2906_v35  ;;  %v2260_v4 = vmul.f32 %v2120_v16, %v6991_v21  ;;  %v2130_v1 = vpop.permute.xlu0 %2129 }
 0x1f5   :  { %2644 = vst.msk [vmem:[%s6529_s4 + $0xc4] sm:$0xf] %vm2594_vm7, %v3500_v30  ;;  %v2265_v20 = vmul.f32 %v2130_v1, %v6921_v63 }
 0x1f6   :  { %2584 = vst.msk [vmem:[%s6529_s4 + $0xd8] sm:$0xf] %vm2529_vm15, %v2911_v62  ;;  %v2908_v6 = vpack.c.bf16 %v2260_v4, %v2260_v4 }
 0x1f7   :  { %2649 = vst.msk [vmem:[%s6529_s4 + $0xd8] sm:$0xf] %vm2594_vm7, %v3500_v30  ;;  %v2124_v21 = vpop.permute.xlu1 %2123  ;;  %v2913_v56 = vpack.c.bf16 %v2265_v20, %v2265_v20 }
 0x1f8   :  { %2581 = vst.msk [vmem:[%s6529_s4 + $0xcc] sm:$0xf] %vm2529_vm15, %v2908_v6  ;;  %v2262_v7 = vmul.f32 %v2124_v21, %v6994_v57  ;;  %v2134_v61 = vpop.permute.xlu0 %2133 }
 0x1f9   :  { %2646 = vst.msk [vmem:[%s6529_s4 + $0xcc] sm:$0xf] %vm2594_vm7, %v3500_v30  ;;  %v2267_v63 = vmul.f32 %v2134_v61, %v7003_v36 }
 0x1fa   :  { %2586 = vst.msk [vmem:[%s6529_s4 + $0xe0] sm:$0xf] %vm2529_vm15, %v2913_v56  ;;  %v2910_v25 = vpack.c.bf16 %v2262_v7, %v2262_v7 }
 0x1fb   :  { %2651 = vst.msk [vmem:[%s6529_s4 + $0xe0] sm:$0xf] %vm2594_vm7, %v3500_v30  ;;  %v2128_v57 = vpop.permute.xlu1 %2127  ;;  %v2915_v50 = vpack.c.bf16 %v2267_v63, %v2267_v63 }
 0x1fc   :  { %2583 = vst.msk [vmem:[%s6529_s4 + $0xd4] sm:$0xf] %vm2529_vm15, %v2910_v25  ;;  %v2264_v13 = vmul.f32 %v2128_v57, %v6995_v53  ;;  %v2138_v28 = vpop.permute.xlu0 %2137 }
 0x1fd   :  { %2648 = vst.msk [vmem:[%s6529_s4 + $0xd4] sm:$0xf] %vm2594_vm7, %v3500_v30  ;;  %v2269_v36 = vmul.f32 %v2138_v28, %v7008_v24 }
 0x1fe   :  { %2588 = vst.msk [vmem:[%s6529_s4 + $0xe8] sm:$0xf] %vm2529_vm15, %v2915_v50  ;;  %v2912_v41 = vpack.c.bf16 %v2264_v13, %v2264_v13 }
 0x1ff   :  { %2653 = vst.msk [vmem:[%s6529_s4 + $0xe8] sm:$0xf] %vm2594_vm7, %v3500_v30  ;;  %v2917_v43 = vpack.c.bf16 %v2269_v36, %v2269_v36 }
 0x200   :  { %v2132_v53 = vpop.permute.xlu1 %2131  ;;  %2585 = vst.msk [vmem:[%s6529_s4 + $0xdc] sm:$0xf] %vm2529_vm15, %v2912_v41 }
 0x201   :  { %v2266_v44 = vmul.f32 %v2132_v53, %v7002_v40  ;;  %v2142_v37 = vpop.permute.xlu0 %2141  ;;  %2650 = vst.msk [vmem:[%s6529_s4 + $0xdc] sm:$0xf] %vm2594_vm7, %v3500_v30 }
 0x202   :  { %2590 = vst.msk [vmem:[%s6529_s4 + $0xf0] sm:$0xf] %vm2529_vm15, %v2917_v43  ;;  %v2271_v24 = vmul.f32 %v2142_v37, %v7014_v55 }
 0x203   :  { %v2914_v48 = vpack.c.bf16 %v2266_v44, %v2266_v44  ;;  %2655 = vst.msk [vmem:[%s6529_s4 + $0xf0] sm:$0xf] %vm2594_vm7, %v3500_v30 }
 0x204   :  { %v2136_v40 = vpop.permute.xlu1 %2135  ;;  %v2919_v49 = vpack.c.bf16 %v2271_v24, %v2271_v24 }
 0x205   :  { %2587 = vst.msk [vmem:[%s6529_s4 + $0xe4] sm:$0xf] %vm2529_vm15, %v2914_v48  ;;  %v2268_v58 = vmul.f32 %v2136_v40, %v7007_v42 }
 0x206   :  { %2652 = vst.msk [vmem:[%s6529_s4 + $0xe4] sm:$0xf] %vm2594_vm7, %v3500_v30 }
 0x207   :  { %2592 = vst.msk [vmem:[%s6529_s4 + $0xf8] sm:$0xf] %vm2529_vm15, %v2919_v49  ;;  %v2916_v55 = vpack.c.bf16 %v2268_v58, %v2268_v58 }
 0x208   :  { %2657 = vst.msk [vmem:[%s6529_s4 + $0xf8] sm:$0xf] %vm2594_vm7, %v3500_v30  ;;  %v2140_v12 = vpop.permute.xlu1 %2139 }
 0x209   :  { %2589 = vst.msk [vmem:[%s6529_s4 + $0xec] sm:$0xf] %vm2529_vm15, %v2916_v55  ;;  %v2270_v42 = vmul.f32 %v2140_v12, %v7013_v27 }
 0x20a   :  { %2654 = vst.msk [vmem:[%s6529_s4 + $0xec] sm:$0xf] %vm2594_vm7, %v3500_v30 }
 0x20b   :  { %v2918_v10 = vpack.c.bf16 %v2270_v42, %v2270_v42 }
 0x20c   :  { %v2144_v47 = vpop.permute.xlu1 %2143 }
 0x20d   :  { %2591 = vst.msk [vmem:[%s6529_s4 + $0xf4] sm:$0xf] %vm2529_vm15, %v2918_v10  ;;  %v2272_v29 = vmul.f32 %v2144_v47, %v7018_v9 }
 0x20e   :  { %2656 = vst.msk [vmem:[%s6529_s4 + $0xf4] sm:$0xf] %vm2594_vm7, %v3500_v30 }
 0x20f   :  { %v2920_v27 = vpack.c.bf16 %v2272_v29, %v2272_v29 }
 0x211   :  { %2593 = vst.msk [vmem:[%s6529_s4 + $0xfc] sm:$0xf] %vm2529_vm15, %v2920_v27 }
 0x212   :  { %2658 = vst.msk [vmem:[%s6529_s4 + $0xfc] sm:$0xf] %vm2594_vm7, %v3500_v30 }

// kernel: basic_block_forward.6
= control target key start
LH: loop header
LB: loop body
LE: loop exit
PB: predicated region body
PF: predicated region fallthrough
CT: control target
= control target key end

     0   :  { %s1560_s9 = smov 0   ;;  %s1562_s10 = smov 0   ;;  %s1771_s0 = inlined_call_operand.vmem [shape: bf16[128,1152], index: 0, kind: input, shape index: {}]   ;;  %s1772_s1 = inlined_call_operand.vmem [shape: bf16[1152,128], index: 1, kind: input, shape index: {}]   ;;  %s1773_s2 = inlined_call_operand.vmem [shape: bf16[128,128], index: 2, kind: output, shape index: {}]  }
   0x1   :  { %s1564_s11 = smov 0   ;;  %s1566_s12 = smov 0  }
   0x2   :  { %s1568_s13 = smov 0  }
   0x3 LB: > { %s24_s14 = sadd.s32 1, %s1538_s12  ;;  %p47_p1 = scmp.ne.s32.totalorder %s1530_s10, %s1526_s9  ;;  %s1542_s13 = sphi %s1568_s13, %s12_s13   ;;  %s1538_s12 = sphi %s1566_s12, %s1777_s12   ;;  %s1534_s11 = sphi %s1564_s11, %s1776_s11   ;;  %s1530_s10 = sphi %s1562_s10, %s1775_s10   ;;  %s1526_s9 = sphi %s1560_s9, %s1774_s9  }
   0x4   : > { %p25_p0 = scmp.ge.s32.totalorder %s24_s14, 3  ;;  %p48_p2 = scmp.eq.s32.totalorder %s1542_s13, 0 }
   0x5   : > { %s40_s16 = sadd.s32 1, %s1530_s10  ;;  %p1123_p5 = scmp.ge.s32.totalorder %s1542_s13, 3 }
   0x6   : > { %s1779_s14 = smov (%p25_p0, %s24_s14), 0  ;;  %p49_p3 = por %p48_p2, %p47_p1 }
   0x7   : > { %s36_s15 = ssub.s32 %s1538_s12, %s1779_s14  ;;  %129 = sbr.rel (%p1123_p5) target bundleno = 37 (0x25), region = 16 }
   0x8   : > { %p38_p4 = scmp.eq.s32.totalorder %s36_s15, 0 }
   0xa   : > { %s1595_s17 = scalar_select %p38_p4, %s1530_s10, %s40_s16  }
   0xe   : > { %132 = sbr.rel (!%p49_p3) target bundleno = 37 (0x25), region = 20  ;;  %s134_s18 = sand.u32 (%p49_p3), 1, %s1530_s10  }
   0xf   : > { %s1229_s19 = smul.u32 (%p49_p3), 12, %s1538_s12 }
  0x10   : > { %s1405_s20 = smul.u32 (%p49_p3), 192, %s134_s18 }
  0x11   : > { %s1603_s23 = scalar_lea.vmem (%p49_p3), %s1771_s0, %s1229_s19 }
  0x12   : > { %v157_v0 = vld [vmem:[%s1603_s23] sm:$0xff] (%p49_p3)  ;;  %v161_v2 = vld [vmem:[%s1603_s23 + $0x48] sm:$0xff] (%p49_p3)  ;;  %s1608_s24 = scalar_lea.vmem (%p49_p3), [#allocation3], %s1405_s20  ;;  %v165_v4 = vld [vmem:[%s1603_s23 + $0x90] sm:$0xff] (%p49_p3) }
  0x13   : > { %v159_v1 = vld [vmem:[%s1603_s23 + $0x24] sm:$0xff] (%p49_p3)  ;;  %158 = vst [vmem:[%s1608_s24] sm:$0xff] (%p49_p3), %v157_v0  ;;  %162 = vst [vmem:[%s1608_s24 + $0x18] sm:$0xff] (%p49_p3), %v161_v2  ;;  %v163_v3 = vld [vmem:[%s1603_s23 + $0x6c] sm:$0xff] (%p49_p3) }
  0x14   : > { %160 = vst [vmem:[%s1608_s24 + $0xc] sm:$0xff] (%p49_p3), %v159_v1  ;;  %v167_v5 = vld [vmem:[%s1603_s23 + $0xb4] sm:$0xff] (%p49_p3)  ;;  %164 = vst [vmem:[%s1608_s24 + $0x24] sm:$0xff] (%p49_p3), %v163_v3  ;;  %v171_v7 = vld [vmem:[%s1603_s23 + $0xfc] sm:$0xff] (%p49_p3) }
  0x15   : > { %166 = vst [vmem:[%s1608_s24 + $0x30] sm:$0xff] %v165_v4  ;;  %168 = vst [vmem:[%s1608_s24 + $0x3c] sm:$0xff] %v167_v5  ;;  %v169_v6 = vld [vmem:[%s1603_s23 + $0xd8] sm:$0xff]  ;;  %v173_v8 = vld [vmem:[%s1603_s23 + $0x120] sm:$0xff] }
  0x16   : > { %170 = vst [vmem:[%s1608_s24 + $0x48] sm:$0xff] %v169_v6  ;;  %172 = vst [vmem:[%s1608_s24 + $0x54] sm:$0xff] %v171_v7  ;;  %v175_v9 = vld [vmem:[%s1603_s23 + $0x144] sm:$0xff]  ;;  %v179_v11 = vld [vmem:[%s1603_s23 + $0x18c] sm:$0xff] }
  0x17   : > { %174 = vst [vmem:[%s1608_s24 + $0x60] sm:$0xff] %v173_v8  ;;  %v177_v10 = vld [vmem:[%s1603_s23 + $0x168] sm:$0xff]  ;;  %176 = vst [vmem:[%s1608_s24 + $0x6c] sm:$0xff] %v175_v9  ;;  %v181_v12 = vld [vmem:[%s1603_s23 + $0x1b0] sm:$0xff] }
  0x18   : > { %178 = vst [vmem:[%s1608_s24 + $0x78] sm:$0xff] %v177_v10  ;;  %180 = vst [vmem:[%s1608_s24 + $0x84] sm:$0xff] %v179_v11  ;;  %v183_v13 = vld [vmem:[%s1603_s23 + $0x1d4] sm:$0xff]  ;;  %v187_v15 = vld [vmem:[%s1603_s23 + $0x21c] sm:$0xff] }
  0x19   : > { %v185_v14 = vld [vmem:[%s1603_s23 + $0x1f8] sm:$0xff]  ;;  %182 = vst [vmem:[%s1608_s24 + $0x90] sm:$0xff] %v181_v12  ;;  %184 = vst [vmem:[%s1608_s24 + $0x9c] sm:$0xff] %v183_v13  ;;  %v1125_v16 = vld [vmem:[%s1603_s23 + $0x8] sm:$0xf] }
  0x1a   : > { %186 = vst [vmem:[%s1608_s24 + $0xa8] sm:$0xff] %v185_v14  ;;  %v1127_v17 = vld [vmem:[%s1603_s23 + $0x2c] sm:$0xf]  ;;  %188 = vst [vmem:[%s1608_s24 + $0xb4] sm:$0xff] %v187_v15  ;;  %v1129_v18 = vld [vmem:[%s1603_s23 + $0x50] sm:$0xf] }
  0x1b   : > { %1126 = vst [vmem:[%s1608_s24 + $0x8] sm:$0xf] %v1125_v16  ;;  %1128 = vst [vmem:[%s1608_s24 + $0x14] sm:$0xf] %v1127_v17  ;;  %v1131_v19 = vld [vmem:[%s1603_s23 + $0x74] sm:$0xf] }
  0x1c   : > { %v1133_v20 = vld [vmem:[%s1603_s23 + $0x98] sm:$0xf]  ;;  %1130 = vst [vmem:[%s1608_s24 + $0x20] sm:$0xf] %v1129_v18  ;;  %1132 = vst [vmem:[%s1608_s24 + $0x2c] sm:$0xf] %v1131_v19 }
  0x1d   : > { %1134 = vst [vmem:[%s1608_s24 + $0x38] sm:$0xf] %v1133_v20  ;;  %v1135_v21 = vld [vmem:[%s1603_s23 + $0xbc] sm:$0xf]  ;;  %v1137_v22 = vld [vmem:[%s1603_s23 + $0xe0] sm:$0xf] }
  0x1e   : > { %v1139_v23 = vld [vmem:[%s1603_s23 + $0x104] sm:$0xf]  ;;  %1136 = vst [vmem:[%s1608_s24 + $0x44] sm:$0xf] %v1135_v21  ;;  %1138 = vst [vmem:[%s1608_s24 + $0x50] sm:$0xf] %v1137_v22 }
  0x1f   : > { %1140 = vst [vmem:[%s1608_s24 + $0x5c] sm:$0xf] %v1139_v23  ;;  %v1141_v24 = vld [vmem:[%s1603_s23 + $0x128] sm:$0xf]  ;;  %v1143_v25 = vld [vmem:[%s1603_s23 + $0x14c] sm:$0xf] }
  0x20   : > { %v1145_v26 = vld [vmem:[%s1603_s23 + $0x170] sm:$0xf]  ;;  %1142 = vst [vmem:[%s1608_s24 + $0x68] sm:$0xf] %v1141_v24  ;;  %1144 = vst [vmem:[%s1608_s24 + $0x74] sm:$0xf] %v1143_v25 }
  0x21   : > { %1146 = vst [vmem:[%s1608_s24 + $0x80] sm:$0xf] %v1145_v26  ;;  %v1147_v27 = vld [vmem:[%s1603_s23 + $0x194] sm:$0xf]  ;;  %v1149_v28 = vld [vmem:[%s1603_s23 + $0x1b8] sm:$0xf] }
  0x22   : > { %v1151_v29 = vld [vmem:[%s1603_s23 + $0x1dc] sm:$0xf]  ;;  %1148 = vst [vmem:[%s1608_s24 + $0x8c] sm:$0xf] %v1147_v27  ;;  %1150 = vst [vmem:[%s1608_s24 + $0x98] sm:$0xf] %v1149_v28 }
  0x23   : > { %1152 = vst [vmem:[%s1608_s24 + $0xa4] sm:$0xf] %v1151_v29  ;;  %v1153_v30 = vld [vmem:[%s1603_s23 + $0x200] sm:$0xf]  ;;  %v1155_v31 = vld [vmem:[%s1603_s23 + $0x224] sm:$0xf] }
  0x24   : > { %1154 = vst [vmem:[%s1608_s24 + $0xb0] sm:$0xf] %v1153_v30  ;;  %1156 = vst [vmem:[%s1608_s24 + $0xbc] sm:$0xf] %v1155_v31 }
  0x25 PF: > { %p1157_p6 = scmp.ge.s32.totalorder %s1542_s13, 1  ;;  %p244_p7 = scmp.lt.s32.totalorder %s1542_s13, 4 }
  0x27   : > { %p245_p8 = pnand %p1157_p6, %p244_p7 }
  0x28   : > { %s251_s25 = sand.u32 (!%p245_p8), 1, %s1526_s9   ;;  %s285_s26 = smul.u32 (!%p245_p8), 48, %s1534_s11 }
  0x29   : > { %248 = sbr.rel (%p245_p8) target bundleno = 379 (0x17b), region = 50  ;;  %p1159_p10 = scmp.ne.s32.totalorder (!%p245_p8), %s1534_s11, 0 }
  0x2a   : > { %s1406_s27 = smul.u32 (!%p245_p8), 192, %s251_s25  ;;  %p286_p9 = scmp.lt.s32.totalorder (!%p245_p8), %s285_s26, 143 }
  0x2c   : > { %s1680_s4 = scalar_lea.vmem (!%p245_p8), [#allocation3], %s1406_s27 }
  0x30   : > { %s1781_s26 = smov (!%p286_p9, %s285_s26), 143  ;;  %307 = sbr.rel (%p1159_p10) target bundleno = 58 (0x3a), region = 58 }
  0x31   : > { %s1158_s28 = sshll.u32 %s1781_s26, 2  ;;  %v1544_v32 = vmov (!%p1159_p10), 0.0  }
  0x32   : > { %s1678_s3 = scalar_lea.vmem %s1772_s1, %s1158_s28  ;;  %308 = vst [vmem:[#allocation2] sm:$0xff] (!%p1159_p10), %v1544_v32  ;;  %309 = vst [vmem:[#allocation2 + $0x8] sm:$0xff] (!%p1159_p10), %v1544_v32 }
  0x33   : > { %310 = vst [vmem:[#allocation2 + $0x10] sm:$0xff] (!%p1159_p10), %v1544_v32  ;;  %311 = vst [vmem:[#allocation2 + $0x18] sm:$0xff] (!%p1159_p10), %v1544_v32 }
  0x34   : > { %312 = vst [vmem:[#allocation2 + $0x20] sm:$0xff] (!%p1159_p10), %v1544_v32  ;;  %313 = vst [vmem:[#allocation2 + $0x28] sm:$0xff] (!%p1159_p10), %v1544_v32 }
  0x35   : > { %314 = vst [vmem:[#allocation2 + $0x30] sm:$0xff] (!%p1159_p10), %v1544_v32  ;;  %315 = vst [vmem:[#allocation2 + $0x38] sm:$0xff] (!%p1159_p10), %v1544_v32 }
  0x36   : > { %316 = vst [vmem:[#allocation2 + $0x40] sm:$0xff] (!%p1159_p10), %v1544_v32  ;;  %317 = vst [vmem:[#allocation2 + $0x48] sm:$0xff] (!%p1159_p10), %v1544_v32 }
  0x37   : > { %318 = vst [vmem:[#allocation2 + $0x50] sm:$0xff] %v1544_v32  ;;  %319 = vst [vmem:[#allocation2 + $0x58] sm:$0xff] %v1544_v32 }
  0x38   : > { %320 = vst [vmem:[#allocation2 + $0x60] sm:$0xff] %v1544_v32  ;;  %321 = vst [vmem:[#allocation2 + $0x68] sm:$0xff] %v1544_v32 }
  0x39   : > { %322 = vst [vmem:[#allocation2 + $0x70] sm:$0xff] %v1544_v32  ;;  %323 = vst [vmem:[#allocation2 + $0x78] sm:$0xff] %v1544_v32 }
  0x3a PF: > { %v1448_v33 = vld [vmem:[%s1678_s3 + $0x40] sm:$0xff]   ;;  %v1451_v36 = vld [vmem:[%s1678_s3 + $0x48] sm:$0xff]   ;;  %v1454_v39 = vld [vmem:[%s1678_s3 + $0x50] sm:$0xff]   ;;  %p1208_p11 = scmp.ne.s32.totalorder %s1534_s11, 2 }
  0x3b   : > { %v1449_v34 = vld [vmem:[%s1678_s3] sm:$0xff]   ;;  %1293 = vmatprep.subr.bf16.mxu0 %v1448_v33  ;;  %v1452_v37 = vld [vmem:[%s1678_s3 + $0x8] sm:$0xff]   ;;  %v1455_v40 = vld [vmem:[%s1678_s3 + $0x10] sm:$0xff]  }
  0x3c   : > { %v1450_v35 = vld [vmem:[%s1678_s3 + $0x80] sm:$0xff]   ;;  %1294 = vmatpush3.bf16.msra.mxu0 %v1449_v34  ;;  %v1453_v38 = vld [vmem:[%s1678_s3 + $0x88] sm:$0xff]   ;;  %v1456_v41 = vld [vmem:[%s1678_s3 + $0x90] sm:$0xff]  }
  0x3d   : > { %1373 = vmatprep.subr.bf16.mxu1 %v1450_v35  ;;  %1295 = vmatprep.subr.bf16.mxu0 %v1451_v36  ;;  %v1457_v42 = vld [vmem:[%s1678_s3 + $0x58] sm:$0xff]   ;;  %v1460_v45 = vld [vmem:[%s1678_s3 + $0x60] sm:$0xff]   ;;  %v1463_v48 = vld [vmem:[%s1678_s3 + $0x68] sm:$0xff]  }
  0x3e   : > { %1374 = vmatpush3.bf16.msra.mxu1 %v1450_v35  ;;  %v1458_v43 = vld [vmem:[%s1678_s3 + $0x18] sm:$0xff]   ;;  %v1462_v46 = vld [vmem:[%s1678_s3 + $0xa0] sm:$0xff]   ;;  %v1465_v49 = vld [vmem:[%s1678_s3 + $0xa8] sm:$0xff]  }
  0x3f   : > { %1375 = vmatprep.subr.bf16.mxu1 %v1453_v38  ;;  %v1459_v44 = vld [vmem:[%s1678_s3 + $0x98] sm:$0xff]   ;;  %v1461_v47 = vld [vmem:[%s1678_s3 + $0x20] sm:$0xff]   ;;  %v1464_v50 = vld [vmem:[%s1678_s3 + $0x28] sm:$0xff]  }
  0x40   : > { %1296 = vmatpush3.bf16.msra.mxu0 %v1452_v37  ;;  %v1466_v51 = vld [vmem:[%s1678_s3 + $0x70] sm:$0xff]   ;;  %v1469_v54 = vld [vmem:[%s1678_s3 + $0x78] sm:$0xff]   ;;  %v1472_v59 = vld [vmem:[%s1680_s4] ss:$12 sps:$4 sm:$0xff]  }
  0x41   : > { %1297 = vmatprep.subr.bf16.mxu0 %v1454_v39  ;;  %v1467_v52 = vld [vmem:[%s1678_s3 + $0x30] sm:$0xff]   ;;  %v1471_v55 = vld [vmem:[%s1678_s3 + $0xb8] sm:$0xff]   ;;  %v1476_v61 = vld [vmem:[%s1680_s4 + $0x20] ss:$12 sps:$4 sm:$0xff]  }
  0x42   : > { %1376 = vmatpush3.bf16.msra.mxu1 %v1453_v38  ;;  %v1468_v53 = vld [vmem:[%s1678_s3 + $0xb0] sm:$0xff]   ;;  %v1470_v58 = vld [vmem:[%s1678_s3 + $0x38] sm:$0xff]   ;;  %v1492_v5 = vld [vmem:[%s1680_s4 + $0x80] ss:$12 sps:$4 sm:$0xff]  }
  0x43   : > { %1377 = vmatprep.subr.bf16.mxu1 %v1456_v41  ;;  %v1474_v56 = vld [vmem:[%s1680_s4 + $0x4] ss:$12 sps:$4 sm:$0xff]   ;;  %v1475_v57 = vld [vmem:[%s1680_s4 + $0x8] ss:$12 sps:$4 sm:$0xff]   ;;  %v1485_v4 = vld [vmem:[%s1680_s4 + $0x4c] ss:$12 sps:$4 sm:$0xff]  }
  0x44   : > { %1298 = vmatpush3.bf16.msra.mxu0 %v1455_v40  ;;  %724 = vmatprep.mubr.bf16.mxu0 %v1474_v56  ;;  %v1477_v60 = vld [vmem:[%s1680_s4 + $0x1c] ss:$12 sps:$4 sm:$0xff]   ;;  %v1483_v62 = vld [vmem:[%s1680_s4 + $0x38] ss:$12 sps:$4 sm:$0xff]   ;;  %v1480_v0 = vld [vmem:[%s1680_s4 + $0x34] ss:$12 sps:$4 sm:$0xff]  }
  0x45   : > { %1299 = vmatprep.subr.bf16.mxu0 %v1457_v42  ;;  %1389 = vmatprep.mubr.bf16.mxu1 %v1475_v57  ;;  %v1479_v63 = vld [vmem:[%s1680_s4 + $0x18] ss:$12 sps:$4 sm:$0xff]   ;;  %v1484_v1 = vld [vmem:[%s1680_s4 + $0x50] ss:$12 sps:$4 sm:$0xff]   ;;  %v1491_v2 = vld [vmem:[%s1680_s4 + $0x68] ss:$12 sps:$4 sm:$0xff]  }
  0x46   : > { %1378 = vmatpush3.bf16.msra.mxu1 %v1456_v41  ;;  %v1482_v3 = vld [vmem:[%s1680_s4 + $0x30] ss:$12 sps:$4 sm:$0xff]   ;;  %v1499_v6 = vld [vmem:[%s1680_s4 + $0x98] ss:$12 sps:$4 sm:$0xff]   ;;  %v1487_v7 = vld [vmem:[%s1680_s4 + $0x48] ss:$12 sps:$4 sm:$0xff]  }
  0x47   : > { %1379 = vmatprep.subr.bf16.mxu1 %v1459_v44  ;;  %v1488_v8 = vld [vmem:[%s1680_s4 + $0x64] ss:$12 sps:$4 sm:$0xff]   ;;  %v1490_v10 = vld [vmem:[%s1680_s4 + $0x60] ss:$12 sps:$4 sm:$0xff]   ;;  %v1493_v11 = vld [vmem:[%s1680_s4 + $0x7c] ss:$12 sps:$4 sm:$0xff]  }
  0x48   : > { %1300 = vmatpush3.bf16.msra.mxu0 %v1458_v43  ;;  %v1500_v9 = vld [vmem:[%s1680_s4 + $0xb0] ss:$12 sps:$4 sm:$0xff]   ;;  %v1495_v12 = vld [vmem:[%s1680_s4 + $0x78] ss:$12 sps:$4 sm:$0xff]   ;;  %v1496_v13 = vld [vmem:[%s1680_s4 + $0x94] ss:$12 sps:$4 sm:$0xff]  }
  0x49   : > { %1301 = vmatprep.subr.bf16.mxu0 %v1460_v45  ;;  %v1498_v14 = vld [vmem:[%s1680_s4 + $0x90] ss:$12 sps:$4 sm:$0xff]   ;;  %v1501_v15 = vld [vmem:[%s1680_s4 + $0xac] ss:$12 sps:$4 sm:$0xff]   ;;  %v1503_v16 = vld [vmem:[%s1680_s4 + $0xa8] ss:$12 sps:$4 sm:$0xff]  }
  0x4a   : > { %1380 = vmatpush3.bf16.msra.mxu1 %v1459_v44  ;;  %v324_v23 = vld [vmem:[#allocation2] sm:$0xff]  ;;  %v325_v28 = vld [vmem:[#allocation2 + $0x8] sm:$0xff]  ;;  %v326_v38 = vld [vmem:[#allocation2 + $0x10] sm:$0xff] }
  0x4b   : > { %1381 = vmatprep.subr.bf16.mxu1 %v1462_v46  ;;  %v327_v44 = vld [vmem:[#allocation2 + $0x18] sm:$0xff] }
  0x4c   : > { %1302 = vmatpush3.bf16.msra.mxu0 %v1461_v47 }
  0x4d   : > { %1303 = vmatprep.subr.bf16.mxu0 %v1463_v48 }
  0x4e   : > { %1382 = vmatpush3.bf16.msra.mxu1 %v1462_v46 }
  0x4f   : > { %1383 = vmatprep.subr.bf16.mxu1 %v1465_v49 }
  0x50   : > { %1304 = vmatpush3.bf16.msra.mxu0 %v1464_v50 }
  0x51   : > { %1305 = vmatprep.subr.bf16.mxu0 %v1466_v51 }
  0x52   : > { %1384 = vmatpush3.bf16.msra.mxu1 %v1465_v49 }
  0x53   : > { %1385 = vmatprep.subr.bf16.mxu1 %v1468_v53 }
  0x54   : > { %1306 = vmatpush3.bf16.msra.mxu0 %v1467_v52 }
  0x55   : > { %1307 = vmatprep.subr.bf16.mxu0 %v1469_v54 }
  0x56   : > { %1386 = vmatpush3.bf16.msra.mxu1 %v1468_v53 }
  0x57   : > { %1387 = vmatprep.subr.bf16.mxu1 %v1471_v55 }
  0x58   : > { %1308 = vmatpush3.bf16.msra.mxu0 %v1470_v58 }
  0x5a   : > { %1388 = vmatpush3.bf16.msra.mxu1 %v1471_v55  ;;  %v328_v55 = vld [vmem:[#allocation2 + $0x20] sm:$0xff] }
  0x5b   : > { %725 = vmatmul.mubr.bf16.vlgmr.msra.gmra.mrb[0].mxu0 %v1472_v59 }
  0x5c   : > { %732 = vmatprep.mubr.bf16.mxu0 %v1477_v60  ;;  %v329_v60 = vld [vmem:[#allocation2 + $0x28] sm:$0xff] }
  0x5d   : > { %1390 = vmatmul.mubr.bf16.vlgmr.msra.gmra.mrb[0].mxu1 %v1476_v61 }
  0x5e   : > { %1393 = vmatprep.mubr.bf16.mxu1 %v1483_v62 }
  0x63   : > { %733 = vmatmul.mubr.bf16.gmra.mrb[4].mxu0 %v1479_v63 }
  0x64   : > { %740 = vmatprep.mubr.bf16.mxu0 %v1480_v0 }
  0x65   : > { %1394 = vmatmul.mubr.bf16.gmra.mrb[4].mxu1 %v1484_v1 }
  0x66   : > { %1397 = vmatprep.mubr.bf16.mxu1 %v1491_v2 }
  0x6b   : > { %741 = vmatmul.mubr.bf16.gmra.mrb[8].mxu0 %v1482_v3 }
  0x6c   : > { %748 = vmatprep.mubr.bf16.mxu0 %v1485_v4 }
  0x6d   : > { %1398 = vmatmul.mubr.bf16.gmra.mrb[8].mxu1 %v1492_v5 }
  0x6e   : > { %1401 = vmatprep.mubr.bf16.mxu1 %v1499_v6  ;;  %v330_v6 = vld [vmem:[#allocation2 + $0x30] sm:$0xff] }
  0x73   : > { %749 = vmatmul.mubr.bf16.gmra.mrb[12].mxu0 %v1487_v7 }
  0x74   : > { %756 = vmatprep.mubr.bf16.mxu0 %v1488_v8 }
  0x75   : > { %1402 = vmatmul.mubr.bf16.gmra.mrb[12].mxu1 %v1500_v9 }
  0x7b   : > { %757 = vmatmul.mubr.bf16.gmra.mrb[16].mxu0 %v1490_v10 }
  0x7c   : > { %764 = vmatprep.mubr.bf16.mxu0 %v1493_v11 }
  0x83   : > { %765 = vmatmul.mubr.bf16.gmra.mrb[20].mxu0 %v1495_v12  ;;  %v331_v12 = vld [vmem:[#allocation2 + $0x38] sm:$0xff] }
  0x84   : > { %772 = vmatprep.mubr.bf16.mxu0 %v1496_v13 }
  0x8b   : > { %773 = vmatmul.mubr.bf16.gmra.mrb[24].mxu0 %v1498_v14 }
  0x8c   : > { %780 = vmatprep.mubr.bf16.mxu0 %v1501_v15 }
  0x93   : > { %781 = vmatmul.mubr.bf16.gmra.mrb[28].mxu0 %v1503_v16 }
 0x12e   : > { %v1309_v17 = vpop.f32.mrb[0].mxu0 }
 0x12f   : > { %v1310_v18 = vpop.f32.mrb[1].mxu0 }
 0x130   : > { %v1311_v19 = vadd.f32 %v1310_v18, %v1309_v17  ;;  %v1312_v20 = vpop.f32.mrb[2].mxu0  ;;  %v1391_v21 = vpop.f32.mrb[0].mxu1 }
 0x131   : > { %v1313_v22 = vpop.f32.mrb[3].mxu0  ;;  %v823_v24 = vpop.f32.mrb[1].mxu1 }
 0x132   : > { %v1314_v25 = vadd.f32 %v1313_v22, %v1312_v20  ;;  %v824_v26 = vadd.f32 %v1311_v19, %v823_v24  ;;  %v1392_v27 = vpop.f32.mrb[2].mxu1  ;;  %v332_v22 = vld [vmem:[#allocation2 + $0x40] sm:$0xff] }
 0x133   : > { %v826_v29 = vpop.f32.mrb[3].mxu1 }
 0x134   : > { %v886_v30 = vadd.f32 %v824_v26, %v324_v23  ;;  %v827_v31 = vadd.f32 %v1314_v25, %v826_v29  ;;  %v333_v25 = vld [vmem:[#allocation2 + $0x48] sm:$0xff] }
 0x136   : > { %902 = vst [vmem:[#allocation2] sm:$0xff] %v886_v30  ;;  %v887_v32 = vadd.f32 %v827_v31, %v325_v28  ;;  %v1315_v33 = vpop.f32.mrb[4].mxu0 }
 0x137   : > { %v1316_v34 = vpop.f32.mrb[5].mxu0 }
 0x138   : > { %903 = vst [vmem:[#allocation2 + $0x8] sm:$0xff] %v887_v32  ;;  %v1317_v35 = vadd.f32 %v1316_v34, %v1315_v33  ;;  %v1318_v36 = vpop.f32.mrb[6].mxu0  ;;  %v1395_v37 = vpop.f32.mrb[4].mxu1  ;;  %v334_v33 = vld [vmem:[#allocation2 + $0x50] sm:$0xff] }
 0x139   : > { %v1319_v39 = vpop.f32.mrb[7].mxu0  ;;  %v839_v40 = vpop.f32.mrb[5].mxu1 }
 0x13a   : > { %v832_v41 = vadd.f32 %v1391_v21, %v1317_v35  ;;  %v1320_v42 = vadd.f32 %v1319_v39, %v1318_v36  ;;  %v1396_v43 = vpop.f32.mrb[6].mxu1 }
 0x13b   : > { %v842_v45 = vpop.f32.mrb[7].mxu1 }
 0x13c   : > { %v888_v46 = vadd.f32 %v832_v41, %v326_v38  ;;  %v835_v47 = vadd.f32 %v1392_v27, %v1320_v42 }
 0x13e   : > { %904 = vst [vmem:[#allocation2 + $0x10] sm:$0xff] %v888_v46  ;;  %v889_v48 = vadd.f32 %v835_v47, %v327_v44  ;;  %v1321_v49 = vpop.f32.mrb[8].mxu0  ;;  %v336_v46 = vld [vmem:[#allocation2 + $0x60] sm:$0xff] }
 0x13f   : > { %v1322_v50 = vpop.f32.mrb[9].mxu0 }
 0x140   : > { %905 = vst [vmem:[#allocation2 + $0x18] sm:$0xff] %v889_v48  ;;  %v1323_v51 = vadd.f32 %v1322_v50, %v1321_v49  ;;  %v1324_v52 = vpop.f32.mrb[10].mxu0  ;;  %v1399_v53 = vpop.f32.mrb[8].mxu1  ;;  %v337_v49 = vld [vmem:[#allocation2 + $0x68] sm:$0xff] }
 0x141   : > { %v1325_v54 = vpop.f32.mrb[11].mxu0  ;;  %v855_v56 = vpop.f32.mrb[9].mxu1 }
 0x142   : > { %v1326_v57 = vadd.f32 %v1325_v54, %v1324_v52  ;;  %v840_v58 = vadd.f32 %v1323_v51, %v839_v40  ;;  %v1400_v59 = vpop.f32.mrb[10].mxu1 }
 0x143   : > { %v858_v61 = vpop.f32.mrb[11].mxu1 }
 0x144   : > { %v890_v62 = vadd.f32 %v840_v58, %v328_v55  ;;  %v843_v63 = vadd.f32 %v1326_v57, %v842_v45  ;;  %v338_v57 = vld [vmem:[#allocation2 + $0x70] sm:$0xff] }
 0x146   : > { %906 = vst [vmem:[#allocation2 + $0x20] sm:$0xff] %v890_v62  ;;  %v891_v0 = vadd.f32 %v843_v63, %v329_v60  ;;  %v1327_v1 = vpop.f32.mrb[12].mxu0 }
 0x147   : > { %v1328_v2 = vpop.f32.mrb[13].mxu0 }
 0x148   : > { %907 = vst [vmem:[#allocation2 + $0x28] sm:$0xff] %v891_v0  ;;  %v1329_v3 = vadd.f32 %v1328_v2, %v1327_v1  ;;  %v1330_v4 = vpop.f32.mrb[14].mxu0  ;;  %v1403_v5 = vpop.f32.mrb[12].mxu1  ;;  %v922_v1 = vld [vmem:[#allocation2] sm:$0xff] (!%p1208_p11)  ;;  %v923_v2 = vld [vmem:[#allocation2 + $0x8] sm:$0xff] (!%p1208_p11) }
 0x149   : > { %v1331_v7 = vpop.f32.mrb[15].mxu0  ;;  %v871_v8 = vpop.f32.mrb[13].mxu1 }
 0x14a   : > { %v848_v9 = vadd.f32 %v1395_v37, %v1329_v3  ;;  %v1332_v10 = vadd.f32 %v1331_v7, %v1330_v4  ;;  %v1404_v11 = vpop.f32.mrb[14].mxu1  ;;  %v335_v37 = vld [vmem:[#allocation2 + $0x58] sm:$0xff]  ;;  %v924_v3 = vld [vmem:[#allocation2 + $0x10] sm:$0xff] (!%p1208_p11)  ;;  %v1249_v4 = vpack.c.bf16 (!%p1208_p11), %v923_v2, %v922_v1 }
 0x14b   : > { %v874_v13 = vpop.f32.mrb[15].mxu1 }
 0x14c   : > { %v892_v14 = vadd.f32 %v848_v9, %v330_v6  ;;  %v851_v15 = vadd.f32 %v1396_v43, %v1332_v10  ;;  %v925_v6 = vld [vmem:[#allocation2 + $0x18] sm:$0xff] (!%p1208_p11)  ;;  %1250 = vst [vmem:[%s1773_s2] sm:$0xff] (!%p1208_p11), %v1249_v4  }
 0x14d   : > { %v926_v7 = vld [vmem:[#allocation2 + $0x20] sm:$0xff] (!%p1208_p11)  ;;  %v1254_v9 = vpack.c.bf16 (!%p1208_p11), %v925_v6, %v924_v3 }
 0x14e   : > { %908 = vst [vmem:[#allocation2 + $0x30] sm:$0xff] %v892_v14  ;;  %v893_v16 = vadd.f32 %v851_v15, %v331_v12  ;;  %v1333_v17 = vpop.f32.mrb[16].mxu0 }
 0x14f   : > { %v1334_v18 = vpop.f32.mrb[17].mxu0  ;;  %1286 = vst [vmem:[%s1773_s2 + $0x8] sm:$0xff] (!%p1208_p11), %v1254_v9  }
 0x150   : > { %909 = vst [vmem:[#allocation2 + $0x38] sm:$0xff] %v893_v16  ;;  %v1335_v19 = vadd.f32 %v1334_v18, %v1333_v17  ;;  %v1336_v20 = vpop.f32.mrb[18].mxu0 }
 0x151   : > { %v1337_v21 = vpop.f32.mrb[19].mxu0 }
 0x152   : > { %v1338_v23 = vadd.f32 %v1337_v21, %v1336_v20  ;;  %v856_v24 = vadd.f32 %v1335_v19, %v855_v56 }
 0x154   : > { %v894_v26 = vadd.f32 %v856_v24, %v332_v22  ;;  %v859_v27 = vadd.f32 %v1338_v23, %v858_v61  ;;  %v339_v61 = vld [vmem:[#allocation2 + $0x78] sm:$0xff] }
 0x156   : > { %910 = vst [vmem:[#allocation2 + $0x40] sm:$0xff] %v894_v26  ;;  %v895_v28 = vadd.f32 %v859_v27, %v333_v25  ;;  %v1339_v29 = vpop.f32.mrb[20].mxu0 }
 0x157   : > { %v1340_v30 = vpop.f32.mrb[21].mxu0  ;;  %v929_v12 = vld [vmem:[#allocation2 + $0x38] sm:$0xff] (!%p1208_p11) }
 0x158   : > { %911 = vst [vmem:[#allocation2 + $0x48] sm:$0xff] %v895_v28  ;;  %v1341_v31 = vadd.f32 %v1340_v30, %v1339_v29  ;;  %v1342_v32 = vpop.f32.mrb[22].mxu0 }
 0x159   : > { %v1343_v34 = vpop.f32.mrb[23].mxu0 }
 0x15a   : > { %v864_v35 = vadd.f32 %v1399_v53, %v1341_v31  ;;  %v1344_v36 = vadd.f32 %v1343_v34, %v1342_v32 }
 0x15c   : > { %v896_v38 = vadd.f32 %v864_v35, %v334_v33  ;;  %v867_v39 = vadd.f32 %v1400_v59, %v1344_v36 }
 0x15e   : > { %912 = vst [vmem:[#allocation2 + $0x50] sm:$0xff] %v896_v38  ;;  %v897_v40 = vadd.f32 %v867_v39, %v335_v37  ;;  %v1345_v41 = vpop.f32.mrb[24].mxu0 }
 0x15f   : > { %v1346_v42 = vpop.f32.mrb[25].mxu0  ;;  %v931_v14 = vld [vmem:[#allocation2 + $0x48] sm:$0xff] (!%p1208_p11) }
 0x160   : > { %913 = vst [vmem:[#allocation2 + $0x58] sm:$0xff] %v897_v40  ;;  %v1347_v43 = vadd.f32 %v1346_v42, %v1345_v41  ;;  %v1348_v44 = vpop.f32.mrb[26].mxu0 }
 0x161   : > { %v1349_v45 = vpop.f32.mrb[27].mxu0 }
 0x162   : > { %v1350_v47 = vadd.f32 %v1349_v45, %v1348_v44  ;;  %v872_v48 = vadd.f32 %v1347_v43, %v871_v8  ;;  %v927_v8 = vld [vmem:[#allocation2 + $0x28] sm:$0xff] (!%p1208_p11) }
 0x163   : > { %v1259_v10 = vpack.c.bf16 (!%p1208_p11), %v927_v8, %v926_v7 }
 0x164   : > { %v898_v50 = vadd.f32 %v872_v48, %v336_v46  ;;  %v875_v51 = vadd.f32 %v1350_v47, %v874_v13  ;;  %v930_v13 = vld [vmem:[#allocation2 + $0x40] sm:$0xff] (!%p1208_p11) }
 0x165   : > { %v932_v15 = vld [vmem:[#allocation2 + $0x50] sm:$0xff] (!%p1208_p11)  ;;  %1287 = vst [vmem:[%s1773_s2 + $0x10] sm:$0xff] (!%p1208_p11), %v1259_v10   ;;  %v1269_v17 = vpack.c.bf16 (!%p1208_p11), %v931_v14, %v930_v13 }
 0x166   : > { %914 = vst [vmem:[#allocation2 + $0x60] sm:$0xff] %v898_v50  ;;  %v899_v52 = vadd.f32 %v875_v51, %v337_v49  ;;  %v1351_v53 = vpop.f32.mrb[28].mxu0 }
 0x167   : > { %v1352_v54 = vpop.f32.mrb[29].mxu0  ;;  %v933_v16 = vld [vmem:[#allocation2 + $0x58] sm:$0xff] (!%p1208_p11)  ;;  %1289 = vst [vmem:[%s1773_s2 + $0x20] sm:$0xff] (!%p1208_p11), %v1269_v17  }
 0x168   : > { %915 = vst [vmem:[#allocation2 + $0x68] sm:$0xff] %v899_v52  ;;  %v1353_v55 = vadd.f32 %v1352_v54, %v1351_v53  ;;  %v1354_v56 = vpop.f32.mrb[30].mxu0  ;;  %v1274_v18 = vpack.c.bf16 (!%p1208_p11), %v933_v16, %v932_v15 }
 0x169   : > { %v1355_v58 = vpop.f32.mrb[31].mxu0 }
 0x16a   : > { %v880_v59 = vadd.f32 %v1403_v5, %v1353_v55  ;;  %v1356_v60 = vadd.f32 %v1355_v58, %v1354_v56  ;;  %921 = sbr.rel (%p1208_p11) target bundleno = 379 (0x17b), region = 62  ;;  %v928_v5 = vld [vmem:[#allocation2 + $0x30] sm:$0xff] (!%p1208_p11)  ;;  %1290 = vst [vmem:[%s1773_s2 + $0x28] sm:$0xff] (!%p1208_p11), %v1274_v18  }
 0x16c   : > { %v900_v62 = vadd.f32 %v880_v59, %v338_v57  ;;  %v883_v63 = vadd.f32 %v1404_v11, %v1356_v60  ;;  %v1264_v11 = vpack.c.bf16 (!%p1208_p11), %v929_v12, %v928_v5 }
 0x16d   : > { %v934_v19 = vld [vmem:[#allocation2 + $0x60] sm:$0xff] (!%p1208_p11) }
 0x16e   : > { %916 = vst [vmem:[#allocation2 + $0x70] sm:$0xff] %v900_v62  ;;  %v901_v0 = vadd.f32 %v883_v63, %v339_v61  ;;  %1288 = vst [vmem:[%s1773_s2 + $0x18] sm:$0xff] (!%p1208_p11), %v1264_v11  }
 0x16f   : > { %v935_v20 = vld [vmem:[#allocation2 + $0x68] sm:$0xff] (!%p1208_p11) }
 0x170   : > { %917 = vst [vmem:[#allocation2 + $0x78] sm:$0xff] %v901_v0  ;;  %v1279_v22 = vpack.c.bf16 (!%p1208_p11), %v935_v20, %v934_v19 }
 0x172   : > { %1291 = vst [vmem:[%s1773_s2 + $0x30] sm:$0xff] %v1279_v22  }
 0x175   : > { %v936_v21 = vld [vmem:[#allocation2 + $0x70] sm:$0xff] }
 0x177   : > { %v937_v23 = vld [vmem:[#allocation2 + $0x78] sm:$0xff] }
 0x178   : > { %v1284_v24 = vpack.c.bf16 %v937_v23, %v936_v21 }
 0x17a   : > { %1292 = vst [vmem:[%s1773_s2 + $0x38] sm:$0xff] %v1284_v24  }
 0x17b PF: > { %s12_s13 = sadd.s32 1, %s1542_s13   ;;  %s1774_s9 = smov %s1530_s10 }
 0x17c   : > { %p9_p12 = scmp.ge.s32.totalorder %s12_s13, 5   ;;  %s1775_s10 = smov %s1595_s17 }
 0x17d   : > { %s1776_s11 = smov %s1538_s12  ;;  %s1777_s12 = smov %s1779_s14 }
 0x17e   :  { %11 = sbr.rel (!%p9_p12) target bundleno = 3 (0x3), region = 106 }

// kernel: basic_block_forward.7
= control target key start
LH: loop header
LB: loop body
LE: loop exit
PB: predicated region body
PF: predicated region fallthrough
CT: control target
= control target key end

     0   :  { %vm480_vm10 = vcmask 27648   ;;  %s1582_s0 = inlined_call_operand.vmem [shape: bf16[128,128], index: 0, kind: input, shape index: {}]   ;;  %s1583_s2 = inlined_call_operand.vmem [shape: f32[1,128], index: 2, kind: input, shape index: {}]   ;;  %s1584_s3 = inlined_call_operand.vmem [shape: f32[1,128], index: 3, kind: input, shape index: {}]   ;;  %s1585_s1 = inlined_call_operand.vmem [shape: bf16[128,4], index: 1, kind: input, shape index: {}]   ;;  %s1586_s4 = inlined_call_operand.vmem [shape: bf16[128,128], index: 4, kind: output, shape index: {}]  }
   0x1   :  { %v825_v0 = vld [vmem:[%s1582_s0 + $0x8] sm:$0xff]   ;;  %v940_v1 = vld [vmem:[%s1583_s2] ss:$0 sm:$0xff]  ;;  %v826_v5 = vld [vmem:[%s1582_s0 + $0x10] sm:$0xff]  }
   0x2   :  { %v767_v2 = vunpack.c.l.bf16 %v825_v0  ;;  %v762_v3 = vld [vmem:[%s1582_s0] sm:$0xff]   ;;  %v768_v4 = vunpack.c.h.bf16 %v825_v0  ;;  %v772_v11 = vunpack.c.h.bf16 %v826_v5  ;;  %v771_v14 = vunpack.c.l.bf16 %v826_v5  ;;  %v827_v15 = vld [vmem:[%s1582_s0 + $0x18] sm:$0xff]   ;;  %v829_v31 = vld [vmem:[%s1582_s0 + $0x28] sm:$0xff]  }
   0x3   :  { %v951_v6 = vld [vmem:[%s1584_s3] ss:$0 sm:$0xff]  ;;  %v763_v7 = vunpack.c.l.bf16 %v762_v3  ;;  %v764_v8 = vunpack.c.h.bf16 %v762_v3  ;;  %s906_s3 = smov 124   ;;  %v776_v20 = vunpack.c.h.bf16 %v827_v15  ;;  %v775_v23 = vunpack.c.l.bf16 %v827_v15  ;;  %v830_v38 = vld [vmem:[%s1582_s0 + $0x30] sm:$0xff]   ;;  %v831_v45 = vld [vmem:[%s1582_s0 + $0x38] sm:$0xff]  }
   0x4   :  { %v59_v9 = vmul.f32 %v767_v2, %v940_v1  ;;  %v60_v10 = vmul.f32 %v768_v4, %v940_v1  ;;  %v62_v19 = vmul.f32 %v772_v11, %v940_v1  ;;  %v61_v22 = vmul.f32 %v771_v14, %v940_v1  ;;  %v828_v24 = vld [vmem:[%s1582_s0 + $0x20] sm:$0xff]   ;;  %v832_v58 = vld [vmem:[%s1585_s1 + $0x8] sm:$0xff]   ;;  %v833_v63 = vld [vmem:[%s1585_s1 + $0x10] sm:$0xff]  }
   0x5   :  { %v57_v12 = vmul.f32 %v763_v7, %v940_v1  ;;  %v58_v13 = vmul.f32 %v764_v8, %v940_v1  ;;  %v64_v26 = vmul.f32 %v776_v20, %v940_v1  ;;  %v780_v27 = vunpack.c.h.bf16 %v828_v24  ;;  %v794_v59 = vld [vmem:[%s1585_s1] sm:$0xff]   ;;  %v1077_v2 = vld [vmem:[%s1585_s1 + $0x18] sm:$0xff]   ;;  %v1093_v11 = vld [vmem:[%s1585_s1 + $0x30] sm:$0xff]  }
   0x6   :  { %v961_v16 = vadd.f32 %v951_v6, %v59_v9  ;;  %v969_v18 = vadd.f32 %v951_v6, %v60_v10  ;;  %v984_v25 = vadd.f32 %v951_v6, %v62_v19  ;;  %v990_v28 = vadd.f32 %v951_v6, %v61_v22  ;;  %v1082_v3 = vld [vmem:[%s1585_s1 + $0x20] sm:$0xff]  }
   0x7   :  { %v964_v17 = vadd.f32 %v951_v6, %v57_v12  ;;  %v975_v21 = vadd.f32 %v951_v6, %v58_v13  ;;  %v63_v29 = vmul.f32 %v775_v23, %v940_v1  ;;  %v779_v30 = vunpack.c.l.bf16 %v828_v24 }
   0x8   :  { %116 = vrot.lane.b32.xlu1 %v961_v16, %s906_s3  ;;  %v999_v32 = vadd.f32 %v951_v6, %v64_v26  ;;  %v66_v33 = vmul.f32 %v780_v27, %v940_v1  ;;  %v784_v34 = vunpack.c.h.bf16 %v829_v31  ;;  %v783_v37 = vunpack.c.l.bf16 %v829_v31  ;;  %v1106_v27 = vld [vmem:[%s1585_s1 + $0x38] sm:$0xff]  }
   0x9   :  { %112 = vrot.lane.b32.xlu0 %v964_v17, %s906_s3  ;;  %v1005_v35 = vadd.f32 %v951_v6, %v63_v29  ;;  %v65_v36 = vmul.f32 %v779_v30, %v940_v1  ;;  %v788_v41 = vunpack.c.h.bf16 %v830_v38  ;;  %v787_v44 = vunpack.c.l.bf16 %v830_v38 }
   0xa   :  { %v1014_v39 = vadd.f32 %v951_v6, %v66_v33  ;;  %v68_v40 = vmul.f32 %v784_v34, %v940_v1  ;;  %v67_v43 = vmul.f32 %v783_v37, %v940_v1  ;;  %v792_v48 = vunpack.c.h.bf16 %v831_v45 }
   0xb   :  { %v1020_v42 = vadd.f32 %v951_v6, %v65_v36  ;;  %v70_v47 = vmul.f32 %v788_v41, %v940_v1  ;;  %v69_v50 = vmul.f32 %v787_v44, %v940_v1  ;;  %v791_v51 = vunpack.c.l.bf16 %v831_v45 }
   0xc   :  { %118 = vrot.lane.b32.xlu1 %v969_v18, %s906_s3  ;;  %v1029_v46 = vadd.f32 %v951_v6, %v68_v40  ;;  %v1035_v49 = vadd.f32 %v951_v6, %v67_v43  ;;  %v72_v53 = vmul.f32 %v792_v48, %v940_v1  ;;  %v799_v60 = vunpack.c.l.bf16 %v832_v58 }
   0xd   :  { %114 = vrot.lane.b32.xlu0 %v975_v21, %s906_s3  ;;  %v1041_v52 = vadd.f32 %v951_v6, %v70_v47  ;;  %v1047_v54 = vadd.f32 %v951_v6, %v69_v50  ;;  %v71_v55 = vmul.f32 %v791_v51, %v940_v1  ;;  %v795_v62 = vunpack.c.l.bf16 %v794_v59 }
   0xe   :  { %v1053_v56 = vadd.f32 %v951_v6, %v72_v53  ;;  %v800_v5 = vunpack.c.h.bf16 %v832_v58  ;;  %v796_v8 = vunpack.c.h.bf16 %v794_v59  ;;  %v804_v9 = vunpack.c.h.bf16 %v833_v63 }
   0xf   :  { %v1058_v57 = vadd.f32 %v951_v6, %v71_v55  ;;  %v1088_v6 = vld [vmem:[%s1585_s1 + $0x28] sm:$0xff]   ;;  %v803_v10 = vunpack.c.l.bf16 %v833_v63  ;;  %v808_v14 = vunpack.c.h.bf16 %v1077_v2  ;;  %v807_v15 = vunpack.c.l.bf16 %v1077_v2  ;;  %s907_s1 = smov 4  }
  0x10   :  { %122 = vrot.lane.b32.xlu1 %v984_v25, %s906_s3  ;;  %v812_v19 = vunpack.c.h.bf16 %v1082_v3  ;;  %v811_v24 = vunpack.c.l.bf16 %v1082_v3  ;;  %v816_v26 = vunpack.c.h.bf16 %v1088_v6  ;;  %v815_v31 = vunpack.c.l.bf16 %v1088_v6 }
  0x11   :  { %120 = vrot.lane.b32.xlu0 %v990_v28, %s906_s3  ;;  %v820_v33 = vunpack.c.h.bf16 %v1093_v11  ;;  %v819_v37 = vunpack.c.l.bf16 %v1093_v11  ;;  %v824_v43 = vunpack.c.h.bf16 %v1106_v27  ;;  %v823_v48 = vunpack.c.l.bf16 %v1106_v27 }
  0x14   :  { %126 = vrot.lane.b32.xlu1 %v999_v32, %s906_s3 }
  0x15   :  { %124 = vrot.lane.b32.xlu0 %v1005_v35, %s906_s3 }
  0x18   :  { %130 = vrot.lane.b32.xlu1 %v1014_v39, %s906_s3 }
  0x19   :  { %128 = vrot.lane.b32.xlu0 %v1020_v42, %s906_s3 }
  0x1c   :  { %134 = vrot.lane.b32.xlu1 %v1029_v46, %s906_s3 }
  0x1d   :  { %132 = vrot.lane.b32.xlu0 %v1035_v49, %s906_s3 }
  0x20   :  { %138 = vrot.lane.b32.xlu1 %v1041_v52, %s906_s3 }
  0x21   :  { %136 = vrot.lane.b32.xlu0 %v1047_v54, %s906_s3 }
  0x24   :  { %142 = vrot.lane.b32.xlu1 %v1053_v56, %s906_s3 }
  0x25   :  { %140 = vrot.lane.b32.xlu0 %v1058_v57, %s906_s3 }
  0x7a   :  { %v117_v61 = vpop.permute.xlu1 %116 }
  0x7b   :  { %v162_v0 = vsub.f32 %v961_v16, %v117_v61  ;;  %v113_v1 = vpop.permute.xlu0 %112 }
  0x7c   :  { %v160_v4 = vsub.f32 %v964_v17, %v113_v1 }
  0x7d   :  { %v210_v7 = vadd.f32 %v799_v60, %v162_v0 }
  0x7e   :  { %v208_v12 = vadd.f32 %v795_v62, %v160_v4  ;;  %v119_v13 = vpop.permute.xlu1 %118 }
  0x7f   :  { %v1098_v20 = vmul.f32 100.0, %v210_v7  ;;  %v163_v22 = vsub.f32 %v969_v18, %v119_v13  ;;  %v115_v23 = vpop.permute.xlu0 %114 }
  0x80   :  { %v1108_v29 = vmul.f32 100.0, %v208_v12  ;;  %v161_v30 = vsub.f32 %v975_v21, %v115_v23 }
  0x81   :  { %v258_v34 = vsub.f32 0.0, %v1098_v20  ;;  %v211_v36 = vadd.f32 %v800_v5, %v163_v22  ;;  %vm242_vm0 = vcmp.ge.f32.partialorder %v1098_v20, 0.0 }
  0x82   :  { %v256_v38 = vsub.f32 0.0, %v1108_v29  ;;  %v209_v40 = vadd.f32 %v796_v8, %v161_v30  ;;  %v123_v41 = vpop.permute.xlu1 %122  ;;  %vm240_vm1 = vcmp.ge.f32.partialorder %v1108_v29, 0.0 }
  0x83   :  { %v1119_v44 = vmul.f32 100.0, %v211_v36  ;;  %v165_v45 = vsub.f32 %v984_v25, %v123_v41  ;;  %v121_v47 = vpop.permute.xlu0 %120  ;;  %v274_v50 = vsel %vm242_vm0, %v258_v34, %v1098_v20 }
  0x84   :  { %v1126_v51 = vmul.f32 100.0, %v209_v40  ;;  %v164_v53 = vsub.f32 %v990_v28, %v121_v47  ;;  %v272_v55 = vsel %vm240_vm1, %v256_v38, %v1108_v29  ;;  %v292_v58 = vmul.f32 1.442695, %v274_v50 }
  0x85   :  { %v259_v59 = vsub.f32 0.0, %v1119_v44  ;;  %v213_v60 = vadd.f32 %v804_v9, %v165_v45  ;;  %v288_v61 = vmul.f32 1.442695, %v272_v55  ;;  %vm243_vm2 = vcmp.ge.f32.partialorder %v1119_v44, 0.0 }
  0x86   :  { %v257_v62 = vsub.f32 0.0, %v1126_v51  ;;  %v212_v63 = vadd.f32 %v803_v10, %v164_v53  ;;  %v127_v0 = vpop.permute.xlu1 %126  ;;  %842 = vpow2.f32 %v292_v58  ;;  %vm241_vm3 = vcmp.ge.f32.partialorder %v1126_v51, 0.0 }
  0x87   :  { %v1136_v1 = vmul.f32 100.0, %v213_v60  ;;  %v167_v2 = vsub.f32 %v999_v32, %v127_v0  ;;  %v125_v4 = vpop.permute.xlu0 %124  ;;  %844 = vpow2.f32 %v288_v61  ;;  %v275_v5 = vsel %vm243_vm2, %v259_v59, %v1119_v44 }
  0x88   :  { %v1142_v7 = vmul.f32 100.0, %v212_v63  ;;  %v166_v8 = vsub.f32 %v1005_v35, %v125_v4  ;;  %v273_v9 = vsel %vm241_vm3, %v257_v62, %v1126_v51  ;;  %v294_v10 = vmul.f32 1.442695, %v275_v5 }
  0x89   :  { %v261_v12 = vsub.f32 0.0, %v1136_v1  ;;  %v215_v13 = vadd.f32 %v808_v14, %v167_v2  ;;  %v290_v22 = vmul.f32 1.442695, %v273_v9  ;;  %vm245_vm4 = vcmp.ge.f32.partialorder %v1136_v1, 0.0 }
  0x8a   :  { %v260_v23 = vsub.f32 0.0, %v1142_v7  ;;  %v214_v30 = vadd.f32 %v807_v15, %v166_v8  ;;  %v131_v34 = vpop.permute.xlu1 %130  ;;  %846 = vpow2.f32 %v294_v10  ;;  %vm244_vm5 = vcmp.ge.f32.partialorder %v1142_v7, 0.0 }
  0x8b   :  { %v1152_v36 = vmul.f32 100.0, %v215_v13  ;;  %v169_v38 = vsub.f32 %v1014_v39, %v131_v34  ;;  %v129_v40 = vpop.permute.xlu0 %128  ;;  %848 = vpow2.f32 %v290_v22  ;;  %v277_v14 = vsel %vm245_vm4, %v261_v12, %v1136_v1 }
  0x8c   :  { %v1158_v41 = vmul.f32 100.0, %v214_v30  ;;  %v168_v45 = vsub.f32 %v1020_v42, %v129_v40  ;;  %v276_v15 = vsel %vm244_vm5, %v260_v23, %v1142_v7  ;;  %v298_v47 = vmul.f32 1.442695, %v277_v14 }
  0x8d   :  { %v263_v50 = vsub.f32 0.0, %v1152_v36  ;;  %v217_v53 = vadd.f32 %v812_v19, %v169_v38  ;;  %v296_v55 = vmul.f32 1.442695, %v276_v15  ;;  %vm247_vm6 = vcmp.ge.f32.partialorder %v1152_v36, 0.0 }
  0x8e   :  { %v262_v58 = vsub.f32 0.0, %v1158_v41  ;;  %v216_v59 = vadd.f32 %v811_v24, %v168_v45  ;;  %v135_v60 = vpop.permute.xlu1 %134  ;;  %850 = vpow2.f32 %v298_v47  ;;  %vm246_vm7 = vcmp.ge.f32.partialorder %v1158_v41, 0.0 }
  0x8f   :  { %v1172_v61 = vmul.f32 100.0, %v217_v53  ;;  %v171_v62 = vsub.f32 %v1029_v46, %v135_v60  ;;  %v133_v63 = vpop.permute.xlu0 %132  ;;  %852 = vpow2.f32 %v296_v55  ;;  %v279_v19 = vsel %vm247_vm6, %v263_v50, %v1152_v36 }
  0x90   :  { %v1178_v0 = vpop.eup %842  ;;  %v1180_v2 = vmul.f32 100.0, %v216_v59  ;;  %v170_v3 = vsub.f32 %v1035_v49, %v133_v63  ;;  %v278_v24 = vsel %vm246_vm7, %v262_v58, %v1158_v41  ;;  %v302_v4 = vmul.f32 1.442695, %v279_v19 }
  0x91   :  { %v1186_v5 = vpop.eup %844  ;;  %v265_v8 = vsub.f32 0.0, %v1172_v61  ;;  %v219_v9 = vadd.f32 %v816_v26, %v171_v62  ;;  %v322_v10 = vadd.f32 1.0, %v1178_v0  ;;  %v300_v12 = vmul.f32 1.442695, %v278_v24 }
  0x92   :  { %v264_v13 = vsub.f32 0.0, %v1180_v2  ;;  %v218_v22 = vadd.f32 %v815_v31, %v170_v3  ;;  %v139_v23 = vpop.permute.xlu1 %138  ;;  %v320_v30 = vadd.f32 1.0, %v1186_v5  ;;  %854 = vpow2.f32 %v302_v4 }
  0x93   :  { %v1196_v34 = vmul.f32 100.0, %v219_v9  ;;  %v173_v38 = vsub.f32 %v1041_v52, %v139_v23  ;;  %v137_v40 = vpop.permute.xlu0 %136  ;;  %856 = vrcp.f32 %v322_v10  ;;  %vm248_vm8 = vcmp.ge.f32.partialorder %v1180_v2, 0.0 }
  0x94   :  { %v1200_v26 = vpop.eup %846  ;;  %v1202_v14 = vmul.f32 100.0, %v218_v22  ;;  %v172_v45 = vsub.f32 %v1047_v54, %v137_v40  ;;  %858 = vrcp.f32 %v320_v30  ;;  %v280_v6 = vsel %vm248_vm8, %v264_v13, %v1180_v2 }
  0x95   :  { %v1208_v31 = vpop.eup %848  ;;  %v267_v15 = vsub.f32 0.0, %v1196_v34  ;;  %v221_v47 = vadd.f32 %v820_v33, %v173_v38  ;;  %v323_v50 = vadd.f32 1.0, %v1200_v26  ;;  %860 = vpow2.f32 %v300_v12 }
  0x96   :  { %v266_v53 = vsub.f32 0.0, %v1202_v14  ;;  %v220_v55 = vadd.f32 %v819_v37, %v172_v45  ;;  %v143_v58 = vpop.permute.xlu1 %142  ;;  %v321_v59 = vadd.f32 1.0, %v1208_v31  ;;  %v304_v60 = vmul.f32 1.442695, %v280_v6 }
  0x97   :  { %v1218_v62 = vmul.f32 100.0, %v221_v47  ;;  %v175_v63 = vsub.f32 %v1053_v56, %v143_v58  ;;  %v141_v19 = vpop.permute.xlu0 %140  ;;  %862 = vrcp.f32 %v323_v50  ;;  %vm249_vm9 = vcmp.ge.f32.partialorder %v1172_v61, 0.0 }
  0x98   :  { %v1222_v33 = vpop.eup %850  ;;  %v1224_v3 = vmul.f32 100.0, %v220_v55  ;;  %v174_v24 = vsub.f32 %v1058_v57, %v141_v19  ;;  %864 = vrcp.f32 %v321_v59  ;;  %v281_v11 = vsel %vm249_vm9, %v265_v8, %v1172_v61 }
  0x99   :  { %v1230_v37 = vpop.eup %852  ;;  %v223_v4 = vadd.f32 %v824_v43, %v175_v63  ;;  %v325_v9 = vadd.f32 1.0, %v1222_v33  ;;  %866 = vpow2.f32 %v304_v60  ;;  %v306_v22 = vmul.f32 1.442695, %v281_v11 }
  0x9a   :  { %v268_v10 = vsub.f32 0.0, %v1224_v3  ;;  %v222_v12 = vadd.f32 %v823_v48, %v174_v24  ;;  %v324_v13 = vadd.f32 1.0, %v1230_v37  ;;  %vm250_vm11 = vcmp.ge.f32.partialorder %v1202_v14, 0.0 }
  0x9b   :  { %v1239_v23 = vmul.f32 100.0, %v223_v4  ;;  %868 = vrcp.f32 %v325_v9  ;;  %vm251_vm12 = vcmp.ge.f32.partialorder %v1196_v34, 0.0  ;;  %v269_v8 = vsub.f32 0.0, %v1218_v62 }
  0x9c   :  { %v1243_v43 = vpop.eup %854  ;;  %870 = vrcp.f32 %v324_v13  ;;  %v282_v27 = vsel %vm250_vm11, %v266_v53, %v1202_v14  ;;  %v283_v48 = vsel %vm251_vm12, %v267_v15, %v1196_v34  ;;  %v1252_v38 = vmul.f32 100.0, %v222_v12 }
  0x9d   :  { %v857_v30 = vpop.eup %856  ;;  %v327_v40 = vadd.f32 1.0, %v1243_v43  ;;  %872 = vpow2.f32 %v306_v22  ;;  %v308_v45 = vmul.f32 1.442695, %v282_v27  ;;  %v271_v47 = vsub.f32 0.0, %v1239_v23 }
  0x9e   :  { %v859_v6 = vpop.eup %858  ;;  %v370_v50 = vmul.f32 %v857_v30, %v1178_v0  ;;  %v310_v55 = vmul.f32 1.442695, %v283_v48  ;;  %vm252_vm13 = vcmp.ge.f32.partialorder %v1224_v3, 0.0  ;;  %vm253_vm14 = vcmp.ge.f32.partialorder %v1218_v62, 0.0 }
  0x9f   :  { %v1258_v53 = vpop.eup %860  ;;  %v368_v58 = vmul.f32 %v859_v6, %v1186_v5  ;;  %874 = vrcp.f32 %v327_v40  ;;  %v284_v15 = vsel %vm252_vm13, %v268_v10, %v1224_v3  ;;  %v270_v19 = vsub.f32 0.0, %v1252_v38 }
  0xa0   :  { %v386_v59 = vsel %vm242_vm0, %v857_v30, %v370_v50  ;;  %v326_v60 = vadd.f32 1.0, %v1258_v53  ;;  %876 = vpow2.f32 %v308_v45  ;;  %v312_v0 = vmul.f32 1.442695, %v284_v15 }
  0xa1   :  { %v863_v63 = vpop.eup %862  ;;  %v384_v5 = vsel %vm240_vm1, %v859_v6, %v368_v58  ;;  %v402_v24 = vmul.f32 %v386_v59, %v961_v16  ;;  %878 = vpow2.f32 %v310_v55  ;;  %v285_v29 = vsel %vm253_vm14, %v269_v8, %v1218_v62 }
  0xa2   :  { %v865_v11 = vpop.eup %864  ;;  %v497_v4 = vsub.f32 1.0, %v384_v5  ;;  %v400_v9 = vmul.f32 %v384_v5, %v964_v17  ;;  %v371_v20 = vmul.f32 %v863_v63, %v1200_v26  ;;  %880 = vrcp.f32 %v326_v60 }
  0xa3   :  { %v1274_v10 = vpop.eup %866  ;;  %v731_v12 = vpack.c.bf16 %v402_v24, %v402_v24  ;;  %v369_v13 = vmul.f32 %v865_v11, %v1208_v31  ;;  %882 = vpow2.f32 %v312_v0  ;;  %v314_v48 = vmul.f32 1.442695, %v285_v29 }
  0xa4   :  { %529 = vrot.lane.b32.xlu0 %v497_v4, %s907_s1  ;;  %v729_v22 = vpack.c.bf16 %v400_v9, %v400_v9  ;;  %v387_v27 = vsel %vm243_vm2, %v863_v63, %v371_v20  ;;  %v328_v26 = vadd.f32 1.0, %v1274_v10  ;;  %v499_v31 = vsub.f32 1.0, %v386_v59 }
  0xa5   :  { %v869_v30 = vpop.eup %868  ;;  %483 = vst.msk [vmem:[%s1586_s4 + $0x8] sm:$0xf] %vm480_vm10, %v731_v12  ;;  %v385_v8 = vsel %vm241_vm3, %v865_v11, %v369_v13  ;;  %v403_v40 = vmul.f32 %v387_v27, %v969_v18  ;;  %vm254_vm15 = vcmp.ge.f32.partialorder %v1252_v38, 0.0  ;;  %vm255_vm0 = vcmp.ge.f32.partialorder %v1239_v23, 0.0 }
  0xa6   :  { %v871_v45 = vpop.eup %870  ;;  %481 = vst.msk [vmem:[%s1586_s4] sm:$0xf] %vm480_vm10, %v729_v22  ;;  %v498_v44 = vsub.f32 1.0, %v385_v8  ;;  %v401_v6 = vmul.f32 %v385_v8, %v975_v21  ;;  %v373_v50 = vmul.f32 %v869_v30, %v1222_v33  ;;  %884 = vrcp.f32 %v328_v26 }
  0xa7   :  { %v1298_v55 = vpop.eup %872  ;;  %v732_v51 = vpack.c.bf16 %v403_v40, %v403_v40  ;;  %v372_v58 = vmul.f32 %v871_v45, %v1230_v37  ;;  %886 = vpow2.f32 %v314_v48  ;;  %v286_v15 = vsel %vm254_vm15, %v270_v19, %v1252_v38 }
  0xa8   :  { %533 = vrot.lane.b32.xlu0 %v499_v31, %s907_s1  ;;  %531 = vrot.lane.b32.xlu1 %v498_v44, %s907_s1  ;;  %v730_v59 = vpack.c.bf16 %v401_v6, %v401_v6  ;;  %v389_v60 = vsel %vm245_vm4, %v869_v30, %v373_v50  ;;  %v329_v33 = vadd.f32 1.0, %v1298_v55  ;;  %v316_v0 = vmul.f32 1.442695, %v286_v15 }
  0xa9   :  { %v875_v63 = vpop.eup %874  ;;  %484 = vst.msk [vmem:[%s1586_s4 + $0xc] sm:$0xf] %vm480_vm10, %v732_v51  ;;  %v500_v37 = vsub.f32 1.0, %v387_v27  ;;  %v388_v19 = vsel %vm244_vm5, %v871_v45, %v372_v58  ;;  %v405_v5 = vmul.f32 %v389_v60, %v984_v25  ;;  %v287_v12 = vsel %vm255_vm0, %v271_v47, %v1239_v23 }
  0xaa   :  { %v877_v24 = vpop.eup %876  ;;  %482 = vst.msk [vmem:[%s1586_s4 + $0x4] sm:$0xf] %vm480_vm10, %v730_v59  ;;  %v501_v1 = vsub.f32 1.0, %v388_v19  ;;  %v404_v11 = vmul.f32 %v388_v19, %v990_v28  ;;  %v375_v4 = vmul.f32 %v875_v63, %v1243_v43  ;;  %888 = vrcp.f32 %v329_v33 }
  0xab   :  { %v879_v9 = vpop.eup %878  ;;  %v734_v20 = vpack.c.bf16 %v405_v5, %v405_v5  ;;  %v330_v7 = vadd.f32 1.0, %v877_v24  ;;  %890 = vpow2.f32 %v316_v0  ;;  %v318_v27 = vmul.f32 1.442695, %v287_v12 }
  0xac   :  { %v881_v13 = vpop.eup %880  ;;  %535 = vrot.lane.b32.xlu1 %v500_v37, %s907_s1  ;;  %537 = vrot.lane.b32.xlu0 %v501_v1, %s907_s1  ;;  %v733_v29 = vpack.c.bf16 %v404_v11, %v404_v11  ;;  %v391_v43 = vsel %vm247_vm6, %v875_v63, %v375_v4  ;;  %v331_v22 = vadd.f32 1.0, %v879_v9  ;;  %v502_v36 = vsub.f32 1.0, %v389_v60 }
  0xad   :  { %v883_v26 = vpop.eup %882  ;;  %486 = vst.msk [vmem:[%s1586_s4 + $0x14] sm:$0xf] %vm480_vm10, %v734_v20  ;;  %v374_v48 = vmul.f32 %v881_v13, %v1258_v53  ;;  %v407_v47 = vmul.f32 %v391_v43, %v999_v32  ;;  %892 = vrcp.f32 %v330_v7  ;;  %v504_v50 = vsub.f32 1.0, %v391_v43 }
  0xae   :  { %485 = vst.msk [vmem:[%s1586_s4 + $0x10] sm:$0xf] %vm480_vm10, %v733_v29  ;;  %894 = vrcp.f32 %v331_v22  ;;  %v332_v30 = vadd.f32 1.0, %v883_v26  ;;  %vm657_vm1 = vcmask 60448   ;;  %vm674_vm2 = vcmask 1043520  }
  0xaf   :  { %v390_v31 = vsel %vm246_vm7, %v881_v13, %v374_v48  ;;  %v736_v8 = vpack.c.bf16 %v407_v47, %v407_v47  ;;  %896 = vpow2.f32 %v318_v27 }
  0xb0   :  { %v885_v40 = vpop.eup %884  ;;  %539 = vrot.lane.b32.xlu1 %v502_v36, %s907_s1  ;;  %v503_v53 = vsub.f32 1.0, %v390_v31  ;;  %v406_v45 = vmul.f32 %v390_v31, %v1005_v35  ;;  %898 = vrcp.f32 %v332_v30 }
  0xb1   :  { %v887_v44 = vpop.eup %886  ;;  %488 = vst.msk [vmem:[%s1586_s4 + $0x1c] sm:$0xf] %vm480_vm10, %v736_v8  ;;  %v376_v6 = vmul.f32 %v885_v40, %v1274_v10 }
  0xb2   :  { %541 = vrot.lane.b32.xlu0 %v503_v53, %s907_s1  ;;  %v735_v41 = vpack.c.bf16 %v406_v45, %v406_v45  ;;  %v333_v51 = vadd.f32 1.0, %v887_v44 }
  0xb3   :  { %v392_v58 = vsel %vm248_vm8, %v885_v40, %v376_v6 }
  0xb4   :  { %v889_v15 = vpop.eup %888  ;;  %487 = vst.msk [vmem:[%s1586_s4 + $0x18] sm:$0xf] %vm480_vm10, %v735_v41  ;;  %543 = vrot.lane.b32.xlu1 %v504_v50, %s907_s1  ;;  %v505_v59 = vsub.f32 1.0, %v392_v58  ;;  %v408_v60 = vmul.f32 %v392_v58, %v1020_v42  ;;  %900 = vrcp.f32 %v333_v51 }
  0xb5   :  { %v891_v10 = vpop.eup %890  ;;  %v377_v33 = vmul.f32 %v889_v15, %v1298_v55 }
  0xb6   :  { %545 = vrot.lane.b32.xlu0 %v505_v59, %s907_s1  ;;  %v737_v0 = vpack.c.bf16 %v408_v60, %v408_v60  ;;  %v334_v2 = vadd.f32 1.0, %v891_v10 }
  0xb7   :  { %v893_v63 = vpop.eup %892  ;;  %v393_v37 = vsel %vm249_vm9, %v889_v15, %v377_v33 }
  0xb8   :  { %v895_v19 = vpop.eup %894  ;;  %489 = vst.msk [vmem:[%s1586_s4 + $0x20] sm:$0xf] %vm480_vm10, %v737_v0  ;;  %v409_v5 = vmul.f32 %v393_v37, %v1014_v39  ;;  %v506_v1 = vsub.f32 1.0, %v393_v37  ;;  %v378_v11 = vmul.f32 %v893_v63, %v877_v24  ;;  %902 = vrcp.f32 %v334_v2 }
  0xb9   :  { %v897_v55 = vpop.eup %896  ;;  %v379_v4 = vmul.f32 %v895_v19, %v879_v9  ;;  %v908_v37 = vmov 0  }
  0xba   :  { %v899_v20 = vpop.eup %898  ;;  %v738_v7 = vpack.c.bf16 %v409_v5, %v409_v5  ;;  %547 = vrot.lane.b32.xlu1 %v506_v1, %s907_s1  ;;  %v394_v61 = vsel %vm250_vm11, %v893_v63, %v378_v11  ;;  %v335_v12 = vadd.f32 1.0, %v897_v55 }
  0xbb   :  { %v507_v13 = vsub.f32 1.0, %v394_v61  ;;  %v410_v29 = vmul.f32 %v394_v61, %v1035_v49  ;;  %v395_v43 = vsel %vm251_vm12, %v895_v19, %v379_v4  ;;  %v380_v22 = vmul.f32 %v899_v20, %v883_v26 }
  0xbc   :  { %490 = vst.msk [vmem:[%s1586_s4 + $0x24] sm:$0xf] %vm480_vm10, %v738_v7  ;;  %v411_v24 = vmul.f32 %v395_v43, %v1029_v46  ;;  %v508_v9 = vsub.f32 1.0, %v395_v43  ;;  %904 = vrcp.f32 %v335_v12 }
  0xbd   :  { %549 = vrot.lane.b32.xlu0 %v507_v13, %s907_s1  ;;  %v739_v14 = vpack.c.bf16 %v410_v29, %v410_v29  ;;  %v396_v27 = vsel %vm252_vm13, %v899_v20, %v380_v22 }
  0xbe   :  { %v901_v48 = vpop.eup %900  ;;  %v740_v47 = vpack.c.bf16 %v411_v24, %v411_v24  ;;  %551 = vrot.lane.b32.xlu1 %v508_v9, %s907_s1  ;;  %v509_v34 = vsub.f32 1.0, %v396_v27  ;;  %v412_v26 = vmul.f32 %v396_v27, %v1047_v54 }
  0xbf   :  { %491 = vst.msk [vmem:[%s1586_s4 + $0x28] sm:$0xf] %vm480_vm10, %v739_v14  ;;  %v381_v36 = vmul.f32 %v901_v48, %v887_v44 }
  0xc0   :  { %492 = vst.msk [vmem:[%s1586_s4 + $0x2c] sm:$0xf] %vm480_vm10, %v740_v47  ;;  %v741_v3 = vpack.c.bf16 %v412_v26, %v412_v26 }
  0xc1   :  { %553 = vrot.lane.b32.xlu0 %v509_v34, %s907_s1  ;;  %v397_v30 = vsel %vm253_vm14, %v901_v48, %v381_v36 }
  0xc2   :  { %v903_v31 = vpop.eup %902  ;;  %493 = vst.msk [vmem:[%s1586_s4 + $0x30] sm:$0xf] %vm480_vm10, %v741_v3  ;;  %v413_v8 = vmul.f32 %v397_v30, %v1041_v52  ;;  %v510_v40 = vsub.f32 1.0, %v397_v30 }
  0xc3   :  { %v382_v53 = vmul.f32 %v903_v31, %v891_v10 }
  0xc4   :  { %v742_v45 = vpack.c.bf16 %v413_v8, %v413_v8  ;;  %555 = vrot.lane.b32.xlu1 %v510_v40, %s907_s1 }
  0xc5   :  { %v398_v44 = vsel %vm254_vm15, %v903_v31, %v382_v53 }
  0xc6   :  { %v905_v6 = vpop.eup %904  ;;  %494 = vst.msk [vmem:[%s1586_s4 + $0x34] sm:$0xf] %vm480_vm10, %v742_v45  ;;  %v511_v62 = vsub.f32 1.0, %v398_v44  ;;  %v414_v41 = vmul.f32 %v398_v44, %v1058_v57 }
  0xc7   :  { %v383_v50 = vmul.f32 %v905_v6, %v897_v55 }
  0xc8   :  { %557 = vrot.lane.b32.xlu0 %v511_v62, %s907_s1  ;;  %v743_v51 = vpack.c.bf16 %v414_v41, %v414_v41 }
  0xc9   :  { %v399_v58 = vsel %vm255_vm0, %v905_v6, %v383_v50 }
  0xca   :  { %495 = vst.msk [vmem:[%s1586_s4 + $0x38] sm:$0xf] %vm480_vm10, %v743_v51  ;;  %v415_v38 = vmul.f32 %v399_v58, %v1053_v56  ;;  %v512_v15 = vsub.f32 1.0, %v399_v58 }
  0xcc   :  { %v744_v59 = vpack.c.bf16 %v415_v38, %v415_v38  ;;  %559 = vrot.lane.b32.xlu1 %v512_v15, %s907_s1 }
  0xce   :  { %496 = vst.msk [vmem:[%s1586_s4 + $0x3c] sm:$0xf] %vm480_vm10, %v744_v59 }
 0x116   :  { %v530_v60 = vpop.permute.xlu0 %529 }
 0x117   :  { %v577_v23 = vmul.f32 %v530_v60, %v964_v17 }
 0x119   :  { %v745_v10 = vpack.c.bf16 %v577_v23, %v577_v23 }
 0x11a   :  { %v532_v33 = vpop.permute.xlu1 %531  ;;  %v534_v0 = vpop.permute.xlu0 %533 }
 0x11b   :  { %658 = vst.msk [vmem:[%s1586_s4] sm:$0xf] %vm657_vm1, %v745_v10  ;;  %v578_v2 = vmul.f32 %v532_v33, %v975_v21  ;;  %v579_v63 = vmul.f32 %v534_v0, %v961_v16 }
 0x11c   :  { %675 = vst.msk [vmem:[%s1586_s4] sm:$0xf] %vm674_vm2, %v908_v37 }
 0x11d   :  { %v746_v17 = vpack.c.bf16 %v578_v2, %v578_v2  ;;  %v747_v19 = vpack.c.bf16 %v579_v63, %v579_v63 }
 0x11e   :  { %v536_v5 = vpop.permute.xlu1 %535  ;;  %v538_v1 = vpop.permute.xlu0 %537 }
 0x11f   :  { %659 = vst.msk [vmem:[%s1586_s4 + $0x4] sm:$0xf] %vm657_vm1, %v746_v17  ;;  %660 = vst.msk [vmem:[%s1586_s4 + $0x8] sm:$0xf] %vm657_vm1, %v747_v19  ;;  %v580_v16 = vmul.f32 %v536_v5, %v969_v18  ;;  %v581_v21 = vmul.f32 %v538_v1, %v990_v28 }
 0x120   :  { %676 = vst.msk [vmem:[%s1586_s4 + $0x4] sm:$0xf] %vm674_vm2, %v908_v37  ;;  %677 = vst.msk [vmem:[%s1586_s4 + $0x8] sm:$0xf] %vm674_vm2, %v908_v37 }
 0x121   :  { %v748_v11 = vpack.c.bf16 %v580_v16, %v580_v16  ;;  %v749_v55 = vpack.c.bf16 %v581_v21, %v581_v21 }
 0x122   :  { %v540_v4 = vpop.permute.xlu1 %539 }
 0x123   :  { %661 = vst.msk [vmem:[%s1586_s4 + $0xc] sm:$0xf] %vm657_vm1, %v748_v11  ;;  %662 = vst.msk [vmem:[%s1586_s4 + $0x10] sm:$0xf] %vm657_vm1, %v749_v55  ;;  %v582_v18 = vmul.f32 %v540_v4, %v984_v25 }
 0x124   :  { %678 = vst.msk [vmem:[%s1586_s4 + $0xc] sm:$0xf] %vm674_vm2, %v908_v37  ;;  %679 = vst.msk [vmem:[%s1586_s4 + $0x10] sm:$0xf] %vm674_vm2, %v908_v37  ;;  %v542_v28 = vpop.permute.xlu0 %541 }
 0x125   :  { %v750_v20 = vpack.c.bf16 %v582_v18, %v582_v18  ;;  %v583_v7 = vmul.f32 %v542_v28, %v1005_v35 }
 0x126   :  { %v544_v61 = vpop.permute.xlu1 %543 }
 0x127   :  { %663 = vst.msk [vmem:[%s1586_s4 + $0x14] sm:$0xf] %vm657_vm1, %v750_v20  ;;  %v751_v25 = vpack.c.bf16 %v583_v7, %v583_v7  ;;  %v584_v12 = vmul.f32 %v544_v61, %v999_v32 }
 0x128   :  { %680 = vst.msk [vmem:[%s1586_s4 + $0x14] sm:$0xf] %vm674_vm2, %v908_v37  ;;  %v546_v13 = vpop.permute.xlu0 %545 }
 0x129   :  { %664 = vst.msk [vmem:[%s1586_s4 + $0x18] sm:$0xf] %vm657_vm1, %v751_v25  ;;  %v752_v35 = vpack.c.bf16 %v584_v12, %v584_v12  ;;  %v585_v29 = vmul.f32 %v546_v13, %v1020_v42 }
 0x12a   :  { %681 = vst.msk [vmem:[%s1586_s4 + $0x18] sm:$0xf] %vm674_vm2, %v908_v37 }
 0x12b   :  { %665 = vst.msk [vmem:[%s1586_s4 + $0x1c] sm:$0xf] %vm657_vm1, %v752_v35  ;;  %v753_v32 = vpack.c.bf16 %v585_v29, %v585_v29 }
 0x12c   :  { %682 = vst.msk [vmem:[%s1586_s4 + $0x1c] sm:$0xf] %vm674_vm2, %v908_v37  ;;  %v548_v43 = vpop.permute.xlu1 %547 }
 0x12d   :  { %666 = vst.msk [vmem:[%s1586_s4 + $0x20] sm:$0xf] %vm657_vm1, %v753_v32  ;;  %v586_v42 = vmul.f32 %v548_v43, %v1014_v39 }
 0x12e   :  { %683 = vst.msk [vmem:[%s1586_s4 + $0x20] sm:$0xf] %vm674_vm2, %v908_v37 }
 0x12f   :  { %v754_v22 = vpack.c.bf16 %v586_v42, %v586_v42  ;;  %v550_v24 = vpop.permute.xlu0 %549 }
 0x130   :  { %v587_v9 = vmul.f32 %v550_v24, %v1035_v49  ;;  %v552_v14 = vpop.permute.xlu1 %551 }
 0x131   :  { %667 = vst.msk [vmem:[%s1586_s4 + $0x24] sm:$0xf] %vm657_vm1, %v754_v22  ;;  %v588_v27 = vmul.f32 %v552_v14, %v1029_v46 }
 0x132   :  { %684 = vst.msk [vmem:[%s1586_s4 + $0x24] sm:$0xf] %vm674_vm2, %v908_v37  ;;  %v755_v39 = vpack.c.bf16 %v587_v9, %v587_v9 }
 0x133   :  { %v756_v48 = vpack.c.bf16 %v588_v27, %v588_v27  ;;  %v554_v47 = vpop.permute.xlu0 %553 }
 0x134   :  { %668 = vst.msk [vmem:[%s1586_s4 + $0x28] sm:$0xf] %vm657_vm1, %v755_v39  ;;  %v589_v49 = vmul.f32 %v554_v47, %v1047_v54 }
 0x135   :  { %685 = vst.msk [vmem:[%s1586_s4 + $0x28] sm:$0xf] %vm674_vm2, %v908_v37 }
 0x136   :  { %669 = vst.msk [vmem:[%s1586_s4 + $0x2c] sm:$0xf] %vm657_vm1, %v756_v48  ;;  %v757_v46 = vpack.c.bf16 %v589_v49, %v589_v49  ;;  %v556_v34 = vpop.permute.xlu1 %555 }
 0x137   :  { %686 = vst.msk [vmem:[%s1586_s4 + $0x2c] sm:$0xf] %vm674_vm2, %v908_v37  ;;  %v590_v54 = vmul.f32 %v556_v34, %v1041_v52 }
 0x138   :  { %670 = vst.msk [vmem:[%s1586_s4 + $0x30] sm:$0xf] %vm657_vm1, %v757_v46 }
 0x139   :  { %687 = vst.msk [vmem:[%s1586_s4 + $0x30] sm:$0xf] %vm674_vm2, %v908_v37  ;;  %v758_v26 = vpack.c.bf16 %v590_v54, %v590_v54 }
 0x13a   :  { %v558_v36 = vpop.permute.xlu0 %557 }
 0x13b   :  { %671 = vst.msk [vmem:[%s1586_s4 + $0x34] sm:$0xf] %vm657_vm1, %v758_v26  ;;  %v591_v52 = vmul.f32 %v558_v36, %v1058_v57 }
 0x13c   :  { %688 = vst.msk [vmem:[%s1586_s4 + $0x34] sm:$0xf] %vm674_vm2, %v908_v37 }
 0x13d   :  { %v759_v3 = vpack.c.bf16 %v591_v52, %v591_v52 }
 0x13e   :  { %v560_v30 = vpop.permute.xlu1 %559 }
 0x13f   :  { %672 = vst.msk [vmem:[%s1586_s4 + $0x38] sm:$0xf] %vm657_vm1, %v759_v3  ;;  %v592_v31 = vmul.f32 %v560_v30, %v1053_v56 }
 0x140   :  { %689 = vst.msk [vmem:[%s1586_s4 + $0x38] sm:$0xf] %vm674_vm2, %v908_v37 }
 0x141   :  { %v760_v57 = vpack.c.bf16 %v592_v31, %v592_v31 }
 0x143   :  { %673 = vst.msk [vmem:[%s1586_s4 + $0x3c] sm:$0xf] %vm657_vm1, %v760_v57 }
 0x144   :  { %690 = vst.msk [vmem:[%s1586_s4 + $0x3c] sm:$0xf] %vm674_vm2, %v908_v37 }

// kernel: basic_block_forward.8
= control target key start
LH: loop header
LB: loop body
LE: loop exit
PB: predicated region body
PF: predicated region fallthrough
CT: control target
= control target key end

     0   :  { %s670_s1 = inlined_call_operand.vmem [shape: bf16[128,128], index: 1, kind: input, shape index: {}]   ;;  %s671_s0 = inlined_call_operand.vmem [shape: bf16[128,128], index: 0, kind: input, shape index: {}]   ;;  %s672_s2 = inlined_call_operand.vmem [shape: bf16[128,128], index: 2, kind: output, shape index: {}]  }
   0x1   :  { %v567_v0 = vld [vmem:[%s670_s1] sm:$0xff]   ;;  %v568_v1 = vld [vmem:[%s670_s1 + $0x8] sm:$0xff]   ;;  %v569_v2 = vld [vmem:[%s670_s1 + $0x10] sm:$0xff]  }
   0x2   :  { %519 = vmatprep.subr.bf16.mxu0 %v567_v0  ;;  %551 = vmatprep.subr.bf16.mxu1 %v567_v0  ;;  %v570_v3 = vld [vmem:[%s670_s1 + $0x18] sm:$0xff]   ;;  %v575_v4 = vld [vmem:[%s671_s0] sm:$0xff]   ;;  %v572_v7 = vld [vmem:[%s670_s1 + $0x28] sm:$0xff]  }
   0x3   :  { %520 = vmatpush3.bf16.msra.mxu0 %v567_v0  ;;  %559 = vmatpush3.bf16.msra.mxu1 %v567_v0  ;;  %v576_v5 = vld [vmem:[%s671_s0 + $0x20] sm:$0xff]   ;;  %v573_v8 = vld [vmem:[%s670_s1 + $0x30] sm:$0xff]   ;;  %v574_v9 = vld [vmem:[%s670_s1 + $0x38] sm:$0xff]  }
   0x4   :  { %521 = vmatprep.subr.bf16.mxu0 %v568_v1  ;;  %552 = vmatprep.subr.bf16.mxu1 %v568_v1  ;;  %v571_v6 = vld [vmem:[%s670_s1 + $0x20] sm:$0xff]   ;;  %v577_v10 = vld [vmem:[%s671_s0 + $0x8] sm:$0xff]   ;;  %v579_v12 = vld [vmem:[%s671_s0 + $0x10] sm:$0xff]  }
   0x5   :  { %535 = vmatprep.mubr.bf16.mxu0 %v575_v4  ;;  %543 = vmatprep.mubr.bf16.mxu1 %v576_v5  ;;  %v578_v11 = vld [vmem:[%s671_s0 + $0x28] sm:$0xff]   ;;  %v580_v13 = vld [vmem:[%s671_s0 + $0x30] sm:$0xff]   ;;  %v581_v14 = vld [vmem:[%s671_s0 + $0x18] sm:$0xff]  }
   0x6   :  { %v582_v15 = vld [vmem:[%s671_s0 + $0x38] sm:$0xff]  }
   0x7   :  { %522 = vmatpush3.bf16.msra.mxu0 %v568_v1  ;;  %560 = vmatpush3.bf16.msra.mxu1 %v568_v1 }
   0x8   :  { %523 = vmatprep.subr.bf16.mxu0 %v569_v2  ;;  %553 = vmatprep.subr.bf16.mxu1 %v569_v2 }
   0xb   :  { %524 = vmatpush3.bf16.msra.mxu0 %v569_v2  ;;  %561 = vmatpush3.bf16.msra.mxu1 %v569_v2 }
   0xc   :  { %525 = vmatprep.subr.bf16.mxu0 %v570_v3  ;;  %554 = vmatprep.subr.bf16.mxu1 %v570_v3 }
   0xf   :  { %526 = vmatpush3.bf16.msra.mxu0 %v570_v3  ;;  %562 = vmatpush3.bf16.msra.mxu1 %v570_v3 }
  0x10   :  { %527 = vmatprep.subr.bf16.mxu0 %v571_v6  ;;  %555 = vmatprep.subr.bf16.mxu1 %v571_v6 }
  0x13   :  { %528 = vmatpush3.bf16.msra.mxu0 %v571_v6  ;;  %563 = vmatpush3.bf16.msra.mxu1 %v571_v6 }
  0x14   :  { %529 = vmatprep.subr.bf16.mxu0 %v572_v7  ;;  %556 = vmatprep.subr.bf16.mxu1 %v572_v7 }
  0x17   :  { %530 = vmatpush3.bf16.msra.mxu0 %v572_v7  ;;  %564 = vmatpush3.bf16.msra.mxu1 %v572_v7 }
  0x18   :  { %531 = vmatprep.subr.bf16.mxu0 %v573_v8  ;;  %557 = vmatprep.subr.bf16.mxu1 %v573_v8 }
  0x1b   :  { %532 = vmatpush3.bf16.msra.mxu0 %v573_v8  ;;  %565 = vmatpush3.bf16.msra.mxu1 %v573_v8 }
  0x1c   :  { %533 = vmatprep.subr.bf16.mxu0 %v574_v9  ;;  %558 = vmatprep.subr.bf16.mxu1 %v574_v9 }
  0x1f   :  { %534 = vmatpush3.bf16.msra.mxu0 %v574_v9  ;;  %566 = vmatpush3.bf16.msra.mxu1 %v574_v9 }
  0x22   :  { %536 = vmatmul.mubr.bf16.vlgmr.msra.gmra.mrb[0].mxu0 %v577_v10  ;;  %544 = vmatmul.mubr.bf16.vlgmr.msra.gmra.mrb[0].mxu1 %v578_v11 }
  0x23   :  { %539 = vmatprep.mubr.bf16.mxu0 %v579_v12  ;;  %547 = vmatprep.mubr.bf16.mxu1 %v580_v13 }
  0x2a   :  { %540 = vmatmul.mubr.bf16.gmra.mrb[4].mxu0 %v581_v14  ;;  %548 = vmatmul.mubr.bf16.gmra.mrb[4].mxu1 %v582_v15 }
  0xf5   :  { %v537_v16 = vpop.f32.mrb[0].mxu0  ;;  %v545_v17 = vpop.f32.mrb[0].mxu1 }
  0xf6   :  { %v210_v18 = vpop.f32.mrb[1].mxu0  ;;  %v242_v19 = vpop.f32.mrb[1].mxu1 }
  0xf7   :  { %v538_v20 = vpop.f32.mrb[2].mxu0  ;;  %v546_v21 = vpop.f32.mrb[2].mxu1 }
  0xf8   :  { %v464_v22 = vpack.c.bf16 %v538_v20, %v537_v16  ;;  %v484_v23 = vpack.c.bf16 %v546_v21, %v545_v17  ;;  %v213_v24 = vpop.f32.mrb[3].mxu0  ;;  %v245_v25 = vpop.f32.mrb[3].mxu1 }
  0xf9   :  { %v459_v26 = vpack.c.bf16 %v213_v24, %v210_v18  ;;  %v479_v27 = vpack.c.bf16 %v245_v25, %v242_v19 }
  0xfa   :  { %496 = vst [vmem:[%s672_s2 + $0x8] sm:$0xff] %v464_v22   ;;  %500 = vst [vmem:[%s672_s2 + $0x28] sm:$0xff] %v484_v23  }
  0xfb   :  { %460 = vst [vmem:[%s672_s2] sm:$0xff] %v459_v26   ;;  %499 = vst [vmem:[%s672_s2 + $0x20] sm:$0xff] %v479_v27  }
  0xfd   :  { %v541_v28 = vpop.f32.mrb[4].mxu0  ;;  %v549_v29 = vpop.f32.mrb[4].mxu1 }
  0xfe   :  { %v226_v30 = vpop.f32.mrb[5].mxu0  ;;  %v258_v31 = vpop.f32.mrb[5].mxu1 }
  0xff   :  { %v542_v32 = vpop.f32.mrb[6].mxu0  ;;  %v550_v33 = vpop.f32.mrb[6].mxu1 }
 0x100   :  { %v474_v34 = vpack.c.bf16 %v542_v32, %v541_v28  ;;  %v494_v35 = vpack.c.bf16 %v550_v33, %v549_v29  ;;  %v229_v36 = vpop.f32.mrb[7].mxu0  ;;  %v261_v37 = vpop.f32.mrb[7].mxu1 }
 0x101   :  { %v469_v38 = vpack.c.bf16 %v229_v36, %v226_v30  ;;  %v489_v39 = vpack.c.bf16 %v261_v37, %v258_v31 }
 0x102   :  { %498 = vst [vmem:[%s672_s2 + $0x18] sm:$0xff] %v474_v34   ;;  %502 = vst [vmem:[%s672_s2 + $0x38] sm:$0xff] %v494_v35  }
 0x103   :  { %497 = vst [vmem:[%s672_s2 + $0x10] sm:$0xff] %v469_v38   ;;  %501 = vst [vmem:[%s672_s2 + $0x30] sm:$0xff] %v489_v39  }

// kernel: basic_block_forward.9
= control target key start
LH: loop header
LB: loop body
LE: loop exit
PB: predicated region body
PF: predicated region fallthrough
CT: control target
= control target key end

     0   :  { %s1588_s12 = smov 0   ;;  %s1590_s13 = smov 0   ;;  %s1847_s0 = inlined_call_operand.vmem [shape: bf16[128,1152], index: 0, kind: input, shape index: {}]   ;;  %s1848_s1 = inlined_call_operand.vmem [shape: bf16[1152,128], index: 1, kind: input, shape index: {}]   ;;  %s1849_s2 = inlined_call_operand.vmem [shape: bf16[128,128], index: 2, kind: input, shape index: {}]   ;;  %s1850_s3 = inlined_call_operand.vmem [shape: f32[128,128], index: 3, kind: output, shape index: {}]  }
   0x1   :  { %s1592_s14 = smov 0   ;;  %s1594_s15 = smov 0  }
   0x2   :  { %s1596_s16 = smov 0  }
   0x3 LB: > { %s25_s17 = sadd.s32 1, %s1561_s15  ;;  %p48_p1 = scmp.ne.s32.totalorder %s1553_s13, %s1549_s12  ;;  %s1565_s16 = sphi %s1596_s16, %s13_s16   ;;  %s1561_s15 = sphi %s1594_s15, %s1854_s15   ;;  %s1557_s14 = sphi %s1592_s14, %s1853_s14   ;;  %s1553_s13 = sphi %s1590_s13, %s1852_s13   ;;  %s1549_s12 = sphi %s1588_s12, %s1851_s12  }
   0x4   : > { %p26_p0 = scmp.ge.s32.totalorder %s25_s17, 3  ;;  %p49_p2 = scmp.eq.s32.totalorder %s1565_s16, 0 }
   0x5   : > { %s41_s19 = sadd.s32 1, %s1553_s13  ;;  %p1186_p5 = scmp.ge.s32.totalorder %s1565_s16, 3 }
   0x6   : > { %s1856_s17 = smov (%p26_p0, %s25_s17), 0  ;;  %p50_p3 = por %p49_p2, %p48_p1 }
   0x7   : > { %s37_s18 = ssub.s32 %s1561_s15, %s1856_s17  ;;  %170 = sbr.rel (%p1186_p5) target bundleno = 37 (0x25), region = 20 }
   0x8   : > { %p39_p4 = scmp.eq.s32.totalorder %s37_s18, 0 }
   0xa   : > { %s1623_s20 = scalar_select %p39_p4, %s1553_s13, %s41_s19  }
   0xe   : > { %173 = sbr.rel (!%p50_p3) target bundleno = 37 (0x25), region = 24  ;;  %s175_s21 = sand.u32 (%p50_p3), 1, %s1553_s13  }
   0xf   : > { %s1276_s22 = smul.u32 (%p50_p3), 12, %s1561_s15 }
  0x10   : > { %s1428_s23 = smul.u32 (%p50_p3), 192, %s175_s21 }
  0x11   : > { %s1631_s26 = scalar_lea.vmem (%p50_p3), %s1847_s0, %s1276_s22 }
  0x12   : > { %v198_v0 = vld [vmem:[%s1631_s26] sm:$0xff] (%p50_p3)  ;;  %v202_v2 = vld [vmem:[%s1631_s26 + $0x48] sm:$0xff] (%p50_p3)  ;;  %s1636_s27 = scalar_lea.vmem (%p50_p3), [#allocation3], %s1428_s23  ;;  %v206_v4 = vld [vmem:[%s1631_s26 + $0x90] sm:$0xff] (%p50_p3) }
  0x13   : > { %v200_v1 = vld [vmem:[%s1631_s26 + $0x24] sm:$0xff] (%p50_p3)  ;;  %199 = vst [vmem:[%s1636_s27] sm:$0xff] (%p50_p3), %v198_v0  ;;  %203 = vst [vmem:[%s1636_s27 + $0x18] sm:$0xff] (%p50_p3), %v202_v2  ;;  %v204_v3 = vld [vmem:[%s1631_s26 + $0x6c] sm:$0xff] (%p50_p3) }
  0x14   : > { %201 = vst [vmem:[%s1636_s27 + $0xc] sm:$0xff] (%p50_p3), %v200_v1  ;;  %v208_v5 = vld [vmem:[%s1631_s26 + $0xb4] sm:$0xff] (%p50_p3)  ;;  %205 = vst [vmem:[%s1636_s27 + $0x24] sm:$0xff] (%p50_p3), %v204_v3  ;;  %v212_v7 = vld [vmem:[%s1631_s26 + $0xfc] sm:$0xff] (%p50_p3) }
  0x15   : > { %207 = vst [vmem:[%s1636_s27 + $0x30] sm:$0xff] %v206_v4  ;;  %209 = vst [vmem:[%s1636_s27 + $0x3c] sm:$0xff] %v208_v5  ;;  %v210_v6 = vld [vmem:[%s1631_s26 + $0xd8] sm:$0xff]  ;;  %v214_v8 = vld [vmem:[%s1631_s26 + $0x120] sm:$0xff] }
  0x16   : > { %211 = vst [vmem:[%s1636_s27 + $0x48] sm:$0xff] %v210_v6  ;;  %213 = vst [vmem:[%s1636_s27 + $0x54] sm:$0xff] %v212_v7  ;;  %v216_v9 = vld [vmem:[%s1631_s26 + $0x144] sm:$0xff]  ;;  %v220_v11 = vld [vmem:[%s1631_s26 + $0x18c] sm:$0xff] }
  0x17   : > { %215 = vst [vmem:[%s1636_s27 + $0x60] sm:$0xff] %v214_v8  ;;  %v218_v10 = vld [vmem:[%s1631_s26 + $0x168] sm:$0xff]  ;;  %217 = vst [vmem:[%s1636_s27 + $0x6c] sm:$0xff] %v216_v9  ;;  %v222_v12 = vld [vmem:[%s1631_s26 + $0x1b0] sm:$0xff] }
  0x18   : > { %219 = vst [vmem:[%s1636_s27 + $0x78] sm:$0xff] %v218_v10  ;;  %221 = vst [vmem:[%s1636_s27 + $0x84] sm:$0xff] %v220_v11  ;;  %v224_v13 = vld [vmem:[%s1631_s26 + $0x1d4] sm:$0xff]  ;;  %v228_v15 = vld [vmem:[%s1631_s26 + $0x21c] sm:$0xff] }
  0x19   : > { %v226_v14 = vld [vmem:[%s1631_s26 + $0x1f8] sm:$0xff]  ;;  %223 = vst [vmem:[%s1636_s27 + $0x90] sm:$0xff] %v222_v12  ;;  %225 = vst [vmem:[%s1636_s27 + $0x9c] sm:$0xff] %v224_v13  ;;  %v1188_v16 = vld [vmem:[%s1631_s26 + $0x8] sm:$0xf] }
  0x1a   : > { %227 = vst [vmem:[%s1636_s27 + $0xa8] sm:$0xff] %v226_v14  ;;  %v1190_v17 = vld [vmem:[%s1631_s26 + $0x2c] sm:$0xf]  ;;  %229 = vst [vmem:[%s1636_s27 + $0xb4] sm:$0xff] %v228_v15  ;;  %v1192_v18 = vld [vmem:[%s1631_s26 + $0x50] sm:$0xf] }
  0x1b   : > { %1189 = vst [vmem:[%s1636_s27 + $0x8] sm:$0xf] %v1188_v16  ;;  %1191 = vst [vmem:[%s1636_s27 + $0x14] sm:$0xf] %v1190_v17  ;;  %v1194_v19 = vld [vmem:[%s1631_s26 + $0x74] sm:$0xf] }
  0x1c   : > { %v1196_v20 = vld [vmem:[%s1631_s26 + $0x98] sm:$0xf]  ;;  %1193 = vst [vmem:[%s1636_s27 + $0x20] sm:$0xf] %v1192_v18  ;;  %1195 = vst [vmem:[%s1636_s27 + $0x2c] sm:$0xf] %v1194_v19 }
  0x1d   : > { %1197 = vst [vmem:[%s1636_s27 + $0x38] sm:$0xf] %v1196_v20  ;;  %v1198_v21 = vld [vmem:[%s1631_s26 + $0xbc] sm:$0xf]  ;;  %v1200_v22 = vld [vmem:[%s1631_s26 + $0xe0] sm:$0xf] }
  0x1e   : > { %v1202_v23 = vld [vmem:[%s1631_s26 + $0x104] sm:$0xf]  ;;  %1199 = vst [vmem:[%s1636_s27 + $0x44] sm:$0xf] %v1198_v21  ;;  %1201 = vst [vmem:[%s1636_s27 + $0x50] sm:$0xf] %v1200_v22 }
  0x1f   : > { %1203 = vst [vmem:[%s1636_s27 + $0x5c] sm:$0xf] %v1202_v23  ;;  %v1204_v24 = vld [vmem:[%s1631_s26 + $0x128] sm:$0xf]  ;;  %v1206_v25 = vld [vmem:[%s1631_s26 + $0x14c] sm:$0xf] }
  0x20   : > { %v1208_v26 = vld [vmem:[%s1631_s26 + $0x170] sm:$0xf]  ;;  %1205 = vst [vmem:[%s1636_s27 + $0x68] sm:$0xf] %v1204_v24  ;;  %1207 = vst [vmem:[%s1636_s27 + $0x74] sm:$0xf] %v1206_v25 }
  0x21   : > { %1209 = vst [vmem:[%s1636_s27 + $0x80] sm:$0xf] %v1208_v26  ;;  %v1210_v27 = vld [vmem:[%s1631_s26 + $0x194] sm:$0xf]  ;;  %v1212_v28 = vld [vmem:[%s1631_s26 + $0x1b8] sm:$0xf] }
  0x22   : > { %v1214_v29 = vld [vmem:[%s1631_s26 + $0x1dc] sm:$0xf]  ;;  %1211 = vst [vmem:[%s1636_s27 + $0x8c] sm:$0xf] %v1210_v27  ;;  %1213 = vst [vmem:[%s1636_s27 + $0x98] sm:$0xf] %v1212_v28 }
  0x23   : > { %1215 = vst [vmem:[%s1636_s27 + $0xa4] sm:$0xf] %v1214_v29  ;;  %v1216_v30 = vld [vmem:[%s1631_s26 + $0x200] sm:$0xf]  ;;  %v1218_v31 = vld [vmem:[%s1631_s26 + $0x224] sm:$0xf] }
  0x24   : > { %1217 = vst [vmem:[%s1636_s27 + $0xb0] sm:$0xf] %v1216_v30  ;;  %1219 = vst [vmem:[%s1636_s27 + $0xbc] sm:$0xf] %v1218_v31 }
  0x25 PF: > { %p1220_p6 = scmp.ge.s32.totalorder %s1565_s16, 1  ;;  %p285_p7 = scmp.lt.s32.totalorder %s1565_s16, 4 }
  0x27   : > { %p286_p8 = pnand %p1220_p6, %p285_p7 }
  0x28   : > { %s292_s28 = sand.u32 (!%p286_p8), 1, %s1549_s12   ;;  %s336_s29 = smul.u32 (!%p286_p8), 48, %s1557_s14 }
  0x29   : > { %289 = sbr.rel (%p286_p8) target bundleno = 379 (0x17b), region = 54  ;;  %p1222_p10 = scmp.ne.s32.totalorder (!%p286_p8), %s1557_s14, 0 }
  0x2a   : > { %s1429_s30 = smul.u32 (!%p286_p8), 192, %s292_s28  ;;  %p337_p9 = scmp.lt.s32.totalorder (!%p286_p8), %s336_s29, 143 }
  0x2c   : > { %s1708_s8 = scalar_lea.vmem (!%p286_p8), [#allocation3], %s1429_s30 }
  0x30   : > { %s1858_s29 = smov (!%p337_p9, %s336_s29), 143  ;;  %367 = sbr.rel (%p1222_p10) target bundleno = 58 (0x3a), region = 62 }
  0x31   : > { %s1221_s4 = sshll.u32 %s1858_s29, 2  ;;  %v1567_v32 = vmov (!%p1222_p10), 0.0  }
  0x32   : > { %s1706_s7 = scalar_lea.vmem %s1848_s1, %s1221_s4  ;;  %368 = vst [vmem:[#allocation2] sm:$0xff] (!%p1222_p10), %v1567_v32  ;;  %369 = vst [vmem:[#allocation2 + $0x8] sm:$0xff] (!%p1222_p10), %v1567_v32 }
  0x33   : > { %370 = vst [vmem:[#allocation2 + $0x10] sm:$0xff] (!%p1222_p10), %v1567_v32  ;;  %371 = vst [vmem:[#allocation2 + $0x18] sm:$0xff] (!%p1222_p10), %v1567_v32 }
  0x34   : > { %372 = vst [vmem:[#allocation2 + $0x20] sm:$0xff] (!%p1222_p10), %v1567_v32  ;;  %373 = vst [vmem:[#allocation2 + $0x28] sm:$0xff] (!%p1222_p10), %v1567_v32 }
  0x35   : > { %374 = vst [vmem:[#allocation2 + $0x30] sm:$0xff] (!%p1222_p10), %v1567_v32  ;;  %375 = vst [vmem:[#allocation2 + $0x38] sm:$0xff] (!%p1222_p10), %v1567_v32 }
  0x36   : > { %376 = vst [vmem:[#allocation2 + $0x40] sm:$0xff] (!%p1222_p10), %v1567_v32  ;;  %377 = vst [vmem:[#allocation2 + $0x48] sm:$0xff] (!%p1222_p10), %v1567_v32 }
  0x37   : > { %378 = vst [vmem:[#allocation2 + $0x50] sm:$0xff] %v1567_v32  ;;  %379 = vst [vmem:[#allocation2 + $0x58] sm:$0xff] %v1567_v32 }
  0x38   : > { %380 = vst [vmem:[#allocation2 + $0x60] sm:$0xff] %v1567_v32  ;;  %381 = vst [vmem:[#allocation2 + $0x68] sm:$0xff] %v1567_v32 }
  0x39   : > { %382 = vst [vmem:[#allocation2 + $0x70] sm:$0xff] %v1567_v32  ;;  %383 = vst [vmem:[#allocation2 + $0x78] sm:$0xff] %v1567_v32 }
  0x3a PF: > { %v1471_v33 = vld [vmem:[%s1706_s7 + $0x40] sm:$0xff]   ;;  %v1474_v36 = vld [vmem:[%s1706_s7 + $0x48] sm:$0xff]   ;;  %v1477_v39 = vld [vmem:[%s1706_s7 + $0x50] sm:$0xff]   ;;  %p1271_p11 = scmp.ne.s32.totalorder %s1557_s14, 2 }
  0x3b   : > { %v1472_v34 = vld [vmem:[%s1706_s7] sm:$0xff]   ;;  %1316 = vmatprep.subr.bf16.mxu0 %v1471_v33  ;;  %v1475_v37 = vld [vmem:[%s1706_s7 + $0x8] sm:$0xff]   ;;  %v1478_v40 = vld [vmem:[%s1706_s7 + $0x10] sm:$0xff]  }
  0x3c   : > { %v1473_v35 = vld [vmem:[%s1706_s7 + $0x80] sm:$0xff]   ;;  %1317 = vmatpush3.bf16.msra.mxu0 %v1472_v34  ;;  %v1476_v38 = vld [vmem:[%s1706_s7 + $0x88] sm:$0xff]   ;;  %v1479_v41 = vld [vmem:[%s1706_s7 + $0x90] sm:$0xff]  }
  0x3d   : > { %1396 = vmatprep.subr.bf16.mxu1 %v1473_v35  ;;  %1318 = vmatprep.subr.bf16.mxu0 %v1474_v36  ;;  %v1480_v42 = vld [vmem:[%s1706_s7 + $0x58] sm:$0xff]   ;;  %v1483_v45 = vld [vmem:[%s1706_s7 + $0x60] sm:$0xff]   ;;  %v1486_v48 = vld [vmem:[%s1706_s7 + $0x68] sm:$0xff]  }
  0x3e   : > { %1397 = vmatpush3.bf16.msra.mxu1 %v1473_v35  ;;  %v1481_v43 = vld [vmem:[%s1706_s7 + $0x18] sm:$0xff]   ;;  %v1485_v46 = vld [vmem:[%s1706_s7 + $0xa0] sm:$0xff]   ;;  %v1488_v49 = vld [vmem:[%s1706_s7 + $0xa8] sm:$0xff]  }
  0x3f   : > { %1398 = vmatprep.subr.bf16.mxu1 %v1476_v38  ;;  %v1482_v44 = vld [vmem:[%s1706_s7 + $0x98] sm:$0xff]   ;;  %v1484_v47 = vld [vmem:[%s1706_s7 + $0x20] sm:$0xff]   ;;  %v1487_v50 = vld [vmem:[%s1706_s7 + $0x28] sm:$0xff]  }
  0x40   : > { %1319 = vmatpush3.bf16.msra.mxu0 %v1475_v37  ;;  %v1489_v51 = vld [vmem:[%s1706_s7 + $0x70] sm:$0xff]   ;;  %v1492_v54 = vld [vmem:[%s1706_s7 + $0x78] sm:$0xff]   ;;  %v1495_v59 = vld [vmem:[%s1708_s8] ss:$12 sps:$4 sm:$0xff]  }
  0x41   : > { %1320 = vmatprep.subr.bf16.mxu0 %v1477_v39  ;;  %v1490_v52 = vld [vmem:[%s1706_s7 + $0x30] sm:$0xff]   ;;  %v1494_v55 = vld [vmem:[%s1706_s7 + $0xb8] sm:$0xff]   ;;  %v1499_v61 = vld [vmem:[%s1708_s8 + $0x20] ss:$12 sps:$4 sm:$0xff]  }
  0x42   : > { %1399 = vmatpush3.bf16.msra.mxu1 %v1476_v38  ;;  %v1491_v53 = vld [vmem:[%s1706_s7 + $0xb0] sm:$0xff]   ;;  %v1493_v58 = vld [vmem:[%s1706_s7 + $0x38] sm:$0xff]   ;;  %v1515_v5 = vld [vmem:[%s1708_s8 + $0x80] ss:$12 sps:$4 sm:$0xff]  }
  0x43   : > { %1400 = vmatprep.subr.bf16.mxu1 %v1479_v41  ;;  %v1497_v56 = vld [vmem:[%s1708_s8 + $0x4] ss:$12 sps:$4 sm:$0xff]   ;;  %v1498_v57 = vld [vmem:[%s1708_s8 + $0x8] ss:$12 sps:$4 sm:$0xff]   ;;  %v1508_v4 = vld [vmem:[%s1708_s8 + $0x4c] ss:$12 sps:$4 sm:$0xff]  }
  0x44   : > { %1321 = vmatpush3.bf16.msra.mxu0 %v1478_v40  ;;  %784 = vmatprep.mubr.bf16.mxu0 %v1497_v56  ;;  %v1500_v60 = vld [vmem:[%s1708_s8 + $0x1c] ss:$12 sps:$4 sm:$0xff]   ;;  %v1506_v62 = vld [vmem:[%s1708_s8 + $0x38] ss:$12 sps:$4 sm:$0xff]   ;;  %v1503_v0 = vld [vmem:[%s1708_s8 + $0x34] ss:$12 sps:$4 sm:$0xff]  }
  0x45   : > { %1322 = vmatprep.subr.bf16.mxu0 %v1480_v42  ;;  %1412 = vmatprep.mubr.bf16.mxu1 %v1498_v57  ;;  %v1502_v63 = vld [vmem:[%s1708_s8 + $0x18] ss:$12 sps:$4 sm:$0xff]   ;;  %v1507_v1 = vld [vmem:[%s1708_s8 + $0x50] ss:$12 sps:$4 sm:$0xff]   ;;  %v1514_v2 = vld [vmem:[%s1708_s8 + $0x68] ss:$12 sps:$4 sm:$0xff]  }
  0x46   : > { %1401 = vmatpush3.bf16.msra.mxu1 %v1479_v41  ;;  %v1505_v3 = vld [vmem:[%s1708_s8 + $0x30] ss:$12 sps:$4 sm:$0xff]   ;;  %v1522_v6 = vld [vmem:[%s1708_s8 + $0x98] ss:$12 sps:$4 sm:$0xff]   ;;  %v1510_v7 = vld [vmem:[%s1708_s8 + $0x48] ss:$12 sps:$4 sm:$0xff]  }
  0x47   : > { %1402 = vmatprep.subr.bf16.mxu1 %v1482_v44  ;;  %v1511_v8 = vld [vmem:[%s1708_s8 + $0x64] ss:$12 sps:$4 sm:$0xff]   ;;  %v1513_v10 = vld [vmem:[%s1708_s8 + $0x60] ss:$12 sps:$4 sm:$0xff]   ;;  %v1516_v11 = vld [vmem:[%s1708_s8 + $0x7c] ss:$12 sps:$4 sm:$0xff]  }
  0x48   : > { %1323 = vmatpush3.bf16.msra.mxu0 %v1481_v43  ;;  %v1523_v9 = vld [vmem:[%s1708_s8 + $0xb0] ss:$12 sps:$4 sm:$0xff]   ;;  %v1518_v12 = vld [vmem:[%s1708_s8 + $0x78] ss:$12 sps:$4 sm:$0xff]   ;;  %v1519_v13 = vld [vmem:[%s1708_s8 + $0x94] ss:$12 sps:$4 sm:$0xff]  }
  0x49   : > { %1324 = vmatprep.subr.bf16.mxu0 %v1483_v45  ;;  %v1521_v14 = vld [vmem:[%s1708_s8 + $0x90] ss:$12 sps:$4 sm:$0xff]   ;;  %v1524_v15 = vld [vmem:[%s1708_s8 + $0xac] ss:$12 sps:$4 sm:$0xff]   ;;  %v1526_v16 = vld [vmem:[%s1708_s8 + $0xa8] ss:$12 sps:$4 sm:$0xff]  }
  0x4a   : > { %1403 = vmatpush3.bf16.msra.mxu1 %v1482_v44  ;;  %v384_v23 = vld [vmem:[#allocation2] sm:$0xff]  ;;  %v385_v28 = vld [vmem:[#allocation2 + $0x8] sm:$0xff]  ;;  %v386_v38 = vld [vmem:[#allocation2 + $0x10] sm:$0xff] }
  0x4b   : > { %1404 = vmatprep.subr.bf16.mxu1 %v1485_v46  ;;  %v387_v44 = vld [vmem:[#allocation2 + $0x18] sm:$0xff] }
  0x4c   : > { %1325 = vmatpush3.bf16.msra.mxu0 %v1484_v47 }
  0x4d   : > { %1326 = vmatprep.subr.bf16.mxu0 %v1486_v48 }
  0x4e   : > { %1405 = vmatpush3.bf16.msra.mxu1 %v1485_v46 }
  0x4f   : > { %1406 = vmatprep.subr.bf16.mxu1 %v1488_v49 }
  0x50   : > { %1327 = vmatpush3.bf16.msra.mxu0 %v1487_v50 }
  0x51   : > { %1328 = vmatprep.subr.bf16.mxu0 %v1489_v51 }
  0x52   : > { %1407 = vmatpush3.bf16.msra.mxu1 %v1488_v49 }
  0x53   : > { %1408 = vmatprep.subr.bf16.mxu1 %v1491_v53 }
  0x54   : > { %1329 = vmatpush3.bf16.msra.mxu0 %v1490_v52 }
  0x55   : > { %1330 = vmatprep.subr.bf16.mxu0 %v1492_v54 }
  0x56   : > { %1409 = vmatpush3.bf16.msra.mxu1 %v1491_v53 }
  0x57   : > { %1410 = vmatprep.subr.bf16.mxu1 %v1494_v55 }
  0x58   : > { %1331 = vmatpush3.bf16.msra.mxu0 %v1493_v58 }
  0x5a   : > { %1411 = vmatpush3.bf16.msra.mxu1 %v1494_v55  ;;  %v388_v55 = vld [vmem:[#allocation2 + $0x20] sm:$0xff] }
  0x5b   : > { %785 = vmatmul.mubr.bf16.vlgmr.msra.gmra.mrb[0].mxu0 %v1495_v59 }
  0x5c   : > { %792 = vmatprep.mubr.bf16.mxu0 %v1500_v60  ;;  %v389_v60 = vld [vmem:[#allocation2 + $0x28] sm:$0xff] }
  0x5d   : > { %1413 = vmatmul.mubr.bf16.vlgmr.msra.gmra.mrb[0].mxu1 %v1499_v61 }
  0x5e   : > { %1416 = vmatprep.mubr.bf16.mxu1 %v1506_v62 }
  0x63   : > { %793 = vmatmul.mubr.bf16.gmra.mrb[4].mxu0 %v1502_v63 }
  0x64   : > { %800 = vmatprep.mubr.bf16.mxu0 %v1503_v0 }
  0x65   : > { %1417 = vmatmul.mubr.bf16.gmra.mrb[4].mxu1 %v1507_v1 }
  0x66   : > { %1420 = vmatprep.mubr.bf16.mxu1 %v1514_v2 }
  0x6b   : > { %801 = vmatmul.mubr.bf16.gmra.mrb[8].mxu0 %v1505_v3 }
  0x6c   : > { %808 = vmatprep.mubr.bf16.mxu0 %v1508_v4 }
  0x6d   : > { %1421 = vmatmul.mubr.bf16.gmra.mrb[8].mxu1 %v1515_v5 }
  0x6e   : > { %1424 = vmatprep.mubr.bf16.mxu1 %v1522_v6  ;;  %v390_v6 = vld [vmem:[#allocation2 + $0x30] sm:$0xff] }
  0x73   : > { %809 = vmatmul.mubr.bf16.gmra.mrb[12].mxu0 %v1510_v7 }
  0x74   : > { %816 = vmatprep.mubr.bf16.mxu0 %v1511_v8 }
  0x75   : > { %1425 = vmatmul.mubr.bf16.gmra.mrb[12].mxu1 %v1523_v9 }
  0x7b   : > { %817 = vmatmul.mubr.bf16.gmra.mrb[16].mxu0 %v1513_v10 }
  0x7c   : > { %824 = vmatprep.mubr.bf16.mxu0 %v1516_v11 }
  0x83   : > { %825 = vmatmul.mubr.bf16.gmra.mrb[20].mxu0 %v1518_v12  ;;  %v391_v12 = vld [vmem:[#allocation2 + $0x38] sm:$0xff] }
  0x84   : > { %832 = vmatprep.mubr.bf16.mxu0 %v1519_v13 }
  0x8b   : > { %833 = vmatmul.mubr.bf16.gmra.mrb[24].mxu0 %v1521_v14 }
  0x8c   : > { %840 = vmatprep.mubr.bf16.mxu0 %v1524_v15 }
  0x93   : > { %841 = vmatmul.mubr.bf16.gmra.mrb[28].mxu0 %v1526_v16 }
 0x12e   : > { %v1332_v17 = vpop.f32.mrb[0].mxu0 }
 0x12f   : > { %v1333_v18 = vpop.f32.mrb[1].mxu0 }
 0x130   : > { %v1334_v19 = vadd.f32 %v1333_v18, %v1332_v17  ;;  %v1335_v20 = vpop.f32.mrb[2].mxu0  ;;  %v1414_v21 = vpop.f32.mrb[0].mxu1 }
 0x131   : > { %v1336_v22 = vpop.f32.mrb[3].mxu0  ;;  %v883_v24 = vpop.f32.mrb[1].mxu1 }
 0x132   : > { %v1337_v25 = vadd.f32 %v1336_v22, %v1335_v20  ;;  %v884_v26 = vadd.f32 %v1334_v19, %v883_v24  ;;  %v1415_v27 = vpop.f32.mrb[2].mxu1  ;;  %v392_v22 = vld [vmem:[#allocation2 + $0x40] sm:$0xff] }
 0x133   : > { %v886_v29 = vpop.f32.mrb[3].mxu1 }
 0x134   : > { %v946_v30 = vadd.f32 %v884_v26, %v384_v23  ;;  %v887_v31 = vadd.f32 %v1337_v25, %v886_v29  ;;  %v393_v25 = vld [vmem:[#allocation2 + $0x48] sm:$0xff] }
 0x136   : > { %962 = vst [vmem:[#allocation2] sm:$0xff] %v946_v30  ;;  %v947_v32 = vadd.f32 %v887_v31, %v385_v28  ;;  %v1338_v33 = vpop.f32.mrb[4].mxu0 }
 0x137   : > { %v1339_v34 = vpop.f32.mrb[5].mxu0 }
 0x138   : > { %963 = vst [vmem:[#allocation2 + $0x8] sm:$0xff] %v947_v32  ;;  %v1340_v35 = vadd.f32 %v1339_v34, %v1338_v33  ;;  %v1341_v36 = vpop.f32.mrb[6].mxu0  ;;  %v1418_v37 = vpop.f32.mrb[4].mxu1  ;;  %v394_v33 = vld [vmem:[#allocation2 + $0x50] sm:$0xff] }
 0x139   : > { %v1342_v39 = vpop.f32.mrb[7].mxu0  ;;  %v899_v40 = vpop.f32.mrb[5].mxu1 }
 0x13a   : > { %v892_v41 = vadd.f32 %v1414_v21, %v1340_v35  ;;  %v1343_v42 = vadd.f32 %v1342_v39, %v1341_v36  ;;  %v1419_v43 = vpop.f32.mrb[6].mxu1 }
 0x13b   : > { %v902_v45 = vpop.f32.mrb[7].mxu1 }
 0x13c   : > { %v948_v46 = vadd.f32 %v892_v41, %v386_v38  ;;  %v895_v47 = vadd.f32 %v1415_v27, %v1343_v42 }
 0x13e   : > { %964 = vst [vmem:[#allocation2 + $0x10] sm:$0xff] %v948_v46  ;;  %v949_v48 = vadd.f32 %v895_v47, %v387_v44  ;;  %v1344_v49 = vpop.f32.mrb[8].mxu0  ;;  %v396_v46 = vld [vmem:[#allocation2 + $0x60] sm:$0xff] }
 0x13f   : > { %v1345_v50 = vpop.f32.mrb[9].mxu0 }
 0x140   : > { %965 = vst [vmem:[#allocation2 + $0x18] sm:$0xff] %v949_v48  ;;  %v1346_v51 = vadd.f32 %v1345_v50, %v1344_v49  ;;  %v1347_v52 = vpop.f32.mrb[10].mxu0  ;;  %v1422_v53 = vpop.f32.mrb[8].mxu1  ;;  %v397_v49 = vld [vmem:[#allocation2 + $0x68] sm:$0xff] }
 0x141   : > { %v1348_v54 = vpop.f32.mrb[11].mxu0  ;;  %v915_v56 = vpop.f32.mrb[9].mxu1 }
 0x142   : > { %v1349_v57 = vadd.f32 %v1348_v54, %v1347_v52  ;;  %v900_v58 = vadd.f32 %v1346_v51, %v899_v40  ;;  %v1423_v59 = vpop.f32.mrb[10].mxu1 }
 0x143   : > { %v918_v61 = vpop.f32.mrb[11].mxu1 }
 0x144   : > { %v950_v62 = vadd.f32 %v900_v58, %v388_v55  ;;  %v903_v63 = vadd.f32 %v1349_v57, %v902_v45  ;;  %v398_v57 = vld [vmem:[#allocation2 + $0x70] sm:$0xff] }
 0x146   : > { %966 = vst [vmem:[#allocation2 + $0x20] sm:$0xff] %v950_v62  ;;  %v951_v0 = vadd.f32 %v903_v63, %v389_v60  ;;  %v1350_v1 = vpop.f32.mrb[12].mxu0 }
 0x147   : > { %v1351_v2 = vpop.f32.mrb[13].mxu0 }
 0x148   : > { %967 = vst [vmem:[#allocation2 + $0x28] sm:$0xff] %v951_v0  ;;  %v1352_v3 = vadd.f32 %v1351_v2, %v1350_v1  ;;  %v1353_v4 = vpop.f32.mrb[14].mxu0  ;;  %v1426_v5 = vpop.f32.mrb[12].mxu1  ;;  %v982_v1 = vld [vmem:[#allocation2] sm:$0xff] (!%p1271_p11) }
 0x149   : > { %v1354_v7 = vpop.f32.mrb[15].mxu0  ;;  %v931_v8 = vpop.f32.mrb[13].mxu1  ;;  %v1278_v2 = vld [vmem:[%s1849_s2] sm:$0xff] (!%p1271_p11)  }
 0x14a   : > { %v908_v9 = vadd.f32 %v1418_v37, %v1352_v3  ;;  %v1355_v10 = vadd.f32 %v1354_v7, %v1353_v4  ;;  %v1427_v11 = vpop.f32.mrb[14].mxu1  ;;  %v395_v37 = vld [vmem:[#allocation2 + $0x58] sm:$0xff]  ;;  %v983_v3 = vld [vmem:[#allocation2 + $0x8] sm:$0xff] (!%p1271_p11)  ;;  %v1279_v4 = vunpack.c.l.bf16 (!%p1271_p11), %v1278_v2  ;;  %v984_v7 = vld [vmem:[#allocation2 + $0x10] sm:$0xff] (!%p1271_p11) }
 0x14b   : > { %v934_v13 = vpop.f32.mrb[15].mxu1 }
 0x14c   : > { %v952_v14 = vadd.f32 %v908_v9, %v390_v6  ;;  %v911_v15 = vadd.f32 %v1419_v43, %v1355_v10  ;;  %v1280_v6 = vunpack.c.h.bf16 (!%p1271_p11), %v1278_v2 }
 0x14e   : > { %968 = vst [vmem:[#allocation2 + $0x30] sm:$0xff] %v952_v14  ;;  %v953_v16 = vadd.f32 %v911_v15, %v391_v12  ;;  %v1356_v17 = vpop.f32.mrb[16].mxu0  ;;  %v1310_v12 = vld [vmem:[%s1849_s2 + $0x10] sm:$0xff] (!%p1271_p11)   ;;  %v1030_v14 = vadd.f32 (!%p1271_p11), %v1279_v4, %v982_v1  ;;  %v1031_v15 = vadd.f32 (!%p1271_p11), %v1280_v6, %v983_v3 }
 0x14f   : > { %v1357_v18 = vpop.f32.mrb[17].mxu0 }
 0x150   : > { %969 = vst [vmem:[#allocation2 + $0x38] sm:$0xff] %v953_v16  ;;  %v1358_v19 = vadd.f32 %v1357_v18, %v1356_v17  ;;  %v1359_v20 = vpop.f32.mrb[18].mxu0  ;;  %v1287_v16 = vunpack.c.l.bf16 (!%p1271_p11), %v1310_v12  ;;  %v1288_v17 = vunpack.c.h.bf16 (!%p1271_p11), %v1310_v12  ;;  %1046 = vst [vmem:[%s1850_s3] sm:$0xff] (!%p1271_p11), %v1030_v14 }
 0x151   : > { %v1360_v21 = vpop.f32.mrb[19].mxu0  ;;  %1047 = vst [vmem:[%s1850_s3 + $0x8] sm:$0xff] (!%p1271_p11), %v1031_v15 }
 0x152   : > { %v1361_v23 = vadd.f32 %v1360_v21, %v1359_v20  ;;  %v916_v24 = vadd.f32 %v1358_v19, %v915_v56  ;;  %v1311_v19 = vld [vmem:[%s1849_s2 + $0x18] sm:$0xff] (!%p1271_p11)  }
 0x154   : > { %v954_v26 = vadd.f32 %v916_v24, %v392_v22  ;;  %v919_v27 = vadd.f32 %v1361_v23, %v918_v61  ;;  %v399_v61 = vld [vmem:[#allocation2 + $0x78] sm:$0xff]  ;;  %v1291_v23 = vunpack.c.l.bf16 (!%p1271_p11), %v1311_v19  ;;  %v1292_v24 = vunpack.c.h.bf16 (!%p1271_p11), %v1311_v19 }
 0x155   : > { %v988_v18 = vld [vmem:[#allocation2 + $0x30] sm:$0xff] (!%p1271_p11) }
 0x156   : > { %970 = vst [vmem:[#allocation2 + $0x40] sm:$0xff] %v954_v26  ;;  %v955_v28 = vadd.f32 %v919_v27, %v393_v25  ;;  %v1362_v29 = vpop.f32.mrb[20].mxu0  ;;  %v1312_v26 = vld [vmem:[%s1849_s2 + $0x20] sm:$0xff] (!%p1271_p11)  }
 0x157   : > { %v1363_v30 = vpop.f32.mrb[21].mxu0  ;;  %v989_v20 = vld [vmem:[#allocation2 + $0x38] sm:$0xff] (!%p1271_p11) }
 0x158   : > { %971 = vst [vmem:[#allocation2 + $0x48] sm:$0xff] %v955_v28  ;;  %v1364_v31 = vadd.f32 %v1363_v30, %v1362_v29  ;;  %v1365_v32 = vpop.f32.mrb[22].mxu0  ;;  %v1295_v30 = vunpack.c.l.bf16 (!%p1271_p11), %v1312_v26 }
 0x159   : > { %v1366_v34 = vpop.f32.mrb[23].mxu0 }
 0x15a   : > { %v924_v35 = vadd.f32 %v1422_v53, %v1364_v31  ;;  %v1367_v36 = vadd.f32 %v1366_v34, %v1365_v32  ;;  %v1296_v31 = vunpack.c.h.bf16 (!%p1271_p11), %v1312_v26 }
 0x15c   : > { %v956_v38 = vadd.f32 %v924_v35, %v394_v33  ;;  %v927_v39 = vadd.f32 %v1423_v59, %v1367_v36  ;;  %v1313_v33 = vld [vmem:[%s1849_s2 + $0x28] sm:$0xff] (!%p1271_p11)   ;;  %v1036_v35 = vadd.f32 (!%p1271_p11), %v1291_v23, %v988_v18  ;;  %v1037_v36 = vadd.f32 (!%p1271_p11), %v1292_v24, %v989_v20 }
 0x15d   : > { %v990_v25 = vld [vmem:[#allocation2 + $0x40] sm:$0xff] (!%p1271_p11) }
 0x15e   : > { %972 = vst [vmem:[#allocation2 + $0x50] sm:$0xff] %v956_v38  ;;  %v957_v40 = vadd.f32 %v927_v39, %v395_v37  ;;  %v1368_v41 = vpop.f32.mrb[24].mxu0  ;;  %v1299_v37 = vunpack.c.l.bf16 (!%p1271_p11), %v1313_v33  ;;  %v1300_v38 = vunpack.c.h.bf16 (!%p1271_p11), %v1313_v33  ;;  %1052 = vst [vmem:[%s1850_s3 + $0x30] sm:$0xff] (!%p1271_p11), %v1036_v35 }
 0x15f   : > { %v1369_v42 = vpop.f32.mrb[25].mxu0  ;;  %v991_v27 = vld [vmem:[#allocation2 + $0x48] sm:$0xff] (!%p1271_p11)  ;;  %1053 = vst [vmem:[%s1850_s3 + $0x38] sm:$0xff] (!%p1271_p11), %v1037_v36 }
 0x160   : > { %973 = vst [vmem:[#allocation2 + $0x58] sm:$0xff] %v957_v40  ;;  %v1370_v43 = vadd.f32 %v1369_v42, %v1368_v41  ;;  %v1371_v44 = vpop.f32.mrb[26].mxu0  ;;  %v1314_v40 = vld [vmem:[%s1849_s2 + $0x30] sm:$0xff] (!%p1271_p11)   ;;  %v1038_v42 = vadd.f32 (!%p1271_p11), %v1295_v30, %v990_v25 }
 0x161   : > { %v1372_v45 = vpop.f32.mrb[27].mxu0 }
 0x162   : > { %v1373_v47 = vadd.f32 %v1372_v45, %v1371_v44  ;;  %v932_v48 = vadd.f32 %v1370_v43, %v931_v8  ;;  %v985_v8 = vld [vmem:[#allocation2 + $0x18] sm:$0xff] (!%p1271_p11)  ;;  %v1039_v43 = vadd.f32 (!%p1271_p11), %v1296_v31, %v991_v27  ;;  %v1303_v44 = vunpack.c.l.bf16 (!%p1271_p11), %v1314_v40  ;;  %1054 = vst [vmem:[%s1850_s3 + $0x40] sm:$0xff] (!%p1271_p11), %v1038_v42 }
 0x163   : > { %v1304_v45 = vunpack.c.h.bf16 (!%p1271_p11), %v1314_v40 }
 0x164   : > { %v958_v50 = vadd.f32 %v932_v48, %v396_v46  ;;  %v935_v51 = vadd.f32 %v1373_v47, %v934_v13  ;;  %v987_v13 = vld [vmem:[#allocation2 + $0x28] sm:$0xff] (!%p1271_p11)  ;;  %v1315_v47 = vld [vmem:[%s1849_s2 + $0x38] sm:$0xff] (!%p1271_p11)   ;;  %1055 = vst [vmem:[%s1850_s3 + $0x48] sm:$0xff] (!%p1271_p11), %v1039_v43 }
 0x165   : > { %v1035_v29 = vadd.f32 (!%p1271_p11), %v1288_v17, %v987_v13  ;;  %v992_v32 = vld [vmem:[#allocation2 + $0x50] sm:$0xff] (!%p1271_p11) }
 0x166   : > { %974 = vst [vmem:[#allocation2 + $0x60] sm:$0xff] %v958_v50  ;;  %v959_v52 = vadd.f32 %v935_v51, %v397_v49  ;;  %v1374_v53 = vpop.f32.mrb[28].mxu0  ;;  %v1040_v49 = vadd.f32 (!%p1271_p11), %v1299_v37, %v992_v32  ;;  %v1307_v51 = vunpack.c.l.bf16 (!%p1271_p11), %v1315_v47 }
 0x167   : > { %v1375_v54 = vpop.f32.mrb[29].mxu0  ;;  %v993_v34 = vld [vmem:[#allocation2 + $0x58] sm:$0xff] (!%p1271_p11)  ;;  %1051 = vst [vmem:[%s1850_s3 + $0x28] sm:$0xff] (!%p1271_p11), %v1035_v29 }
 0x168   : > { %975 = vst [vmem:[#allocation2 + $0x68] sm:$0xff] %v959_v52  ;;  %v1376_v55 = vadd.f32 %v1375_v54, %v1374_v53  ;;  %v1377_v56 = vpop.f32.mrb[30].mxu0  ;;  %v1041_v50 = vadd.f32 (!%p1271_p11), %v1300_v38, %v993_v34  ;;  %v1308_v52 = vunpack.c.h.bf16 (!%p1271_p11), %v1315_v47  ;;  %1056 = vst [vmem:[%s1850_s3 + $0x50] sm:$0xff] (!%p1271_p11), %v1040_v49 }
 0x169   : > { %v1378_v58 = vpop.f32.mrb[31].mxu0 }
 0x16a   : > { %v940_v59 = vadd.f32 %v1426_v5, %v1376_v55  ;;  %v1379_v60 = vadd.f32 %v1378_v58, %v1377_v56  ;;  %981 = sbr.rel (%p1271_p11) target bundleno = 379 (0x17b), region = 66  ;;  %v1309_v5 = vld [vmem:[%s1849_s2 + $0x8] sm:$0xff] (!%p1271_p11)   ;;  %1057 = vst [vmem:[%s1850_s3 + $0x58] sm:$0xff] (!%p1271_p11), %v1041_v50 }
 0x16b   : > { %v1283_v9 = vunpack.c.l.bf16 (!%p1271_p11), %v1309_v5  ;;  %v1284_v10 = vunpack.c.h.bf16 (!%p1271_p11), %v1309_v5 }
 0x16c   : > { %v960_v62 = vadd.f32 %v940_v59, %v398_v57  ;;  %v943_v63 = vadd.f32 %v1427_v11, %v1379_v60  ;;  %v986_v11 = vld [vmem:[#allocation2 + $0x20] sm:$0xff] (!%p1271_p11) }
 0x16d   : > { %v1032_v21 = vadd.f32 (!%p1271_p11), %v1283_v9, %v984_v7  ;;  %v1033_v22 = vadd.f32 (!%p1271_p11), %v1284_v10, %v985_v8  ;;  %v1034_v28 = vadd.f32 (!%p1271_p11), %v1287_v16, %v986_v11  ;;  %v994_v39 = vld [vmem:[#allocation2 + $0x60] sm:$0xff] (!%p1271_p11) }
 0x16e   : > { %976 = vst [vmem:[#allocation2 + $0x70] sm:$0xff] %v960_v62  ;;  %v961_v0 = vadd.f32 %v943_v63, %v399_v61  ;;  %v1042_v53 = vadd.f32 (!%p1271_p11), %v1303_v44, %v994_v39 }
 0x16f   : > { %1048 = vst [vmem:[%s1850_s3 + $0x10] sm:$0xff] (!%p1271_p11), %v1032_v21  ;;  %1049 = vst [vmem:[%s1850_s3 + $0x18] sm:$0xff] (!%p1271_p11), %v1033_v22  ;;  %v995_v41 = vld [vmem:[#allocation2 + $0x68] sm:$0xff] (!%p1271_p11) }
 0x170   : > { %977 = vst [vmem:[#allocation2 + $0x78] sm:$0xff] %v961_v0  ;;  %1050 = vst [vmem:[%s1850_s3 + $0x20] sm:$0xff] (!%p1271_p11), %v1034_v28  ;;  %v1043_v54 = vadd.f32 (!%p1271_p11), %v1304_v45, %v995_v41 }
 0x171   : > { %1058 = vst [vmem:[%s1850_s3 + $0x60] sm:$0xff] %v1042_v53 }
 0x172   : > { %1059 = vst [vmem:[%s1850_s3 + $0x68] sm:$0xff] %v1043_v54 }
 0x175   : > { %v996_v46 = vld [vmem:[#allocation2 + $0x70] sm:$0xff] }
 0x176   : > { %v1044_v55 = vadd.f32 %v1307_v51, %v996_v46 }
 0x177   : > { %v997_v48 = vld [vmem:[#allocation2 + $0x78] sm:$0xff] }
 0x178   : > { %v1045_v56 = vadd.f32 %v1308_v52, %v997_v48  ;;  %1060 = vst [vmem:[%s1850_s3 + $0x70] sm:$0xff] %v1044_v55 }
 0x17a   : > { %1061 = vst [vmem:[%s1850_s3 + $0x78] sm:$0xff] %v1045_v56 }
 0x17b PF: > { %s13_s16 = sadd.s32 1, %s1565_s16   ;;  %s1851_s12 = smov %s1553_s13 }
 0x17c   : > { %p10_p12 = scmp.ge.s32.totalorder %s13_s16, 5   ;;  %s1852_s13 = smov %s1623_s20 }
 0x17d   : > { %s1853_s14 = smov %s1561_s15  ;;  %s1854_s15 = smov %s1856_s17 }
 0x17e   :  { %12 = sbr.rel (!%p10_p12) target bundleno = 3 (0x3), region = 113 }

</bundles_post_ra>
